<compile_context>
chip_gen: v6e
topology: v6e:2x2x1
jax: 0.10.0
libtpu: 0.0.40
codegen_flags: <defaults>
</compile_context>

<pallas_src>
import functools

import jax
import jax.numpy as jnp
import numpy as np
from jax import lax
from jax.experimental import pallas as pl
from jax.experimental.pallas import tpu as pltpu


# ----------------------------------------------------------------------------
# In-kernel helper: stride-1 "valid" conv on an NHWC VMEM-resident value.
# ----------------------------------------------------------------------------
def _conv_block(x, w_ref, b_ref, kh, kw, oh, ow):
    """x: (bt, H, W, Cin) value, already in the MXU compute dtype.
    w_ref: (kh*kw, Cin, OC); b_ref: (1, OC) f32.
    Returns relu(conv(x) + b) as (bt*oh*ow, OC) f32, rows in (b, y, x) order."""
    bt = x.shape[0]
    cin = x.shape[-1]
    oc = w_ref.shape[-1]
    acc = jnp.zeros((bt * oh * ow, oc), jnp.float32)
    for i in range(kh):
        for j in range(kw):
            win = x[:, i:i + oh, j:j + ow, :].reshape(bt * oh * ow, cin)
            acc = acc + jnp.dot(win, w_ref[i * kw + j],
                                preferred_element_type=jnp.float32)
    return jnp.maximum(acc + b_ref[...], 0.0)


# ----------------------------------------------------------------------------
# The single fused kernel: conv1 + conv2 + conv3 + sensor_fc + fc1 + fc2.
# ----------------------------------------------------------------------------
def _qnet_kernel(xp_ref, sensor_ref, action_ref,
                 w1_ref, b1_ref, w2_ref, b2_ref, w3_ref, b3_ref,
                 ws_ref, bs_ref,
                 w1c_ref, w1s_ref, w1a_ref, b1fc_ref,
                 wq_ref, bq_ref,
                 o_ref, *, oh1, ow1, oh2, ow2, oh3, ow3, cin1):
    bt = xp_ref.shape[0]
    cdt = w1_ref.dtype
    yh, xh = oh1 // 2, ow1 // 2
    oc1 = w1_ref.shape[-1]

    xp = xp_ref[...]                                   # (bt, ih, xh+1, 2*cin1)

    # conv1 (8x8 stride 4 == 2x2 stride-1 on the s2d(4) image), emitted directly
    # in space-to-depth(2) channel order (ry, rx, c): no activation repack ever
    # leaves VMEM, and conv2 becomes a stride-1 conv.
    groups = []
    for rx in range(2):
        acc = jnp.zeros((bt * oh1 * xh, oc1), jnp.float32)
        for i in range(2):
            for j in range(2):
                ac = rx + j                            # absolute column tap
                pc, qc = ac % 2, ac // 2               # parity / half-index
                win = xp[:, i:i + oh1, qc:qc + xh, pc * cin1:(pc + 1) * cin1]
                win = win.reshape(bt * oh1 * xh, cin1)
                acc = acc + jnp.dot(win, w1_ref[i * 2 + j],
                                    preferred_element_type=jnp.float32)
        groups.append(jnp.maximum(acc + b1_ref[...], 0.0).astype(cdt))
    y1 = jnp.concatenate(groups, axis=-1)              # (bt*oh1*xh, 2*oc1): (rx, c)
    y1 = y1.reshape(bt, yh, 2, xh, 2 * oc1)            # output row = 2*Y + ry
    a1 = jnp.concatenate([y1[:, :, 0], y1[:, :, 1]], axis=-1)  # (bt, yh, xh, 4*oc1)

    # conv2 (4x4 stride 2 == 2x2 stride-1 on the s2d(2) activation).
    a2 = _conv_block(a1, w2_ref, b2_ref, 2, 2, oh2, ow2)
    a2 = a2.astype(cdt).reshape(bt, oh2, ow2, -1)

    # conv3 (3x3 stride 1).
    oc3 = w3_ref.shape[-1]
    a3 = _conv_block(a2, w3_ref, b3_ref, 3, 3, oh3, ow3)        # (bt*p3, 64) f32
    a3 = a3.astype(cdt).reshape(bt, oh3 * ow3 * oc3)            # NHWC flatten (y,x,c)

    # sensor_fc + ReLU.
    hs = jnp.dot(sensor_ref[...], ws_ref[...], preferred_element_type=jnp.float32)
    hs = jnp.maximum(hs + bs_ref[...], 0.0).astype(cdt)

    # fc1: concat(conv_flat, sensor_x, action) @ W == three partial matmuls,
    # with the conv part issued as ONE K = p3*64 contraction.
    h = jnp.dot(a3, w1c_ref[...], preferred_element_type=jnp.float32)
    h = h + jnp.dot(hs, w1s_ref[...], preferred_element_type=jnp.float32)
    h = h + jnp.dot(action_ref[...], w1a_ref[...], preferred_element_type=jnp.float32)
    h = jnp.maximum(h + b1fc_ref[...], 0.0)                     # (bt, 512) f32

    # fc2 (N=1): VPU multiply + lane reduction; broadcast across 128 lanes so the
    # output store is an unmasked full-lane store (wrapper keeps column 0).
    prod = h * wq_ref[...].astype(jnp.float32)                  # (bt, 512)
    q = jnp.sum(prod, axis=-1, keepdims=True) + bq_ref[...]     # (bt, 1)
    o_ref[...] = jnp.broadcast_to(q, (bt, o_ref.shape[-1])).astype(o_ref.dtype)


# ----------------------------------------------------------------------------
# Geometry / one-time weight packing.
# ----------------------------------------------------------------------------
def _conv_geometry(input_shape):
    _, h, w = input_shape

    def out(sz, k, s):
        return (sz - k) // s + 1

    h1, w1 = out(h, 8, 4), out(w, 8, 4)
    h2, w2 = out(h1, 4, 2), out(w1, 4, 2)
    h3, w3 = out(h2, 3, 1), out(w2, 3, 1)
    return (h1, w1), (h2, w2), (h3, w3)


def pack_params(params, input_shape, compute_dtype=jnp.bfloat16):
    """One-time packing of PyTorch-layout params for the Pallas forward.

    Default compute_dtype is bf16 (MXU-native on all generations); accumulation,
    bias and ReLU stay f32 in-kernel.  Pass jnp.float32 for an exact path."""
    _, h, w = input_shape
    (h1, w1), (h2, w2), (h3, w3) = _conv_geometry(input_shape)
    assert h % 4 == 0 and w % 4 == 0 and h1 % 2 == 0 and w1 % 2 == 0, (
        "spatial dims must be divisible by the conv strides for the s2d repack")
    cdt = compute_dtype

    def conv_pack(w_oihw, stride):
        # A stride-s conv on a space-to-depth(s) input == stride-1 conv over
        # (k/s)x(k/s) cells; within-cell features ordered (ry, rx, c).
        oc, ic, kh, kw = w_oihw.shape
        ch, cw = kh // stride, kw // stride
        t = jnp.transpose(w_oihw, (2, 3, 1, 0))                 # (kh, kw, ic, oc)
        t = t.reshape(ch, stride, cw, stride, ic, oc)           # (di, ry, dj, rx, ic, oc)
        t = jnp.transpose(t, (0, 2, 1, 3, 4, 5))                # (di, dj, ry, rx, ic, oc)
        return t.reshape(ch * cw, stride * stride * ic, oc)

    conv_out = 64 * h3 * w3
    fc1_w = params["fc1_w"]                                     # (512, conv_out+64+A)
    # Conv part of fc1: permute NCHW-flatten columns to NHWC flatten (y, x, c)
    # order and pre-flatten to a single (p3*64, 512) contraction operand.
    w1c = fc1_w[:, :conv_out].reshape(512, 64, h3, w3)
    w1c = jnp.transpose(w1c, (2, 3, 1, 0)).reshape(h3 * w3 * 64, 512)
    w1s = fc1_w[:, conv_out:conv_out + 64].T                    # (64, 512)
    w1a = fc1_w[:, conv_out + 64:].T                            # (A, 512)

    return {
        "conv1_w": conv_pack(params["conv1_w"], 4).astype(cdt),  # (4, 16C, 32)
        "conv1_b": params["conv1_b"].reshape(1, -1).astype(jnp.float32),
        "conv2_w": conv_pack(params["conv2_w"], 2).astype(cdt),  # (4, 128, 64)
        "conv2_b": params["conv2_b"].reshape(1, -1).astype(jnp.float32),
        "conv3_w": conv_pack(params["conv3_w"], 1).astype(cdt),  # (9, 64, 64)
        "conv3_b": params["conv3_b"].reshape(1, -1).astype(jnp.float32),
        "sensor_w": params["sensor_w"].T.astype(cdt),             # (S, 64)
        "sensor_b": params["sensor_b"].reshape(1, -1).astype(jnp.float32),
        "fc1_wc": w1c.astype(cdt),                                # (p3*64, 512)
        "fc1_ws": w1s.astype(cdt),                                # (64, 512)
        "fc1_wa": w1a.astype(cdt),                                # (A, 512)
        "fc1_b": params["fc1_b"].reshape(1, -1).astype(jnp.float32),
        "fc2_w": params["fc2_w"].astype(jnp.float32),             # (1, 512), VPU path
        "fc2_b": params["fc2_b"].reshape(1, 1).astype(jnp.float32),
    }


# ----------------------------------------------------------------------------
# Forward pass (single pallas_call).
# ----------------------------------------------------------------------------
def _space_to_depth(x_nhwc, blk):
    b, h, w, c = x_nhwc.shape
    x = x_nhwc.reshape(b, h // blk, blk, w // blk, blk, c)
    x = jnp.transpose(x, (0, 1, 3, 2, 4, 5))
    return x.reshape(b, h // blk, w // blk, blk * blk * c)


def _const_spec(arr):
    nd = arr.ndim
    idx = lambda i, nd=nd: (0,) * nd
    try:
        # Constant index_map -> the weight stays VMEM-resident; single-buffer it.
        return pl.BlockSpec(arr.shape, idx, pipeline_mode=pl.Buffered(1))
    except (TypeError, AttributeError):
        return pl.BlockSpec(arr.shape, idx)


def _batched_spec(block_shape):
    nd = len(block_shape)
    return pl.BlockSpec(block_shape, lambda i, nd=nd: (i,) + (0,) * (nd - 1))


def _vmem_limit_bytes():
    # ~3/4 of physical VMEM per chip generation (48 MiB on v7x, 96 MiB on v5e/v6e).
    try:
        cap = pltpu.get_tpu_info().vmem_capacity_bytes
        return int(min(cap * 3 // 4, 96 * 1024 * 1024))
    except Exception:
        return 32 * 1024 * 1024


def qnetwork_forward(packed, image, sensor_data, action, *, batch_tile=64):
    """image: (B, C, H, W) f32; sensor_data: (B, S); action: (B, A). Returns (B, 1).

    batch_tile: raise to 128 on v6e (128 MiB VMEM); keep the grid >= 2 steps on
    v7x so both TensorCores are used for large batches."""
    B, C, H, W = image.shape
    (h1, w1), (h2, w2), (h3, w3) = _conv_geometry((C, H, W))
    ih, iw = H // 4, W // 4
    xh = w1 // 2
    cin1 = 16 * C
    cdt = packed["conv1_w"].dtype

    bt = B if B <= batch_tile else batch_tile
    Bp = ((B + bt - 1) // bt) * bt

    def pad_b(x):
        if x.shape[0] == Bp:
            return x
        return jnp.pad(x, [(0, Bp - x.shape[0])] + [(0, 0)] * (x.ndim - 1))

    image = pad_b(image)
    sensor_data = pad_b(sensor_data).astype(cdt)
    action = pad_b(action).astype(cdt)

    # One-time layout work per forward (cheap bijective repacks of the raw image):
    # NCHW -> NHWC -> space-to-depth(4) -> fold column parity into the channel dim.
    # Result is 128-lane dense; inside the kernel every conv window is a contiguous
    # VMEM slice and conv1 can emit its output directly in s2d(2) order.
    xs = _space_to_depth(jnp.transpose(image, (0, 2, 3, 1)), 4)   # (Bp, ih, iw, 16C)
    pad_w = 2 * (xh + 1) - iw
    if pad_w:
        xs = jnp.pad(xs, ((0, 0), (0, 0), (0, pad_w), (0, 0)))
    xp = xs.reshape(Bp, ih, xh + 1, 2 * cin1).astype(cdt)

    grid = (Bp // bt,)
    q = pl.pallas_call(
        functools.partial(_qnet_kernel, oh1=h1, ow1=w1, oh2=h2, ow2=w2,
                          oh3=h3, ow3=w3, cin1=cin1),
        out_shape=jax.ShapeDtypeStruct((Bp, 128), jnp.float32),
        grid=grid,
        in_specs=[
            _batched_spec((bt, ih, xh + 1, 2 * cin1)),
            _batched_spec((bt, sensor_data.shape[-1])),
            _batched_spec((bt, action.shape[-1])),
            _const_spec(packed["conv1_w"]), _const_spec(packed["conv1_b"]),
            _const_spec(packed["conv2_w"]), _const_spec(packed["conv2_b"]),
            _const_spec(packed["conv3_w"]), _const_spec(packed["conv3_b"]),
            _const_spec(packed["sensor_w"]), _const_spec(packed["sensor_b"]),
            _const_spec(packed["fc1_wc"]), _const_spec(packed["fc1_ws"]),
            _const_spec(packed["fc1_wa"]), _const_spec(packed["fc1_b"]),
            _const_spec(packed["fc2_w"]), _const_spec(packed["fc2_b"]),
        ],
        out_specs=_batched_spec((bt, 128)),
        compiler_params=pltpu.CompilerParams(
            dimension_semantics=("parallel",),
            vmem_limit_bytes=_vmem_limit_bytes()),
    )(xp, sensor_data, action,
      packed["conv1_w"], packed["conv1_b"],
      packed["conv2_w"], packed["conv2_b"],
      packed["conv3_w"], packed["conv3_b"],
      packed["sensor_w"], packed["sensor_b"],
      packed["fc1_wc"], packed["fc1_ws"], packed["fc1_wa"], packed["fc1_b"],
      packed["fc2_w"], packed["fc2_b"])

    return q[:B, :1]


# ----------------------------------------------------------------------------
# Parameter init (PyTorch layout) and pure-JAX reference (for cross-check).
# ----------------------------------------------------------------------------
def init_params(key, input_shape, sensor_dim, action_dim):
    c_in, _, _ = input_shape
    (_, _), (_, _), (h3, w3) = _conv_geometry(input_shape)
    conv_out_size = 64 * h3 * w3

    ks = jax.random.split(key, 12)
    s = 0.05
    return {
        "conv1_w": jax.random.normal(ks[0], (32, c_in, 8, 8), jnp.float32) * s,
        "conv1_b": jax.random.normal(ks[1], (32,), jnp.float32) * s,
        "conv2_w": jax.random.normal(ks[2], (64, 32, 4, 4), jnp.float32) * s,
        "conv2_b": jax.random.normal(ks[3], (64,), jnp.float32) * s,
        "conv3_w": jax.random.normal(ks[4], (64, 64, 3, 3), jnp.float32) * s,
        "conv3_b": jax.random.normal(ks[5], (64,), jnp.float32) * s,
        "sensor_w": jax.random.normal(ks[6], (64, sensor_dim), jnp.float32) * s,
        "sensor_b": jax.random.normal(ks[7], (64,), jnp.float32) * s,
        "fc1_w": jax.random.normal(
            ks[8], (512, conv_out_size + 64 + action_dim), jnp.float32) * s,
        "fc1_b": jax.random.normal(ks[9], (512,), jnp.float32) * s,
        "fc2_w": jax.random.normal(ks[10], (1, 512), jnp.float32) * s,
        "fc2_b": jax.random.normal(ks[11], (1,), jnp.float32) * s,
    }


def qnetwork_reference(params, image, sensor_data, action):
    def conv(x, w, b, s):
        y = lax.conv_general_dilated(
            x, w, window_strides=(s, s), padding="VALID",
            dimension_numbers=("NCHW", "OIHW", "NCHW"))
        return jax.nn.relu(y + b[None, :, None, None])

    x = conv(image, params["conv1_w"], params["conv1_b"], 4)
    x = conv(x, params["conv2_w"], params["conv2_b"], 2)
    x = conv(x, params["conv3_w"], params["conv3_b"], 1)
    x = x.reshape(x.shape[0], -1)
    sensor_x = jax.nn.relu(sensor_data @ params["sensor_w"].T + params["sensor_b"])
    x = jnp.concatenate((x, sensor_x, action), axis=1)
    x = jax.nn.relu(x @ params["fc1_w"].T + params["fc1_b"])
    return x @ params["fc2_w"].T + params["fc2_b"]


if __name__ == "__main__":
    batch = 2
    input_shape = (4, 36, 36)      # (C, H, W)
    sensor_dim = 8
    action_dim = 4

    key = jax.random.PRNGKey(0)
    kp, ki, ks, ka = jax.random.split(key, 4)

    params = init_params(kp, input_shape, sensor_dim, action_dim)
    image = jax.random.normal(ki, (batch,) + input_shape, jnp.float32)
    sensor = jax.random.normal(ks, (batch, sensor_dim), jnp.float32)
    action = jax.random.normal(ka, (batch, action_dim), jnp.float32)

    q_ref = jax.block_until_ready(qnetwork_reference(params, image, sensor, action))

    fwd = jax.jit(qnetwork_forward, static_argnames=("batch_tile",))

    # Exact (f32) compute path: tight check against the pure-JAX reference.
    packed_f32 = pack_params(params, input_shape, compute_dtype=jnp.float32)
    q32 = jax.block_until_ready(fwd(packed_f32, image, sensor, action))
    assert q32.shape == (batch, 1)
    np.testing.assert_allclose(np.asarray(q32), np.asarray(q_ref), rtol=1e-4, atol=1e-4)

    # Default bf16 MXU path (f32 accumulation): loose tolerance.
    packed_bf16 = pack_params(params, input_shape)
    qbf = jax.block_until_ready(fwd(packed_bf16, image, sensor, action))
    assert qbf.shape == (batch, 1)
    np.testing.assert_allclose(np.asarray(qbf), np.asarray(q_ref), rtol=1e-1, atol=1e-1)

    print("KERNEL_OK")
</pallas_src>

<mosaic_0001>
module attributes {stable_mosaic.version = 11 : i64} {
  func.func @_qnet_kernel(%arg0: i32, %arg1: memref<2x9x5x128xf32, #tpu.memory_space<vmem>>, %arg2: memref<2x8xf32, #tpu.memory_space<vmem>>, %arg3: memref<2x4xf32, #tpu.memory_space<vmem>>, %arg4: memref<4x64x32xf32, #tpu.memory_space<vmem>>, %arg5: memref<1x32xf32, #tpu.memory_space<vmem>>, %arg6: memref<4x128x64xf32, #tpu.memory_space<vmem>>, %arg7: memref<1x64xf32, #tpu.memory_space<vmem>>, %arg8: memref<9x64x64xf32, #tpu.memory_space<vmem>>, %arg9: memref<1x64xf32, #tpu.memory_space<vmem>>, %arg10: memref<8x64xf32, #tpu.memory_space<vmem>>, %arg11: memref<1x64xf32, #tpu.memory_space<vmem>>, %arg12: memref<64x512xf32, #tpu.memory_space<vmem>>, %arg13: memref<64x512xf32, #tpu.memory_space<vmem>>, %arg14: memref<4x512xf32, #tpu.memory_space<vmem>>, %arg15: memref<1x512xf32, #tpu.memory_space<vmem>>, %arg16: memref<1x512xf32, #tpu.memory_space<vmem>>, %arg17: memref<1x1xf32, #tpu.memory_space<vmem>>, %arg18: memref<2x128xf32, #tpu.memory_space<vmem>>) attributes {dimension_semantics = [#tpu.dimension_semantics<parallel>], iteration_bounds = array<i64: 1>, scalar_prefetch = 0 : i64, scratch_operands = 0 : i64, tpu.core_type = #tpu.core_type<tc>, window_params = [{transform_indices = @transform_0, window_bounds = array<i64: 2, 9, 5, 128>}, {transform_indices = @transform_1, window_bounds = array<i64: 2, 8>}, {transform_indices = @transform_2, window_bounds = array<i64: 2, 4>}, {pipeline_mode = #tpu.pipeline_mode<synchronous>, transform_indices = @transform_3, window_bounds = array<i64: 4, 64, 32>}, {pipeline_mode = #tpu.pipeline_mode<synchronous>, transform_indices = @transform_4, window_bounds = array<i64: 1, 32>}, {pipeline_mode = #tpu.pipeline_mode<synchronous>, transform_indices = @transform_5, window_bounds = array<i64: 4, 128, 64>}, {pipeline_mode = #tpu.pipeline_mode<synchronous>, transform_indices = @transform_6, window_bounds = array<i64: 1, 64>}, {pipeline_mode = #tpu.pipeline_mode<synchronous>, transform_indices = @transform_7, window_bounds = array<i64: 9, 64, 64>}, {pipeline_mode = #tpu.pipeline_mode<synchronous>, transform_indices = @transform_8, window_bounds = array<i64: 1, 64>}, {pipeline_mode = #tpu.pipeline_mode<synchronous>, transform_indices = @transform_9, window_bounds = array<i64: 8, 64>}, {pipeline_mode = #tpu.pipeline_mode<synchronous>, transform_indices = @transform_10, window_bounds = array<i64: 1, 64>}, {pipeline_mode = #tpu.pipeline_mode<synchronous>, transform_indices = @transform_11, window_bounds = array<i64: 64, 512>}, {pipeline_mode = #tpu.pipeline_mode<synchronous>, transform_indices = @transform_12, window_bounds = array<i64: 64, 512>}, {pipeline_mode = #tpu.pipeline_mode<synchronous>, transform_indices = @transform_13, window_bounds = array<i64: 4, 512>}, {pipeline_mode = #tpu.pipeline_mode<synchronous>, transform_indices = @transform_14, window_bounds = array<i64: 1, 512>}, {pipeline_mode = #tpu.pipeline_mode<synchronous>, transform_indices = @transform_15, window_bounds = array<i64: 1, 512>}, {pipeline_mode = #tpu.pipeline_mode<synchronous>, transform_indices = @transform_16, window_bounds = array<i64: 1, 1>}, {transform_indices = @transform_17, window_bounds = array<i64: 2, 128>}]} {
    %c0 = arith.constant 0 : index
    %c0_0 = arith.constant 0 : index
    %c0_1 = arith.constant 0 : index
    %c0_2 = arith.constant 0 : index
    %0 = vector.load %arg1[%c0, %c0_0, %c0_1, %c0_2] : memref<2x9x5x128xf32, #tpu.memory_space<vmem>>, vector<2x9x5x128xf32>
    %cst = arith.constant 0.000000e+00 : f32
    %1 = vector.broadcast %cst : f32 to vector<64x32xf32>
    %2 = vector.extract_strided_slice %0 {offsets = [0, 0, 0, 0], sizes = [2, 8, 4, 64], strides = [1, 1, 1, 1]} : vector<2x9x5x128xf32> to vector<2x8x4x64xf32>
    %3 = vector.shape_cast %2 : vector<2x8x4x64xf32> to vector<64x64xf32>
    %c0_3 = arith.constant 0 : index
    %c0_4 = arith.constant 0 : index
    %c0_5 = arith.constant 0 : index
    %4 = vector.load %arg4[%c0_3, %c0_4, %c0_5] : memref<4x64x32xf32, #tpu.memory_space<vmem>>, vector<1x64x32xf32>
    %5 = vector.shape_cast %4 : vector<1x64x32xf32> to vector<64x32xf32>
    %cst_6 = arith.constant dense<0.000000e+00> : vector<64x32xf32>
    %6 = tpu.matmul %3, %5, %cst_6 {dimension_numbers = #tpu.dot_dimension_numbers<[1], [0], [0], [1], [0, 0, 1, 1], [], []>} : vector<64x64xf32>, vector<64x32xf32>, vector<64x32xf32> -> vector<64x32xf32>
    %7 = arith.addf %1, %6 : vector<64x32xf32>
    %8 = vector.extract_strided_slice %0 {offsets = [0, 0, 0, 64], sizes = [2, 8, 4, 64], strides = [1, 1, 1, 1]} : vector<2x9x5x128xf32> to vector<2x8x4x64xf32>
    %9 = vector.shape_cast %8 : vector<2x8x4x64xf32> to vector<64x64xf32>
    %c1 = arith.constant 1 : index
    %c0_7 = arith.constant 0 : index
    %c0_8 = arith.constant 0 : index
    %10 = vector.load %arg4[%c1, %c0_7, %c0_8] : memref<4x64x32xf32, #tpu.memory_space<vmem>>, vector<1x64x32xf32>
    %11 = vector.shape_cast %10 : vector<1x64x32xf32> to vector<64x32xf32>
    %cst_9 = arith.constant dense<0.000000e+00> : vector<64x32xf32>
    %12 = tpu.matmul %9, %11, %cst_9 {dimension_numbers = #tpu.dot_dimension_numbers<[1], [0], [0], [1], [0, 0, 1, 1], [], []>} : vector<64x64xf32>, vector<64x32xf32>, vector<64x32xf32> -> vector<64x32xf32>
    %13 = arith.addf %7, %12 : vector<64x32xf32>
    %14 = vector.extract_strided_slice %0 {offsets = [0, 1, 0, 0], sizes = [2, 8, 4, 64], strides = [1, 1, 1, 1]} : vector<2x9x5x128xf32> to vector<2x8x4x64xf32>
    %15 = vector.shape_cast %14 : vector<2x8x4x64xf32> to vector<64x64xf32>
    %c2 = arith.constant 2 : index
    %c0_10 = arith.constant 0 : index
    %c0_11 = arith.constant 0 : index
    %16 = vector.load %arg4[%c2, %c0_10, %c0_11] : memref<4x64x32xf32, #tpu.memory_space<vmem>>, vector<1x64x32xf32>
    %17 = vector.shape_cast %16 : vector<1x64x32xf32> to vector<64x32xf32>
    %cst_12 = arith.constant dense<0.000000e+00> : vector<64x32xf32>
    %18 = tpu.matmul %15, %17, %cst_12 {dimension_numbers = #tpu.dot_dimension_numbers<[1], [0], [0], [1], [0, 0, 1, 1], [], []>} : vector<64x64xf32>, vector<64x32xf32>, vector<64x32xf32> -> vector<64x32xf32>
    %19 = arith.addf %13, %18 : vector<64x32xf32>
    %20 = vector.extract_strided_slice %0 {offsets = [0, 1, 0, 64], sizes = [2, 8, 4, 64], strides = [1, 1, 1, 1]} : vector<2x9x5x128xf32> to vector<2x8x4x64xf32>
    %21 = vector.shape_cast %20 : vector<2x8x4x64xf32> to vector<64x64xf32>
    %c3 = arith.constant 3 : index
    %c0_13 = arith.constant 0 : index
    %c0_14 = arith.constant 0 : index
    %22 = vector.load %arg4[%c3, %c0_13, %c0_14] : memref<4x64x32xf32, #tpu.memory_space<vmem>>, vector<1x64x32xf32>
    %23 = vector.shape_cast %22 : vector<1x64x32xf32> to vector<64x32xf32>
    %cst_15 = arith.constant dense<0.000000e+00> : vector<64x32xf32>
    %24 = tpu.matmul %21, %23, %cst_15 {dimension_numbers = #tpu.dot_dimension_numbers<[1], [0], [0], [1], [0, 0, 1, 1], [], []>} : vector<64x64xf32>, vector<64x32xf32>, vector<64x32xf32> -> vector<64x32xf32>
    %25 = arith.addf %19, %24 : vector<64x32xf32>
    %c0_16 = arith.constant 0 : index
    %c0_17 = arith.constant 0 : index
    %26 = vector.load %arg5[%c0_16, %c0_17] : memref<1x32xf32, #tpu.memory_space<vmem>>, vector<1x32xf32>
    %27 = vector.broadcast %26 : vector<1x32xf32> to vector<64x32xf32>
    %28 = arith.addf %25, %27 : vector<64x32xf32>
    %cst_18 = arith.constant 0.000000e+00 : f32
    %29 = vector.broadcast %cst_18 : f32 to vector<64x32xf32>
    %30 = arith.maximumf %28, %29 : vector<64x32xf32>
    %cst_19 = arith.constant 0.000000e+00 : f32
    %31 = vector.broadcast %cst_19 : f32 to vector<64x32xf32>
    %32 = vector.extract_strided_slice %0 {offsets = [0, 0, 0, 64], sizes = [2, 8, 4, 64], strides = [1, 1, 1, 1]} : vector<2x9x5x128xf32> to vector<2x8x4x64xf32>
    %33 = vector.shape_cast %32 : vector<2x8x4x64xf32> to vector<64x64xf32>
    %c0_20 = arith.constant 0 : index
    %c0_21 = arith.constant 0 : index
    %c0_22 = arith.constant 0 : index
    %34 = vector.load %arg4[%c0_20, %c0_21, %c0_22] : memref<4x64x32xf32, #tpu.memory_space<vmem>>, vector<1x64x32xf32>
    %35 = vector.shape_cast %34 : vector<1x64x32xf32> to vector<64x32xf32>
    %cst_23 = arith.constant dense<0.000000e+00> : vector<64x32xf32>
    %36 = tpu.matmul %33, %35, %cst_23 {dimension_numbers = #tpu.dot_dimension_numbers<[1], [0], [0], [1], [0, 0, 1, 1], [], []>} : vector<64x64xf32>, vector<64x32xf32>, vector<64x32xf32> -> vector<64x32xf32>
    %37 = arith.addf %31, %36 : vector<64x32xf32>
    %38 = vector.extract_strided_slice %0 {offsets = [0, 0, 1, 0], sizes = [2, 8, 4, 64], strides = [1, 1, 1, 1]} : vector<2x9x5x128xf32> to vector<2x8x4x64xf32>
    %39 = vector.shape_cast %38 : vector<2x8x4x64xf32> to vector<64x64xf32>
    %c1_24 = arith.constant 1 : index
    %c0_25 = arith.constant 0 : index
    %c0_26 = arith.constant 0 : index
    %40 = vector.load %arg4[%c1_24, %c0_25, %c0_26] : memref<4x64x32xf32, #tpu.memory_space<vmem>>, vector<1x64x32xf32>
    %41 = vector.shape_cast %40 : vector<1x64x32xf32> to vector<64x32xf32>
    %cst_27 = arith.constant dense<0.000000e+00> : vector<64x32xf32>
    %42 = tpu.matmul %39, %41, %cst_27 {dimension_numbers = #tpu.dot_dimension_numbers<[1], [0], [0], [1], [0, 0, 1, 1], [], []>} : vector<64x64xf32>, vector<64x32xf32>, vector<64x32xf32> -> vector<64x32xf32>
    %43 = arith.addf %37, %42 : vector<64x32xf32>
    %44 = vector.extract_strided_slice %0 {offsets = [0, 1, 0, 64], sizes = [2, 8, 4, 64], strides = [1, 1, 1, 1]} : vector<2x9x5x128xf32> to vector<2x8x4x64xf32>
    %45 = vector.shape_cast %44 : vector<2x8x4x64xf32> to vector<64x64xf32>
    %c2_28 = arith.constant 2 : index
    %c0_29 = arith.constant 0 : index
    %c0_30 = arith.constant 0 : index
    %46 = vector.load %arg4[%c2_28, %c0_29, %c0_30] : memref<4x64x32xf32, #tpu.memory_space<vmem>>, vector<1x64x32xf32>
    %47 = vector.shape_cast %46 : vector<1x64x32xf32> to vector<64x32xf32>
    %cst_31 = arith.constant dense<0.000000e+00> : vector<64x32xf32>
    %48 = tpu.matmul %45, %47, %cst_31 {dimension_numbers = #tpu.dot_dimension_numbers<[1], [0], [0], [1], [0, 0, 1, 1], [], []>} : vector<64x64xf32>, vector<64x32xf32>, vector<64x32xf32> -> vector<64x32xf32>
    %49 = arith.addf %43, %48 : vector<64x32xf32>
    %50 = vector.extract_strided_slice %0 {offsets = [0, 1, 1, 0], sizes = [2, 8, 4, 64], strides = [1, 1, 1, 1]} : vector<2x9x5x128xf32> to vector<2x8x4x64xf32>
    %51 = vector.shape_cast %50 : vector<2x8x4x64xf32> to vector<64x64xf32>
    %c3_32 = arith.constant 3 : index
    %c0_33 = arith.constant 0 : index
    %c0_34 = arith.constant 0 : index
    %52 = vector.load %arg4[%c3_32, %c0_33, %c0_34] : memref<4x64x32xf32, #tpu.memory_space<vmem>>, vector<1x64x32xf32>
    %53 = vector.shape_cast %52 : vector<1x64x32xf32> to vector<64x32xf32>
    %cst_35 = arith.constant dense<0.000000e+00> : vector<64x32xf32>
    %54 = tpu.matmul %51, %53, %cst_35 {dimension_numbers = #tpu.dot_dimension_numbers<[1], [0], [0], [1], [0, 0, 1, 1], [], []>} : vector<64x64xf32>, vector<64x32xf32>, vector<64x32xf32> -> vector<64x32xf32>
    %55 = arith.addf %49, %54 : vector<64x32xf32>
    %c0_36 = arith.constant 0 : index
    %c0_37 = arith.constant 0 : index
    %56 = vector.load %arg5[%c0_36, %c0_37] : memref<1x32xf32, #tpu.memory_space<vmem>>, vector<1x32xf32>
    %57 = vector.broadcast %56 : vector<1x32xf32> to vector<64x32xf32>
    %58 = arith.addf %55, %57 : vector<64x32xf32>
    %cst_38 = arith.constant 0.000000e+00 : f32
    %59 = vector.broadcast %cst_38 : f32 to vector<64x32xf32>
    %60 = arith.maximumf %58, %59 : vector<64x32xf32>
    %61 = tpu.concatenate %30, %60 in 1 : vector<64x32xf32>, vector<64x32xf32> -> vector<64x64xf32>
    %62 = vector.shape_cast %61 : vector<64x64xf32> to vector<2x4x2x4x64xf32>
    %63 = vector.extract_strided_slice %62 {offsets = [0, 0, 0, 0, 0], sizes = [2, 4, 1, 4, 64], strides = [1, 1, 1, 1, 1]} : vector<2x4x2x4x64xf32> to vector<2x4x1x4x64xf32>
    %64 = vector.shape_cast %63 : vector<2x4x1x4x64xf32> to vector<2x4x4x64xf32>
    %65 = vector.extract_strided_slice %62 {offsets = [0, 0, 1, 0, 0], sizes = [2, 4, 1, 4, 64], strides = [1, 1, 1, 1, 1]} : vector<2x4x2x4x64xf32> to vector<2x4x1x4x64xf32>
    %66 = vector.shape_cast %65 : vector<2x4x1x4x64xf32> to vector<2x4x4x64xf32>
    %67 = tpu.concatenate %64, %66 in 3 : vector<2x4x4x64xf32>, vector<2x4x4x64xf32> -> vector<2x4x4x128xf32>
    %cst_39 = arith.constant 0.000000e+00 : f32
    %68 = vector.broadcast %cst_39 : f32 to vector<18x64xf32>
    %69 = vector.extract_strided_slice %67 {offsets = [0, 0, 0, 0], sizes = [2, 3, 3, 128], strides = [1, 1, 1, 1]} : vector<2x4x4x128xf32> to vector<2x3x3x128xf32>
    %70 = vector.shape_cast %69 : vector<2x3x3x128xf32> to vector<18x128xf32>
    %c0_40 = arith.constant 0 : index
    %c0_41 = arith.constant 0 : index
    %c0_42 = arith.constant 0 : index
    %71 = vector.load %arg6[%c0_40, %c0_41, %c0_42] : memref<4x128x64xf32, #tpu.memory_space<vmem>>, vector<1x128x64xf32>
    %72 = vector.shape_cast %71 : vector<1x128x64xf32> to vector<128x64xf32>
    %cst_43 = arith.constant dense<0.000000e+00> : vector<18x64xf32>
    %73 = tpu.matmul %70, %72, %cst_43 {dimension_numbers = #tpu.dot_dimension_numbers<[1], [0], [0], [1], [0, 0, 1, 1], [], []>} : vector<18x128xf32>, vector<128x64xf32>, vector<18x64xf32> -> vector<18x64xf32>
    %74 = arith.addf %68, %73 : vector<18x64xf32>
    %75 = vector.extract_strided_slice %67 {offsets = [0, 0, 1, 0], sizes = [2, 3, 3, 128], strides = [1, 1, 1, 1]} : vector<2x4x4x128xf32> to vector<2x3x3x128xf32>
    %76 = vector.shape_cast %75 : vector<2x3x3x128xf32> to vector<18x128xf32>
    %c1_44 = arith.constant 1 : index
    %c0_45 = arith.constant 0 : index
    %c0_46 = arith.constant 0 : index
    %77 = vector.load %arg6[%c1_44, %c0_45, %c0_46] : memref<4x128x64xf32, #tpu.memory_space<vmem>>, vector<1x128x64xf32>
    %78 = vector.shape_cast %77 : vector<1x128x64xf32> to vector<128x64xf32>
    %cst_47 = arith.constant dense<0.000000e+00> : vector<18x64xf32>
    %79 = tpu.matmul %76, %78, %cst_47 {dimension_numbers = #tpu.dot_dimension_numbers<[1], [0], [0], [1], [0, 0, 1, 1], [], []>} : vector<18x128xf32>, vector<128x64xf32>, vector<18x64xf32> -> vector<18x64xf32>
    %80 = arith.addf %74, %79 : vector<18x64xf32>
    %81 = vector.extract_strided_slice %67 {offsets = [0, 1, 0, 0], sizes = [2, 3, 3, 128], strides = [1, 1, 1, 1]} : vector<2x4x4x128xf32> to vector<2x3x3x128xf32>
    %82 = vector.shape_cast %81 : vector<2x3x3x128xf32> to vector<18x128xf32>
    %c2_48 = arith.constant 2 : index
    %c0_49 = arith.constant 0 : index
    %c0_50 = arith.constant 0 : index
    %83 = vector.load %arg6[%c2_48, %c0_49, %c0_50] : memref<4x128x64xf32, #tpu.memory_space<vmem>>, vector<1x128x64xf32>
    %84 = vector.shape_cast %83 : vector<1x128x64xf32> to vector<128x64xf32>
    %cst_51 = arith.constant dense<0.000000e+00> : vector<18x64xf32>
    %85 = tpu.matmul %82, %84, %cst_51 {dimension_numbers = #tpu.dot_dimension_numbers<[1], [0], [0], [1], [0, 0, 1, 1], [], []>} : vector<18x128xf32>, vector<128x64xf32>, vector<18x64xf32> -> vector<18x64xf32>
    %86 = arith.addf %80, %85 : vector<18x64xf32>
    %87 = vector.extract_strided_slice %67 {offsets = [0, 1, 1, 0], sizes = [2, 3, 3, 128], strides = [1, 1, 1, 1]} : vector<2x4x4x128xf32> to vector<2x3x3x128xf32>
    %88 = vector.shape_cast %87 : vector<2x3x3x128xf32> to vector<18x128xf32>
    %c3_52 = arith.constant 3 : index
    %c0_53 = arith.constant 0 : index
    %c0_54 = arith.constant 0 : index
    %89 = vector.load %arg6[%c3_52, %c0_53, %c0_54] : memref<4x128x64xf32, #tpu.memory_space<vmem>>, vector<1x128x64xf32>
    %90 = vector.shape_cast %89 : vector<1x128x64xf32> to vector<128x64xf32>
    %cst_55 = arith.constant dense<0.000000e+00> : vector<18x64xf32>
    %91 = tpu.matmul %88, %90, %cst_55 {dimension_numbers = #tpu.dot_dimension_numbers<[1], [0], [0], [1], [0, 0, 1, 1], [], []>} : vector<18x128xf32>, vector<128x64xf32>, vector<18x64xf32> -> vector<18x64xf32>
    %92 = arith.addf %86, %91 : vector<18x64xf32>
    %c0_56 = arith.constant 0 : index
    %c0_57 = arith.constant 0 : index
    %93 = vector.load %arg7[%c0_56, %c0_57] : memref<1x64xf32, #tpu.memory_space<vmem>>, vector<1x64xf32>
    %94 = vector.broadcast %93 : vector<1x64xf32> to vector<18x64xf32>
    %95 = arith.addf %92, %94 : vector<18x64xf32>
    %cst_58 = arith.constant 0.000000e+00 : f32
    %96 = vector.broadcast %cst_58 : f32 to vector<18x64xf32>
    %97 = arith.maximumf %95, %96 : vector<18x64xf32>
    %98 = vector.shape_cast %97 : vector<18x64xf32> to vector<2x3x3x64xf32>
    %cst_59 = arith.constant 0.000000e+00 : f32
    %99 = vector.broadcast %cst_59 : f32 to vector<2x64xf32>
    %100 = vector.extract_strided_slice %98 {offsets = [0, 0, 0, 0], sizes = [2, 1, 1, 64], strides = [1, 1, 1, 1]} : vector<2x3x3x64xf32> to vector<2x1x1x64xf32>
    %101 = vector.shape_cast %100 : vector<2x1x1x64xf32> to vector<2x64xf32>
    %c0_60 = arith.constant 0 : index
    %c0_61 = arith.constant 0 : index
    %c0_62 = arith.constant 0 : index
    %102 = vector.load %arg8[%c0_60, %c0_61, %c0_62] : memref<9x64x64xf32, #tpu.memory_space<vmem>>, vector<1x64x64xf32>
    %103 = vector.shape_cast %102 : vector<1x64x64xf32> to vector<64x64xf32>
    %cst_63 = arith.constant dense<0.000000e+00> : vector<2x64xf32>
    %104 = tpu.matmul %101, %103, %cst_63 {dimension_numbers = #tpu.dot_dimension_numbers<[1], [0], [0], [1], [0, 0, 1, 1], [], []>} : vector<2x64xf32>, vector<64x64xf32>, vector<2x64xf32> -> vector<2x64xf32>
    %105 = arith.addf %99, %104 : vector<2x64xf32>
    %106 = vector.extract_strided_slice %98 {offsets = [0, 0, 1, 0], sizes = [2, 1, 1, 64], strides = [1, 1, 1, 1]} : vector<2x3x3x64xf32> to vector<2x1x1x64xf32>
    %107 = vector.shape_cast %106 : vector<2x1x1x64xf32> to vector<2x64xf32>
    %c1_64 = arith.constant 1 : index
    %c0_65 = arith.constant 0 : index
    %c0_66 = arith.constant 0 : index
    %108 = vector.load %arg8[%c1_64, %c0_65, %c0_66] : memref<9x64x64xf32, #tpu.memory_space<vmem>>, vector<1x64x64xf32>
    %109 = vector.shape_cast %108 : vector<1x64x64xf32> to vector<64x64xf32>
    %cst_67 = arith.constant dense<0.000000e+00> : vector<2x64xf32>
    %110 = tpu.matmul %107, %109, %cst_67 {dimension_numbers = #tpu.dot_dimension_numbers<[1], [0], [0], [1], [0, 0, 1, 1], [], []>} : vector<2x64xf32>, vector<64x64xf32>, vector<2x64xf32> -> vector<2x64xf32>
    %111 = arith.addf %105, %110 : vector<2x64xf32>
    %112 = vector.extract_strided_slice %98 {offsets = [0, 0, 2, 0], sizes = [2, 1, 1, 64], strides = [1, 1, 1, 1]} : vector<2x3x3x64xf32> to vector<2x1x1x64xf32>
    %113 = vector.shape_cast %112 : vector<2x1x1x64xf32> to vector<2x64xf32>
    %c2_68 = arith.constant 2 : index
    %c0_69 = arith.constant 0 : index
    %c0_70 = arith.constant 0 : index
    %114 = vector.load %arg8[%c2_68, %c0_69, %c0_70] : memref<9x64x64xf32, #tpu.memory_space<vmem>>, vector<1x64x64xf32>
    %115 = vector.shape_cast %114 : vector<1x64x64xf32> to vector<64x64xf32>
    %cst_71 = arith.constant dense<0.000000e+00> : vector<2x64xf32>
    %116 = tpu.matmul %113, %115, %cst_71 {dimension_numbers = #tpu.dot_dimension_numbers<[1], [0], [0], [1], [0, 0, 1, 1], [], []>} : vector<2x64xf32>, vector<64x64xf32>, vector<2x64xf32> -> vector<2x64xf32>
    %117 = arith.addf %111, %116 : vector<2x64xf32>
    %118 = vector.extract_strided_slice %98 {offsets = [0, 1, 0, 0], sizes = [2, 1, 1, 64], strides = [1, 1, 1, 1]} : vector<2x3x3x64xf32> to vector<2x1x1x64xf32>
    %119 = vector.shape_cast %118 : vector<2x1x1x64xf32> to vector<2x64xf32>
    %c3_72 = arith.constant 3 : index
    %c0_73 = arith.constant 0 : index
    %c0_74 = arith.constant 0 : index
    %120 = vector.load %arg8[%c3_72, %c0_73, %c0_74] : memref<9x64x64xf32, #tpu.memory_space<vmem>>, vector<1x64x64xf32>
    %121 = vector.shape_cast %120 : vector<1x64x64xf32> to vector<64x64xf32>
    %cst_75 = arith.constant dense<0.000000e+00> : vector<2x64xf32>
    %122 = tpu.matmul %119, %121, %cst_75 {dimension_numbers = #tpu.dot_dimension_numbers<[1], [0], [0], [1], [0, 0, 1, 1], [], []>} : vector<2x64xf32>, vector<64x64xf32>, vector<2x64xf32> -> vector<2x64xf32>
    %123 = arith.addf %117, %122 : vector<2x64xf32>
    %124 = vector.extract_strided_slice %98 {offsets = [0, 1, 1, 0], sizes = [2, 1, 1, 64], strides = [1, 1, 1, 1]} : vector<2x3x3x64xf32> to vector<2x1x1x64xf32>
    %125 = vector.shape_cast %124 : vector<2x1x1x64xf32> to vector<2x64xf32>
    %c4 = arith.constant 4 : index
    %c0_76 = arith.constant 0 : index
    %c0_77 = arith.constant 0 : index
    %126 = vector.load %arg8[%c4, %c0_76, %c0_77] : memref<9x64x64xf32, #tpu.memory_space<vmem>>, vector<1x64x64xf32>
    %127 = vector.shape_cast %126 : vector<1x64x64xf32> to vector<64x64xf32>
    %cst_78 = arith.constant dense<0.000000e+00> : vector<2x64xf32>
    %128 = tpu.matmul %125, %127, %cst_78 {dimension_numbers = #tpu.dot_dimension_numbers<[1], [0], [0], [1], [0, 0, 1, 1], [], []>} : vector<2x64xf32>, vector<64x64xf32>, vector<2x64xf32> -> vector<2x64xf32>
    %129 = arith.addf %123, %128 : vector<2x64xf32>
    %130 = vector.extract_strided_slice %98 {offsets = [0, 1, 2, 0], sizes = [2, 1, 1, 64], strides = [1, 1, 1, 1]} : vector<2x3x3x64xf32> to vector<2x1x1x64xf32>
    %131 = vector.shape_cast %130 : vector<2x1x1x64xf32> to vector<2x64xf32>
    %c5 = arith.constant 5 : index
    %c0_79 = arith.constant 0 : index
    %c0_80 = arith.constant 0 : index
    %132 = vector.load %arg8[%c5, %c0_79, %c0_80] : memref<9x64x64xf32, #tpu.memory_space<vmem>>, vector<1x64x64xf32>
    %133 = vector.shape_cast %132 : vector<1x64x64xf32> to vector<64x64xf32>
    %cst_81 = arith.constant dense<0.000000e+00> : vector<2x64xf32>
    %134 = tpu.matmul %131, %133, %cst_81 {dimension_numbers = #tpu.dot_dimension_numbers<[1], [0], [0], [1], [0, 0, 1, 1], [], []>} : vector<2x64xf32>, vector<64x64xf32>, vector<2x64xf32> -> vector<2x64xf32>
    %135 = arith.addf %129, %134 : vector<2x64xf32>
    %136 = vector.extract_strided_slice %98 {offsets = [0, 2, 0, 0], sizes = [2, 1, 1, 64], strides = [1, 1, 1, 1]} : vector<2x3x3x64xf32> to vector<2x1x1x64xf32>
    %137 = vector.shape_cast %136 : vector<2x1x1x64xf32> to vector<2x64xf32>
    %c6 = arith.constant 6 : index
    %c0_82 = arith.constant 0 : index
    %c0_83 = arith.constant 0 : index
    %138 = vector.load %arg8[%c6, %c0_82, %c0_83] : memref<9x64x64xf32, #tpu.memory_space<vmem>>, vector<1x64x64xf32>
    %139 = vector.shape_cast %138 : vector<1x64x64xf32> to vector<64x64xf32>
    %cst_84 = arith.constant dense<0.000000e+00> : vector<2x64xf32>
    %140 = tpu.matmul %137, %139, %cst_84 {dimension_numbers = #tpu.dot_dimension_numbers<[1], [0], [0], [1], [0, 0, 1, 1], [], []>} : vector<2x64xf32>, vector<64x64xf32>, vector<2x64xf32> -> vector<2x64xf32>
    %141 = arith.addf %135, %140 : vector<2x64xf32>
    %142 = vector.extract_strided_slice %98 {offsets = [0, 2, 1, 0], sizes = [2, 1, 1, 64], strides = [1, 1, 1, 1]} : vector<2x3x3x64xf32> to vector<2x1x1x64xf32>
    %143 = vector.shape_cast %142 : vector<2x1x1x64xf32> to vector<2x64xf32>
    %c7 = arith.constant 7 : index
    %c0_85 = arith.constant 0 : index
    %c0_86 = arith.constant 0 : index
    %144 = vector.load %arg8[%c7, %c0_85, %c0_86] : memref<9x64x64xf32, #tpu.memory_space<vmem>>, vector<1x64x64xf32>
    %145 = vector.shape_cast %144 : vector<1x64x64xf32> to vector<64x64xf32>
    %cst_87 = arith.constant dense<0.000000e+00> : vector<2x64xf32>
    %146 = tpu.matmul %143, %145, %cst_87 {dimension_numbers = #tpu.dot_dimension_numbers<[1], [0], [0], [1], [0, 0, 1, 1], [], []>} : vector<2x64xf32>, vector<64x64xf32>, vector<2x64xf32> -> vector<2x64xf32>
    %147 = arith.addf %141, %146 : vector<2x64xf32>
    %148 = vector.extract_strided_slice %98 {offsets = [0, 2, 2, 0], sizes = [2, 1, 1, 64], strides = [1, 1, 1, 1]} : vector<2x3x3x64xf32> to vector<2x1x1x64xf32>
    %149 = vector.shape_cast %148 : vector<2x1x1x64xf32> to vector<2x64xf32>
    %c8 = arith.constant 8 : index
    %c0_88 = arith.constant 0 : index
    %c0_89 = arith.constant 0 : index
    %150 = vector.load %arg8[%c8, %c0_88, %c0_89] : memref<9x64x64xf32, #tpu.memory_space<vmem>>, vector<1x64x64xf32>
    %151 = vector.shape_cast %150 : vector<1x64x64xf32> to vector<64x64xf32>
    %cst_90 = arith.constant dense<0.000000e+00> : vector<2x64xf32>
    %152 = tpu.matmul %149, %151, %cst_90 {dimension_numbers = #tpu.dot_dimension_numbers<[1], [0], [0], [1], [0, 0, 1, 1], [], []>} : vector<2x64xf32>, vector<64x64xf32>, vector<2x64xf32> -> vector<2x64xf32>
    %153 = arith.addf %147, %152 : vector<2x64xf32>
    %c0_91 = arith.constant 0 : index
    %c0_92 = arith.constant 0 : index
    %154 = vector.load %arg9[%c0_91, %c0_92] : memref<1x64xf32, #tpu.memory_space<vmem>>, vector<1x64xf32>
    %155 = vector.broadcast %154 : vector<1x64xf32> to vector<2x64xf32>
    %156 = arith.addf %153, %155 : vector<2x64xf32>
    %cst_93 = arith.constant 0.000000e+00 : f32
    %157 = vector.broadcast %cst_93 : f32 to vector<2x64xf32>
    %158 = arith.maximumf %156, %157 : vector<2x64xf32>
    %c0_94 = arith.constant 0 : index
    %c0_95 = arith.constant 0 : index
    %159 = vector.load %arg2[%c0_94, %c0_95] : memref<2x8xf32, #tpu.memory_space<vmem>>, vector<2x8xf32>
    %c0_96 = arith.constant 0 : index
    %c0_97 = arith.constant 0 : index
    %160 = vector.load %arg10[%c0_96, %c0_97] : memref<8x64xf32, #tpu.memory_space<vmem>>, vector<8x64xf32>
    %cst_98 = arith.constant dense<0.000000e+00> : vector<2x64xf32>
    %161 = tpu.matmul %159, %160, %cst_98 {dimension_numbers = #tpu.dot_dimension_numbers<[1], [0], [0], [1], [0, 0, 1, 1], [], []>} : vector<2x8xf32>, vector<8x64xf32>, vector<2x64xf32> -> vector<2x64xf32>
    %c0_99 = arith.constant 0 : index
    %c0_100 = arith.constant 0 : index
    %162 = vector.load %arg11[%c0_99, %c0_100] : memref<1x64xf32, #tpu.memory_space<vmem>>, vector<1x64xf32>
    %163 = vector.broadcast %162 : vector<1x64xf32> to vector<2x64xf32>
    %164 = arith.addf %161, %163 : vector<2x64xf32>
    %cst_101 = arith.constant 0.000000e+00 : f32
    %165 = vector.broadcast %cst_101 : f32 to vector<2x64xf32>
    %166 = arith.maximumf %164, %165 : vector<2x64xf32>
    %c0_102 = arith.constant 0 : index
    %c0_103 = arith.constant 0 : index
    %167 = vector.load %arg12[%c0_102, %c0_103] : memref<64x512xf32, #tpu.memory_space<vmem>>, vector<64x512xf32>
    %cst_104 = arith.constant dense<0.000000e+00> : vector<2x512xf32>
    %168 = tpu.matmul %158, %167, %cst_104 {dimension_numbers = #tpu.dot_dimension_numbers<[1], [0], [0], [1], [0, 0, 1, 1], [], []>} : vector<2x64xf32>, vector<64x512xf32>, vector<2x512xf32> -> vector<2x512xf32>
    %c0_105 = arith.constant 0 : index
    %c0_106 = arith.constant 0 : index
    %169 = vector.load %arg13[%c0_105, %c0_106] : memref<64x512xf32, #tpu.memory_space<vmem>>, vector<64x512xf32>
    %cst_107 = arith.constant dense<0.000000e+00> : vector<2x512xf32>
    %170 = tpu.matmul %166, %169, %cst_107 {dimension_numbers = #tpu.dot_dimension_numbers<[1], [0], [0], [1], [0, 0, 1, 1], [], []>} : vector<2x64xf32>, vector<64x512xf32>, vector<2x512xf32> -> vector<2x512xf32>
    %171 = arith.addf %168, %170 : vector<2x512xf32>
    %c0_108 = arith.constant 0 : index
    %c0_109 = arith.constant 0 : index
    %172 = vector.load %arg3[%c0_108, %c0_109] : memref<2x4xf32, #tpu.memory_space<vmem>>, vector<2x4xf32>
    %c0_110 = arith.constant 0 : index
    %c0_111 = arith.constant 0 : index
    %173 = vector.load %arg14[%c0_110, %c0_111] : memref<4x512xf32, #tpu.memory_space<vmem>>, vector<4x512xf32>
    %cst_112 = arith.constant dense<0.000000e+00> : vector<2x512xf32>
    %174 = tpu.matmul %172, %173, %cst_112 {dimension_numbers = #tpu.dot_dimension_numbers<[1], [0], [0], [1], [0, 0, 1, 1], [], []>} : vector<2x4xf32>, vector<4x512xf32>, vector<2x512xf32> -> vector<2x512xf32>
    %175 = arith.addf %171, %174 : vector<2x512xf32>
    %c0_113 = arith.constant 0 : index
    %c0_114 = arith.constant 0 : index
    %176 = vector.load %arg15[%c0_113, %c0_114] : memref<1x512xf32, #tpu.memory_space<vmem>>, vector<1x512xf32>
    %177 = vector.broadcast %176 : vector<1x512xf32> to vector<2x512xf32>
    %178 = arith.addf %175, %177 : vector<2x512xf32>
    %cst_115 = arith.constant 0.000000e+00 : f32
    %179 = vector.broadcast %cst_115 : f32 to vector<2x512xf32>
    %180 = arith.maximumf %178, %179 : vector<2x512xf32>
    %c0_116 = arith.constant 0 : index
    %c0_117 = arith.constant 0 : index
    %181 = vector.load %arg16[%c0_116, %c0_117] : memref<1x512xf32, #tpu.memory_space<vmem>>, vector<1x512xf32>
    %182 = vector.broadcast %181 : vector<1x512xf32> to vector<2x512xf32>
    %183 = arith.mulf %180, %182 : vector<2x512xf32>
    %cst_118 = arith.constant dense<0.000000e+00> : vector<2xf32>
    %184 = vector.multi_reduction <add>, %183, %cst_118 [1] : vector<2x512xf32> to vector<2xf32>
    %185 = vector.shape_cast %184 : vector<2xf32> to vector<2x1xf32>
    %c0_119 = arith.constant 0 : index
    %c0_120 = arith.constant 0 : index
    %186 = vector.load %arg17[%c0_119, %c0_120] : memref<1x1xf32, #tpu.memory_space<vmem>>, vector<1x1xf32>
    %187 = vector.broadcast %186 : vector<1x1xf32> to vector<2x1xf32>
    %188 = arith.addf %185, %187 : vector<2x1xf32>
    %189 = vector.shape_cast %188 : vector<2x1xf32> to vector<2x1xf32>
    %190 = vector.broadcast %189 : vector<2x1xf32> to vector<2x128xf32>
    %c0_121 = arith.constant 0 : index
    %c0_122 = arith.constant 0 : index
    %191 = vector.load %arg18[%c0_121, %c0_122] : memref<2x128xf32, #tpu.memory_space<vmem>>, vector<2x128xf32>
    tpu.vector_store %arg18[%c0_121, %c0_122], %190 {strides = array<i32>} : memref<2x128xf32, #tpu.memory_space<vmem>>, vector<2x128xf32>,
    return
  }
  func.func @transform_0(%arg0: i32) -> (i32, i32, i32, i32) {
    %c0_i32 = arith.constant 0 : i32
    %c0_i32_0 = arith.constant 0 : i32
    %c0_i32_1 = arith.constant 0 : i32
    %c0_i32_2 = arith.constant 0 : i32
    return %arg0, %c0_i32, %c0_i32_0, %c0_i32_1 : i32, i32, i32, i32
  }
  func.func @transform_1(%arg0: i32) -> (i32, i32) {
    %c0_i32 = arith.constant 0 : i32
    %c0_i32_0 = arith.constant 0 : i32
    return %arg0, %c0_i32 : i32, i32
  }
  func.func @transform_2(%arg0: i32) -> (i32, i32) {
    %c0_i32 = arith.constant 0 : i32
    %c0_i32_0 = arith.constant 0 : i32
    return %arg0, %c0_i32 : i32, i32
  }
  func.func @transform_3(%arg0: i32) -> (i32, i32, i32) {
    %c0_i32 = arith.constant 0 : i32
    %c0_i32_0 = arith.constant 0 : i32
    %c0_i32_1 = arith.constant 0 : i32
    %c0_i32_2 = arith.constant 0 : i32
    return %c0_i32, %c0_i32_0, %c0_i32_1 : i32, i32, i32
  }
  func.func @transform_4(%arg0: i32) -> (i32, i32) {
    %c0_i32 = arith.constant 0 : i32
    %c0_i32_0 = arith.constant 0 : i32
    %c0_i32_1 = arith.constant 0 : i32
    return %c0_i32, %c0_i32_0 : i32, i32
  }
  func.func @transform_5(%arg0: i32) -> (i32, i32, i32) {
    %c0_i32 = arith.constant 0 : i32
    %c0_i32_0 = arith.constant 0 : i32
    %c0_i32_1 = arith.constant 0 : i32
    %c0_i32_2 = arith.constant 0 : i32
    return %c0_i32, %c0_i32_0, %c0_i32_1 : i32, i32, i32
  }
  func.func @transform_6(%arg0: i32) -> (i32, i32) {
    %c0_i32 = arith.constant 0 : i32
    %c0_i32_0 = arith.constant 0 : i32
    %c0_i32_1 = arith.constant 0 : i32
    return %c0_i32, %c0_i32_0 : i32, i32
  }
  func.func @transform_7(%arg0: i32) -> (i32, i32, i32) {
    %c0_i32 = arith.constant 0 : i32
    %c0_i32_0 = arith.constant 0 : i32
    %c0_i32_1 = arith.constant 0 : i32
    %c0_i32_2 = arith.constant 0 : i32
    return %c0_i32, %c0_i32_0, %c0_i32_1 : i32, i32, i32
  }
  func.func @transform_8(%arg0: i32) -> (i32, i32) {
    %c0_i32 = arith.constant 0 : i32
    %c0_i32_0 = arith.constant 0 : i32
    %c0_i32_1 = arith.constant 0 : i32
    return %c0_i32, %c0_i32_0 : i32, i32
  }
  func.func @transform_9(%arg0: i32) -> (i32, i32) {
    %c0_i32 = arith.constant 0 : i32
    %c0_i32_0 = arith.constant 0 : i32
    %c0_i32_1 = arith.constant 0 : i32
    return %c0_i32, %c0_i32_0 : i32, i32
  }
  func.func @transform_10(%arg0: i32) -> (i32, i32) {
    %c0_i32 = arith.constant 0 : i32
    %c0_i32_0 = arith.constant 0 : i32
    %c0_i32_1 = arith.constant 0 : i32
    return %c0_i32, %c0_i32_0 : i32, i32
  }
  func.func @transform_11(%arg0: i32) -> (i32, i32) {
    %c0_i32 = arith.constant 0 : i32
    %c0_i32_0 = arith.constant 0 : i32
    %c0_i32_1 = arith.constant 0 : i32
    return %c0_i32, %c0_i32_0 : i32, i32
  }
  func.func @transform_12(%arg0: i32) -> (i32, i32) {
    %c0_i32 = arith.constant 0 : i32
    %c0_i32_0 = arith.constant 0 : i32
    %c0_i32_1 = arith.constant 0 : i32
    return %c0_i32, %c0_i32_0 : i32, i32
  }
  func.func @transform_13(%arg0: i32) -> (i32, i32) {
    %c0_i32 = arith.constant 0 : i32
    %c0_i32_0 = arith.constant 0 : i32
    %c0_i32_1 = arith.constant 0 : i32
    return %c0_i32, %c0_i32_0 : i32, i32
  }
  func.func @transform_14(%arg0: i32) -> (i32, i32) {
    %c0_i32 = arith.constant 0 : i32
    %c0_i32_0 = arith.constant 0 : i32
    %c0_i32_1 = arith.constant 0 : i32
    return %c0_i32, %c0_i32_0 : i32, i32
  }
  func.func @transform_15(%arg0: i32) -> (i32, i32) {
    %c0_i32 = arith.constant 0 : i32
    %c0_i32_0 = arith.constant 0 : i32
    %c0_i32_1 = arith.constant 0 : i32
    return %c0_i32, %c0_i32_0 : i32, i32
  }
  func.func @transform_16(%arg0: i32) -> (i32, i32) {
    %c0_i32 = arith.constant 0 : i32
    %c0_i32_0 = arith.constant 0 : i32
    %c0_i32_1 = arith.constant 0 : i32
    return %c0_i32, %c0_i32_0 : i32, i32
  }
  func.func @transform_17(%arg0: i32) -> (i32, i32) {
    %c0_i32 = arith.constant 0 : i32
    %c0_i32_0 = arith.constant 0 : i32
    return %arg0, %c0_i32 : i32, i32
  }
}

</mosaic_0001>

<bundles_post_ra>
// kernel: qnetwork_forward.1
= control target key start
LH: loop header
LB: loop body
LE: loop exit
PB: predicated region body
PF: predicated region fallthrough
CT: control target
= control target key end

     0   :  { %vm133_vm0 = vcmask 523264   ;;  %s5257_s28 = smov 64   ;;  %vm717_vm1 = vcmask 1042432   ;;  %vm718_vm2 = vcmask 1046532   ;;  %vm1326_vm4 = vcmask 261120   ;;  %s7393_s0 = inlined_call_operand.vmem [shape: f32[2,9,5,128], index: 0, kind: input, shape index: {}]   ;;  %s7394_s3 = inlined_call_operand.vmem [shape: f32[4,64,32], index: 3, kind: input, shape index: {}]   ;;  %s7395_s4 = inlined_call_operand.vmem [shape: f32[1,32], index: 4, kind: input, shape index: {}]   ;;  %s7396_s5 = inlined_call_operand.vmem [shape: f32[4,128,64], index: 5, kind: input, shape index: {}]   ;;  %s7397_s7 = inlined_call_operand.vmem [shape: f32[9,64,64], index: 7, kind: input, shape index: {}]   ;;  %s7398_s6 = inlined_call_operand.vmem [shape: f32[1,64], index: 6, kind: input, shape index: {}]   ;;  %s7399_s9 = inlined_call_operand.vmem [shape: f32[8,64], index: 9, kind: input, shape index: {}]   ;;  %s7400_s1 = inlined_call_operand.vmem [shape: f32[2,8], index: 1, kind: input, shape index: {}]   ;;  %s7401_s12 = inlined_call_operand.vmem [shape: f32[64,512], index: 12, kind: input, shape index: {}]   ;;  %s7402_s11 = inlined_call_operand.vmem [shape: f32[64,512], index: 11, kind: input, shape index: {}]   ;;  %s7403_s10 = inlined_call_operand.vmem [shape: f32[1,64], index: 10, kind: input, shape index: {}]   ;;  %s7404_s8 = inlined_call_operand.vmem [shape: f32[1,64], index: 8, kind: input, shape index: {}]   ;;  %s7405_s13 = inlined_call_operand.vmem [shape: f32[4,512], index: 13, kind: input, shape index: {}]   ;;  %s7406_s2 = inlined_call_operand.vmem [shape: f32[2,4], index: 2, kind: input, shape index: {}]   ;;  %s7407_s16 = inlined_call_operand.<no memory space> [shape: f32[1,1], index: 16, kind: input, shape index: {}]   ;;  %s7408_s14 = inlined_call_operand.vmem [shape: f32[1,512], index: 14, kind: input, shape index: {}]   ;;  %s7409_s15 = inlined_call_operand.vmem [shape: f32[1,512], index: 15, kind: input, shape index: {}]   ;;  %s7410_s17 = inlined_call_operand.vmem [shape: f32[2,128], index: 17, kind: output, shape index: {}]  }
   0x1   :  { %7423 = sst [smem:[#allocation9_spill]] %s7393_s0  ;;  %vm5635_vm3 = vmor %vm717_vm1, %vm718_vm2  ;;  %vm5260_vm5 = vmmov 0   ;;  %vm3432_vm6 = vcmask 64512   ;;  %vm3872_vm7 = vcmask 1043456   ;;  %vm3868_vm8 = vcmask 31744  }
   0x2   :  { %7424 = sst [smem:[#allocation10_spill]] %s7394_s3  ;;  %vm4083_vm9 = vcmask 1041408  }
   0x3   :  { %s7425_s26 = sld [smem:[#allocation9_spill]] }
   0x4   :  { %s7426_s27 = sld [smem:[#allocation10_spill]] }
   0x9   :  { %v5356_v0 = vld [vmem:[%s7425_s26] sm:$0x1f]  ;;  %v5361_v1 = vld [vmem:[%s7425_s26 + $0x8] sm:$0x1f]  ;;  %v5378_v5 = vld [vmem:[%s7425_s26 + $0x10] sm:$0x1f] }
   0xa   :  { %v5366_v2 = vld [vmem:[%s7425_s26 + $0x20] sm:$0x1f]  ;;  %v109_v3 = vcombine.low %v5356_v0, %v5361_v1  ;;  %v5373_v4 = vld [vmem:[%s7425_s26 + $0x28] sm:$0x1f]  ;;  %v5387_v7 = vld [vmem:[%s7425_s26 + $0x18] sm:$0x1f]  ;;  %v5524_v31 = vcombine.low %v5361_v1, %v5378_v5  ;;  %v703_v40 = vcombine.high %v5378_v5, %v5378_v5  ;;  %v701_v43 = vcombine.high %v5356_v0, %v5356_v0 }
   0xb   :  { %v5382_v6 = vcombine.low %v5366_v2, %v5373_v4  ;;  %v5392_v8 = vld [vmem:[%s7425_s26 + $0x30] sm:$0x1f]  ;;  %v5397_v9 = vld [vmem:[%s7426_s27 + $0x38] sm:$0xff]  ;;  %v5410_v11 = vcombine.low %v5378_v5, %v5387_v7  ;;  %v5415_v12 = vld [vmem:[%s7425_s26 + $0x48] sm:$0x1f]  ;;  %v5536_v33 = vcombine.low %v5387_v7, %v5366_v2  ;;  %v704_v41 = vcombine.high %v5387_v7, %v5387_v7 }
   0xc   :  { %117 = vrot.lane.b32.xlu0 %v109_v3, %s5257_s28  ;;  %v5403_v10 = vld [vmem:[%s7425_s26 + $0x38] sm:$0x1f]  ;;  %4677 = vmatprep.subr.mxu1 %v5397_v9  ;;  %v5420_v13 = vld [vmem:[%s7425_s26 + $0x50] sm:$0x1f]  ;;  %v5442_v17 = vld [vmem:[%s7425_s26 + $0x60] sm:$0x1f]  ;;  %v5561_v37 = vcombine.low %v5373_v4, %v5392_v8  ;;  %v702_v44 = vcombine.high %v5361_v1, %v5361_v1  ;;  %v705_v60 = vcombine.high %v5366_v2, %v5366_v2 }
   0xd   :  { %121 = vrot.lane.b32.xlu1 %v5382_v6, %s5257_s28  ;;  %4678 = vmatpush3.msra.mxu1 %v5397_v9  ;;  %v5425_v14 = vcombine.low %v5392_v8, %v5403_v10  ;;  %v5432_v15 = vcombine.low %v5415_v12, %v5420_v13  ;;  %v5437_v16 = vld [vmem:[%s7425_s26 + $0x58] sm:$0x1f]  ;;  %v5449_v18 = vld [vmem:[%s7425_s26 + $0x68] sm:$0x1f]  ;;  %v5454_v19 = vld [vmem:[%s7425_s26 + $0x70] sm:$0x1f] }
   0xe   :  { %4693 = vmatprep.mubr.msk.f32.mxu1 %vm133_vm0, %v109_v3  ;;  %v5459_v20 = vld [vmem:[%s7425_s26 + $0x78] sm:$0x1f]  ;;  %v5464_v21 = vld [vmem:[%s7426_s27 + $0x30] sm:$0xff]  ;;  %v5473_v23 = vcombine.low %v5437_v16, %v5442_v17  ;;  %v5478_v24 = vld [vmem:[%s7425_s26 + $0x80] sm:$0x1f]  ;;  %v5496_v27 = vcombine.low %v5449_v18, %v5454_v19  ;;  %v5602_v46 = vcombine.low %v5420_v13, %v5437_v16  ;;  %v5614_v48 = vcombine.low %v5442_v17, %v5449_v18 }
   0xf   :  { %v5469_v22 = vld [vmem:[%s7426_s27 + $0x78] sm:$0xff]  ;;  %4679 = vmatprep.subr.mxu1 %v5464_v21  ;;  %v5485_v25 = vld [vmem:[%s7426_s27 + $0x28] sm:$0xff]  ;;  %v5490_v26 = vld [vmem:[%s7426_s27 + $0x70] sm:$0xff]  ;;  %v5509_v29 = vcombine.low %v5459_v20, %v5478_v24  ;;  %v4170_v50 = vrot.slane %v5378_v5, 9  ;;  %v730_v51 = vrot.slane %v703_v40, 5  ;;  %v4171_v52 = vrot.slane %v5387_v7, 9 }
  0x10   :  { %119 = vrot.lane.b32.xlu0 %v5410_v11, %s5257_s28  ;;  %4649 = vmatprep.subr.mxu0 %v5469_v22  ;;  %v5505_v28 = vld [vmem:[%s7426_s27 + $0x20] sm:$0xff]  ;;  %v5516_v30 = vld [vmem:[%s7426_s27 + $0x68] sm:$0xff]  ;;  %v5530_v32 = vld [vmem:[%s7426_s27 + $0x18] sm:$0xff]  ;;  %v734_v53 = vrot.slane %v704_v41, 5  ;;  %v4168_v55 = vrot.slane %v5356_v0, 9  ;;  %v722_v56 = vrot.slane %v701_v43, 5  ;;  %v5647_v61 = vcombine.low %v5454_v19, %v5459_v20 }
  0x11   :  { %123 = vrot.lane.b32.xlu1 %v5425_v14, %s5257_s28  ;;  %4680 = vmatpush3.msra.mxu1 %v5464_v21  ;;  %v5542_v34 = vld [vmem:[%s7426_s27 + $0x60] sm:$0xff]  ;;  %v5555_v36 = vld [vmem:[%s7426_s27 + $0x10] sm:$0xff]  ;;  %v5567_v38 = vld [vmem:[%s7426_s27 + $0x58] sm:$0xff]  ;;  %v4169_v57 = vrot.slane %v5361_v1, 9  ;;  %v726_v58 = vrot.slane %v702_v44, 5  ;;  %v706_v0 = vcombine.high %v5373_v4, %v5373_v4  ;;  %v707_v1 = vcombine.high %v5392_v8, %v5392_v8 }
  0x12   :  { %4650 = vmatpush3.msra.mxu0 %v5469_v22  ;;  %4681 = vmatprep.subr.mxu1 %v5485_v25  ;;  %v5547_v35 = vld [vmem:[%s7425_s26 + $0x40] sm:$0x1f]  ;;  %v5585_v42 = vld [vmem:[%s7426_s27 + $0x8] sm:$0xff]  ;;  %v5596_v45 = vld [vmem:[%s7426_s27 + $0x50] sm:$0xff]  ;;  %v5673_v5 = vsel %vm5635_vm3, %v4170_v50, %v730_v51  ;;  %v5677_v7 = vsel %vm5635_vm3, %v4171_v52, %v734_v53  ;;  %v708_v40 = vcombine.high %v5403_v10, %v5403_v10  ;;  %v4172_v50 = vrot.slane %v5366_v2, 9 }
  0x13   :  { %4651 = vmatprep.subr.mxu0 %v5490_v26  ;;  %4682 = vmatpush3.msra.mxu1 %v5485_v25  ;;  %v5573_v39 = vcombine.low %v5403_v10, %v5547_v35  ;;  %v5608_v47 = vld [vmem:[%s7426_s27] sm:$0xff]  ;;  %v5620_v49 = vld [vmem:[%s7426_s27 + $0x48] sm:$0xff]  ;;  %v5653_v62 = vld [vmem:[%s7426_s27 + $0xf8] sm:$0xff]  ;;  %v5698_v44 = vsel %vm5635_vm3, %v4168_v55, %v722_v56  ;;  %v738_v51 = vrot.slane %v705_v60, 5  ;;  %v4173_v52 = vrot.slane %v5373_v4, 9 }
  0x14   :  { %125 = vrot.lane.b32.xlu0 %v5432_v15, %s5257_s28  ;;  %4652 = vmatpush3.msra.mxu0 %v5490_v26  ;;  %7427 = vst [vmem:[#allocation3_spill] sm:$0xff] %v5620_v49  ;;  %v5627_v54 = vld [vmem:[%s7425_s26 + $0x88] sm:$0x1f]  ;;  %v5658_v63 = vld [vmem:[%s7426_s27 + $0x40] sm:$0xff]  ;;  %v5689_v41 = vld [vmem:[%s7426_s27 + $0xf0] sm:$0xff]  ;;  %v4174_v55 = vrot.slane %v5392_v8, 9  ;;  %v709_v56 = vcombine.high %v5415_v12, %v5415_v12  ;;  %v710_v60 = vcombine.high %v5420_v13, %v5420_v13 }
  0x15   :  { %127 = vrot.lane.b32.xlu1 %v5473_v23, %s5257_s28  ;;  %4683 = vmatprep.subr.mxu1 %v5505_v28  ;;  %v5668_v3 = vcombine.low %v5478_v24, %v5627_v54  ;;  %v5694_v43 = vld [vmem:[%s7426_s27 + $0xb8] sm:$0xff]  ;;  %v5720_v2 = vld [vmem:[%s7426_s27 + $0xe8] sm:$0xff]  ;;  %v750_v8 = vrot.slane %v708_v40, 5  ;;  %v712_v40 = vcombine.high %v5442_v17, %v5442_v17  ;;  %v4177_v4 = vrot.slane %v5420_v13, 9 }
  0x16   :  { %4653 = vmatprep.subr.mxu0 %v5516_v30  ;;  %4684 = vmatpush3.msra.mxu1 %v5505_v28  ;;  %7430 = vst [vmem:[#allocation4_spill] sm:$0xff] %v5720_v2  ;;  %v5756_v53 = vsel %vm5635_vm3, %v4172_v50, %v738_v51  ;;  %v4178_v50 = vrot.slane %v5437_v16, 9  ;;  %v5780_v51 = vld [vmem:[%s7426_s27 + $0xd0] sm:$0xff] }
  0x17   :  { %4654 = vmatpush3.msra.mxu0 %v5516_v30  ;;  %4685 = vmatprep.subr.mxu1 %v5530_v32 }
  0x18   :  { %129 = vrot.lane.b32.xlu0 %v5496_v27, %s5257_s28  ;;  %4655 = vmatprep.subr.mxu0 %v5542_v34 }
  0x19   :  { %131 = vrot.lane.b32.xlu1 %v5509_v29, %s5257_s28  ;;  %4686 = vmatpush3.msra.mxu1 %v5530_v32 }
  0x1a   :  { %4656 = vmatpush3.msra.mxu0 %v5542_v34  ;;  %4687 = vmatprep.subr.mxu1 %v5555_v36 }
  0x1b   :  { %4657 = vmatprep.subr.mxu0 %v5567_v38  ;;  %4688 = vmatpush3.msra.mxu1 %v5555_v36 }
  0x1c   :  { %533 = vrot.lane.b32.xlu0 %v5524_v31, %s5257_s28  ;;  %4658 = vmatpush3.msra.mxu0 %v5567_v38 }
  0x1d   :  { %535 = vrot.lane.b32.xlu1 %v5536_v33, %s5257_s28  ;;  %4689 = vmatprep.subr.mxu1 %v5585_v42 }
  0x1e   :  { %4659 = vmatprep.subr.mxu0 %v5596_v45  ;;  %4690 = vmatpush3.msra.mxu1 %v5585_v42 }
  0x1f   :  { %4660 = vmatpush3.msra.mxu0 %v5596_v45  ;;  %4691 = vmatprep.subr.mxu1 %v5608_v47 }
  0x20   :  { %537 = vrot.lane.b32.xlu0 %v5561_v37, %s5257_s28  ;;  %4661 = vmatprep.subr.mxu0 %v5620_v49 }
  0x21   :  { %539 = vrot.lane.b32.xlu1 %v5573_v39, %s5257_s28  ;;  %4692 = vmatpush3.msra.mxu1 %v5608_v47 }
  0x22   :  { %4662 = vmatpush3.msra.mxu0 %v5620_v49  ;;  %4694 = vmatmul.mubr.msk.f32.vlgmr.msra.gmra.mxu1 %vm133_vm0, %v5410_v11  ;;  %v5702_v11 = vsel %vm5635_vm3, %v4169_v57, %v726_v58  ;;  %v742_v49 = vrot.slane %v706_v0, 5  ;;  %v746_v57 = vrot.slane %v707_v1, 5  ;;  %v4175_v58 = vrot.slane %v5403_v10, 9  ;;  %v5735_v0 = vld [vmem:[%s7426_s27 + $0xe0] sm:$0xff] }
  0x23   :  { %4733 = vmatprep.subr.mxu1 %v5653_v62  ;;  %4663 = vmatprep.subr.mxu0 %v5658_v63  ;;  %v4176_v10 = vrot.slane %v5415_v12, 9  ;;  %v711_v1 = vcombine.high %v5437_v16, %v5437_v16  ;;  %v5752_v12 = vld [vmem:[%s7426_s27 + $0xd8] sm:$0xff]  ;;  %v766_v16 = vrot.slane %v712_v40, 5 }
  0x24   :  { %541 = vrot.lane.b32.xlu0 %v5602_v46, %s5257_s28  ;;  %4734 = vmatpush3.msra.mxu1 %v5653_v62 }
  0x25   :  { %543 = vrot.lane.b32.xlu1 %v5614_v48, %s5257_s28  ;;  %4664 = vmatpush3.msra.mxu0 %v5658_v63 }
  0x26   :  { %4735 = vmatprep.subr.mxu1 %v5689_v41  ;;  %4705 = vmatprep.subr.mxu0 %v5694_v43 }
  0x27   :  { %4696 = vmatprep.mubr.msk.f32.mxu1 %vm133_vm0, %v5382_v6  ;;  %4736 = vmatpush3.msra.mxu1 %v5689_v41  ;;  %v754_v6 = vrot.slane %v709_v56, 5  ;;  %v758_v56 = vrot.slane %v710_v60, 5  ;;  %v5798_v60 = vld [vmem:[%s7426_s27 + $0xc8] sm:$0xff] }
  0x28   :  { %545 = vrot.lane.b32.xlu0 %v5647_v61, %s5257_s28  ;;  %4697 = vmatmul.mubr.msk.f32.gmra.mxu1 %vm133_vm0, %v5425_v14  ;;  %v5760_v14 = vsel %vm5635_vm3, %v4173_v52, %v742_v49  ;;  %v713_v49 = vcombine.high %v5449_v18, %v5449_v18  ;;  %7431 = vst [vmem:[#allocation5_spill] sm:$0xff] %v5798_v60  ;;  %v4181_v52 = vrot.slane %v5454_v19, 9 }
  0x29   :  { %547 = vrot.lane.b32.xlu1 %v5668_v3, %s5257_s28  ;;  %4737 = vmatprep.subr.mxu1 %v5720_v2 }
  0x2a   :  { %4738 = vmatpush3.msra.mxu1 %v5720_v2  ;;  %4699 = vmatprep.mubr.msk.f32.mxu1 %vm133_vm0, %v5432_v15  ;;  %v5767_v15 = vsel %vm5635_vm3, %v4174_v55, %v746_v57  ;;  %v5771_v2 = vsel %vm5635_vm3, %v4175_v58, %v750_v8  ;;  %v762_v57 = vrot.slane %v711_v1, 5  ;;  %v4179_v58 = vrot.slane %v5442_v17, 9 }
  0x2b   :  { %4739 = vmatprep.subr.mxu1 %v5735_v0  ;;  %v714_v8 = vcombine.high %v5454_v19, %v5454_v19  ;;  %v4180_v17 = vrot.slane %v5449_v18, 9  ;;  %v715_v1 = vcombine.high %v5459_v20, %v5459_v20  ;;  %v770_v40 = vrot.slane %v713_v49, 5 }
  0x2c   :  { %4740 = vmatpush3.msra.mxu1 %v5735_v0  ;;  %v5815_v18 = vsel %vm5635_vm3, %v4176_v10, %v754_v6  ;;  %v5819_v55 = vsel %vm5635_vm3, %v4177_v4, %v758_v56  ;;  %v5828_v49 = vsel %vm5635_vm3, %v4178_v50, %v762_v57  ;;  %v5832_v10 = vsel %vm5635_vm3, %v4179_v58, %v766_v16  ;;  %v5957_v4 = vld [vmem:[%s7426_s27 + $0x88] sm:$0xff] }
  0x2d   :  { %4700 = vmatmul.mubr.msk.f32.gmra.mxu1 %vm133_vm0, %v5473_v23  ;;  %4741 = vmatprep.subr.mxu1 %v5752_v12  ;;  %v716_v23 = vcombine.high %v5478_v24, %v5478_v24  ;;  %v774_v13 = vrot.slane %v714_v8, 5  ;;  %v778_v6 = vrot.slane %v715_v1, 5  ;;  %v4183_v56 = vrot.slane %v5478_v24, 9 }
  0x2e   :  { %4742 = vmatpush3.msra.mxu1 %v5752_v12  ;;  %4702 = vmatprep.mubr.msk.f32.mxu1 %vm133_vm0, %v5496_v27  ;;  %v5811_v27 = vld [vmem:[%s7426_s27 + $0xc0] sm:$0xff]  ;;  %v5844_v50 = vsel %vm5635_vm3, %v4180_v17, %v770_v40  ;;  %v1131_v16 = vcombine.high %v5547_v35, %v5547_v35  ;;  %v5944_v17 = vld [vmem:[%s7426_s27 + $0x90] sm:$0xff] }
  0x2f   :  { %4743 = vmatprep.subr.mxu1 %v5780_v51  ;;  %7432 = vst [vmem:[#allocation6_spill] sm:$0xff] %v5811_v27  ;;  %v782_v8 = vrot.slane %v716_v23, 5  ;;  %v5848_v57 = vsel %vm5635_vm3, %v4181_v52, %v774_v13  ;;  %v4208_v13 = vrot.slane %v5547_v35, 9  ;;  %v5901_v23 = vld [vmem:[%s7426_s27 + $0xb0] sm:$0xff] }
  0x30   :  { %4744 = vmatpush3.msra.mxu1 %v5780_v51  ;;  %v1135_v52 = vrot.slane %v1131_v16, 5 }
  0x31   :  { %4703 = vmatmul.mubr.msk.f32.gmra.mxu1 %vm133_vm0, %v5509_v29  ;;  %4745 = vmatprep.subr.mxu1 %v5798_v60  ;;  %v4182_v29 = vrot.slane %v5459_v20, 9  ;;  %v5858_v58 = vsel %vm5635_vm3, %v4183_v56, %v782_v8  ;;  %v4209_v56 = vrot.slane %v5627_v54, 9  ;;  %v5935_v8 = vld [vmem:[%s7426_s27 + $0x98] sm:$0xff] }
  0x32   :  { %4746 = vmatpush3.msra.mxu1 %v5798_v60  ;;  %v5871_v40 = vsel %vm5635_vm3, %v4208_v13, %v1135_v52  ;;  %v5922_v52 = vld [vmem:[%s7426_s27 + $0xa0] sm:$0xff] }
  0x33   :  { %4747 = vmatprep.subr.mxu1 %v5811_v27  ;;  %v5854_v24 = vsel %vm5635_vm3, %v4182_v29, %v778_v6  ;;  %7433 = vst [vmem:[#allocation7_spill] sm:$0xff] %v5871_v40  ;;  %v1132_v6 = vcombine.high %v5627_v54, %v5627_v54 }
  0x34   :  { %4748 = vmatpush3.msra.mxu1 %v5811_v27 }
  0x35   :  { %4789 = vmatprep.subr.mxu1 %v5397_v9  ;;  %v1139_v35 = vrot.slane %v1132_v6, 5 }
  0x37   :  { %v5886_v13 = vsel %vm5635_vm3, %v4209_v56, %v1139_v35  ;;  %v5913_v56 = vld [vmem:[%s7426_s27 + $0xa8] sm:$0xff] }
  0x38   :  { %7434 = vst [vmem:[#allocation8_spill] sm:$0xff] %v5886_v13  ;;  %v5966_v13 = vld [vmem:[%s7426_s27 + $0x80] sm:$0xff] }
  0x7e   :  { %v5890_v29 = vpop.permute.xlu0 %117 }
  0x7f   :  { %v5892_v54 = vpop.permute.xlu1 %121  ;;  %4665 = vmatprep.mubr.msk.f32.mxu0 %vm133_vm0, %v5890_v29 }
  0x82   :  { %v5896_v6 = vpop.permute.xlu0 %119 }
  0x83   :  { %v5903_v59 = vpop.permute.xlu1 %123  ;;  %4666 = vmatmul.mubr.msk.f32.vlgmr.msra.gmra.mxu0 %vm133_vm0, %v5896_v6 }
  0x84   :  { %4668 = vmatprep.mubr.msk.f32.mxu0 %vm133_vm0, %v5892_v54  ;;  %4706 = vmatpush3.msra.mxu0 %v5694_v43 }
  0x85   :  { %4707 = vmatprep.subr.mxu0 %v5901_v23 }
  0x86   :  { %4708 = vmatpush3.msra.mxu0 %v5901_v23  ;;  %v5917_v35 = vpop.permute.xlu0 %125 }
  0x87   :  { %v5924_v16 = vpop.permute.xlu1 %127  ;;  %4669 = vmatmul.mubr.msk.f32.gmra.mxu0 %vm133_vm0, %v5903_v59  ;;  %4709 = vmatprep.subr.mxu0 %v5913_v56 }
  0x88   :  { %4710 = vmatpush3.msra.mxu0 %v5913_v56  ;;  %4671 = vmatprep.mubr.msk.f32.mxu0 %vm133_vm0, %v5917_v35 }
  0x89   :  { %4711 = vmatprep.subr.mxu0 %v5922_v52 }
  0x8a   :  { %4712 = vmatpush3.msra.mxu0 %v5922_v52  ;;  %v5939_v1 = vpop.permute.xlu0 %129 }
  0x8b   :  { %v5946_v20 = vpop.permute.xlu1 %131  ;;  %4672 = vmatmul.mubr.msk.f32.gmra.mxu0 %vm133_vm0, %v5924_v16  ;;  %4713 = vmatprep.subr.mxu0 %v5935_v8 }
  0x8c   :  { %4714 = vmatpush3.msra.mxu0 %v5935_v8  ;;  %4674 = vmatprep.mubr.msk.f32.mxu0 %vm133_vm0, %v5939_v1 }
  0x8d   :  { %4715 = vmatprep.subr.mxu0 %v5944_v17 }
  0x8e   :  { %4716 = vmatpush3.msra.mxu0 %v5944_v17  ;;  %v5961_v19 = vpop.permute.xlu0 %533 }
  0x8f   :  { %v5968_v40 = vpop.permute.xlu1 %535  ;;  %4675 = vmatmul.mubr.msk.f32.gmra.mxu0 %vm133_vm0, %v5946_v20  ;;  %4717 = vmatprep.subr.mxu0 %v5957_v4 }
  0x90   :  { %4749 = vmatprep.mubr.msk.f32.mxu1 %vm133_vm0, %v5961_v19  ;;  %4718 = vmatpush3.msra.mxu0 %v5957_v4 }
  0x91   :  { %4750 = vmatmul.mubr.msk.f32.vlgmr.msra.gmra.mxu1 %vm133_vm0, %v5968_v40  ;;  %4719 = vmatprep.subr.mxu0 %v5966_v13 }
  0x92   :  { %4790 = vmatpush3.msra.mxu1 %v5397_v9  ;;  %4720 = vmatpush3.msra.mxu0 %v5966_v13  ;;  %v5981_v27 = vpop.permute.xlu0 %537 }
  0x93   :  { %4721 = vmatprep.mubr.msk.f32.mxu0 %vm133_vm0, %v5524_v31  ;;  %4791 = vmatprep.subr.mxu1 %v5464_v21  ;;  %v5986_v60 = vpop.permute.xlu1 %539  ;;  %v7438_v31 = vcombine.low %v5756_v53, %v5760_v14 }
  0x94   :  { %4722 = vmatmul.mubr.msk.f32.vlgmr.msra.gmra.mxu0 %vm133_vm0, %v5536_v33  ;;  %4752 = vmatprep.mubr.msk.f32.mxu1 %vm133_vm0, %v5981_v27  ;;  %v7440_v33 = vld [vmem:[#allocation4_spill] sm:$0xff] }
  0x95   :  { %4761 = vmatprep.subr.mxu0 %v5469_v22  ;;  %4792 = vmatpush3.msra.mxu1 %v5464_v21 }
  0x96   :  { %4753 = vmatmul.mubr.msk.f32.gmra.mxu1 %vm133_vm0, %v5986_v60  ;;  %4762 = vmatpush3.msra.mxu0 %v5469_v22  ;;  %v5999_v9 = vpop.permute.xlu0 %541 }
  0x97   :  { %4793 = vmatprep.subr.mxu1 %v5485_v25  ;;  %4763 = vmatprep.subr.mxu0 %v5490_v26  ;;  %v6006_v21 = vpop.permute.xlu1 %543 }
  0x98   :  { %4794 = vmatpush3.msra.mxu1 %v5485_v25  ;;  %4724 = vmatprep.mubr.msk.f32.mxu0 %vm133_vm0, %v5561_v37  ;;  %v7443_v37 = vcombine.low %v5844_v50, %v5848_v57 }
  0x99   :  { %4764 = vmatpush3.msra.mxu0 %v5490_v26  ;;  %4795 = vmatprep.subr.mxu1 %v5505_v28  ;;  %v7435_v26 = vld [vmem:[#allocation3_spill] sm:$0xff] }
  0x9a   :  { %4725 = vmatmul.mubr.msk.f32.gmra.mxu0 %vm133_vm0, %v5573_v39  ;;  %4755 = vmatprep.mubr.msk.f32.mxu1 %vm133_vm0, %v5999_v9  ;;  %v6019_v22 = vpop.permute.xlu0 %545  ;;  %v7445_v39 = vld [vmem:[#allocation5_spill] sm:$0xff] }
  0x9b   :  { %4765 = vmatprep.subr.mxu0 %v5516_v30  ;;  %4796 = vmatpush3.msra.mxu1 %v5505_v28  ;;  %v6026_v25 = vpop.permute.xlu1 %547  ;;  %v7436_v28 = vcombine.low %v5698_v44, %v5702_v11 }
  0x9c   :  { %4756 = vmatmul.mubr.msk.f32.gmra.mxu1 %vm133_vm0, %v6006_v21  ;;  %4766 = vmatpush3.msra.mxu0 %v5516_v30  ;;  %v7437_v30 = vcombine.low %v5673_v5, %v5677_v7 }
  0x9d   :  { %4797 = vmatprep.subr.mxu1 %v5530_v32  ;;  %4767 = vmatprep.subr.mxu0 %v5542_v34 }
  0x9e   :  { %4798 = vmatpush3.msra.mxu1 %v5530_v32  ;;  %4727 = vmatprep.mubr.msk.f32.mxu0 %vm133_vm0, %v5602_v46  ;;  %v7439_v32 = vcombine.low %v5767_v15, %v5771_v2  ;;  %v7448_v46 = vcombine.low %v5677_v7, %v5756_v53 }
  0x9f   :  { %4768 = vmatpush3.msra.mxu0 %v5542_v34  ;;  %4799 = vmatprep.subr.mxu1 %v5555_v36  ;;  %v7441_v34 = vcombine.low %v5815_v18, %v5819_v55 }
  0xa0   :  { %4728 = vmatmul.mubr.msk.f32.gmra.mxu0 %vm133_vm0, %v5614_v48  ;;  %4758 = vmatprep.mubr.msk.f32.mxu1 %vm133_vm0, %v6019_v22  ;;  %v7450_v48 = vld [vmem:[#allocation7_spill] sm:$0xff] }
  0xa1   :  { %4769 = vmatprep.subr.mxu0 %v5567_v38  ;;  %4800 = vmatpush3.msra.mxu1 %v5555_v36  ;;  %v7442_v36 = vcombine.low %v5828_v49, %v5832_v10 }
  0xa2   :  { %4759 = vmatmul.mubr.msk.f32.gmra.mxu1 %vm133_vm0, %v6026_v25  ;;  %4770 = vmatpush3.msra.mxu0 %v5567_v38  ;;  %v7444_v38 = vcombine.low %v5854_v24, %v5858_v58 }
  0xa3   :  { %4801 = vmatprep.subr.mxu1 %v5585_v42  ;;  %4771 = vmatprep.subr.mxu0 %v5596_v45 }
  0xa4   :  { %4802 = vmatpush3.msra.mxu1 %v5585_v42  ;;  %4805 = vmatprep.mubr.msk.f32.mxu1 %vm133_vm0, %v5890_v29  ;;  %v7446_v42 = vld [vmem:[#allocation6_spill] sm:$0xff] }
  0xa5   :  { %4730 = vmatprep.mubr.msk.f32.mxu0 %vm133_vm0, %v5647_v61  ;;  %4772 = vmatpush3.msra.mxu0 %v5596_v45  ;;  %v7447_v45 = vcombine.low %v5702_v11, %v5673_v5  ;;  %v7451_v61 = vcombine.low %v5771_v2, %v7450_v48  ;;  %v7455_v5 = vld [vmem:[#allocation8_spill] sm:$0xff] }
  0xa6   :  { %4803 = vmatprep.subr.mxu1 %v5608_v47  ;;  %4731 = vmatmul.mubr.msk.f32.gmra.mxu0 %vm133_vm0, %v5668_v3  ;;  %v7454_v3 = vcombine.low %v5848_v57, %v5854_v24  ;;  %v7456_v7 = vcombine.low %v5858_v58, %v7455_v5  ;;  %v6182_v58 = vld [vmem:[%s7395_s4] ss:$0 sm:$0xff]  ;;  %s5258_s4 = smov 32  }
  0xa7   :  { %4773 = vmatprep.subr.mxu0 %v7435_v26  ;;  %4804 = vmatpush3.msra.mxu1 %v5608_v47  ;;  %v7449_v47 = vcombine.low %v5760_v14, %v5767_v15 }
  0xa8   :  { %4774 = vmatpush3.msra.mxu0 %v7435_v26  ;;  %4806 = vmatmul.mubr.msk.f32.vlgmr.msra.gmra.mxu1 %vm133_vm0, %v5896_v6 }
  0xa9   :  { %4775 = vmatprep.subr.mxu0 %v5658_v63  ;;  %4808 = vmatprep.mubr.msk.f32.mxu1 %vm133_vm0, %v5892_v54 }
  0xaa   :  { %4776 = vmatpush3.msra.mxu0 %v5658_v63  ;;  %4777 = vmatprep.mubr.msk.f32.mxu0 %vm133_vm0, %v7436_v28  ;;  %v7453_v63 = vcombine.low %v5832_v10, %v5844_v50 }
  0xab   :  { %4778 = vmatmul.mubr.msk.f32.vlgmr.msra.gmra.mxu0 %vm133_vm0, %v7437_v30  ;;  %4817 = vmatprep.subr.mxu0 %v5694_v43 }
  0xac   :  { %4845 = vmatprep.subr.mxu1 %v5653_v62  ;;  %4809 = vmatmul.mubr.msk.f32.gmra.mxu1 %vm133_vm0, %v5903_v59 }
  0xad   :  { %4818 = vmatpush3.msra.mxu0 %v5694_v43  ;;  %4846 = vmatpush3.msra.mxu1 %v5653_v62  ;;  %v7452_v62 = vcombine.low %v5819_v55, %v5828_v49 }
  0xae   :  { %4811 = vmatprep.mubr.msk.f32.mxu1 %vm133_vm0, %v5917_v35  ;;  %4819 = vmatprep.subr.mxu0 %v5901_v23 }
  0xaf   :  { %4847 = vmatprep.subr.mxu1 %v5689_v41  ;;  %4780 = vmatprep.mubr.msk.f32.mxu0 %vm133_vm0, %v7438_v31 }
  0xb0   :  { %4820 = vmatpush3.msra.mxu0 %v5901_v23  ;;  %4848 = vmatpush3.msra.mxu1 %v5689_v41 }
  0xb1   :  { %4781 = vmatmul.mubr.msk.f32.gmra.mxu0 %vm133_vm0, %v7439_v32  ;;  %4821 = vmatprep.subr.mxu0 %v5913_v56 }
  0xb2   :  { %4849 = vmatprep.subr.mxu1 %v7440_v33  ;;  %4812 = vmatmul.mubr.msk.f32.gmra.mxu1 %vm133_vm0, %v5924_v16 }
  0xb3   :  { %4822 = vmatpush3.msra.mxu0 %v5913_v56  ;;  %4850 = vmatpush3.msra.mxu1 %v7440_v33 }
  0xb4   :  { %4814 = vmatprep.mubr.msk.f32.mxu1 %vm133_vm0, %v5939_v1  ;;  %4823 = vmatprep.subr.mxu0 %v5922_v52 }
  0xb5   :  { %4851 = vmatprep.subr.mxu1 %v5735_v0  ;;  %4783 = vmatprep.mubr.msk.f32.mxu0 %vm133_vm0, %v7441_v34 }
  0xb6   :  { %4824 = vmatpush3.msra.mxu0 %v5922_v52  ;;  %4852 = vmatpush3.msra.mxu1 %v5735_v0 }
  0xb7   :  { %4784 = vmatmul.mubr.msk.f32.gmra.mxu0 %vm133_vm0, %v7442_v36  ;;  %4825 = vmatprep.subr.mxu0 %v5935_v8 }
  0xb8   :  { %4853 = vmatprep.subr.mxu1 %v5752_v12  ;;  %4815 = vmatmul.mubr.msk.f32.gmra.mxu1 %vm133_vm0, %v5946_v20 }
  0xb9   :  { %4826 = vmatpush3.msra.mxu0 %v5935_v8  ;;  %4854 = vmatpush3.msra.mxu1 %v5752_v12 }
  0xba   :  { %4827 = vmatprep.subr.mxu0 %v5944_v17  ;;  %4855 = vmatprep.subr.mxu1 %v5780_v51 }
  0xbb   :  { %4786 = vmatprep.mubr.msk.f32.mxu0 %vm133_vm0, %v7443_v37  ;;  %4828 = vmatpush3.msra.mxu0 %v5944_v17 }
  0xbc   :  { %4856 = vmatpush3.msra.mxu1 %v5780_v51  ;;  %4787 = vmatmul.mubr.msk.f32.gmra.mxu0 %vm133_vm0, %v7444_v38 }
  0xbd   :  { %4829 = vmatprep.subr.mxu0 %v5957_v4  ;;  %4857 = vmatprep.subr.mxu1 %v7445_v39 }
  0xbe   :  { %4830 = vmatpush3.msra.mxu0 %v5957_v4  ;;  %4833 = vmatprep.mubr.msk.f32.mxu0 %vm133_vm0, %v5961_v19 }
  0xbf   :  { %4858 = vmatpush3.msra.mxu1 %v7445_v39  ;;  %4831 = vmatprep.subr.mxu0 %v5966_v13 }
  0xc0   :  { %4859 = vmatprep.subr.mxu1 %v7446_v42  ;;  %4832 = vmatpush3.msra.mxu0 %v5966_v13 }
  0xc1   :  { %4860 = vmatpush3.msra.mxu1 %v7446_v42  ;;  %4861 = vmatprep.mubr.msk.f32.mxu1 %vm133_vm0, %v7447_v45 }
  0xc2   :  { %4834 = vmatmul.mubr.msk.f32.vlgmr.msra.gmra.mxu0 %vm133_vm0, %v5968_v40  ;;  %4862 = vmatmul.mubr.msk.f32.vlgmr.msra.gmra.mxu1 %vm133_vm0, %v7448_v46 }
  0xc3   :  { %4836 = vmatprep.mubr.msk.f32.mxu0 %vm133_vm0, %v5981_v27  ;;  %4864 = vmatprep.mubr.msk.f32.mxu1 %vm133_vm0, %v7449_v47 }
  0xc6   :  { %4837 = vmatmul.mubr.msk.f32.gmra.mxu0 %vm133_vm0, %v5986_v60  ;;  %4865 = vmatmul.mubr.msk.f32.gmra.mxu1 %vm133_vm0, %v7451_v61 }
  0xc7   :  { %4839 = vmatprep.mubr.msk.f32.mxu0 %vm133_vm0, %v5999_v9  ;;  %4867 = vmatprep.mubr.msk.f32.mxu1 %vm133_vm0, %v7452_v62 }
  0xca   :  { %4840 = vmatmul.mubr.msk.f32.gmra.mxu0 %vm133_vm0, %v6006_v21  ;;  %4868 = vmatmul.mubr.msk.f32.gmra.mxu1 %vm133_vm0, %v7453_v63 }
  0xcb   :  { %4842 = vmatprep.mubr.msk.f32.mxu0 %vm133_vm0, %v6019_v22  ;;  %4870 = vmatprep.mubr.msk.f32.mxu1 %vm133_vm0, %v7454_v3 }
  0xce   :  { %4843 = vmatmul.mubr.msk.f32.gmra.mxu0 %vm133_vm0, %v6026_v25  ;;  %4871 = vmatmul.mubr.msk.f32.gmra.mxu1 %vm133_vm0, %v7456_v7 }
  0xe2   :  { %v4695_v41 = vpop.f32.mrf.mxu1 }
  0xe4   :  { %v337_v43 = vpop.f32.mrf.mxu1 }
  0xe8   :  { %v4698_v44 = vpop.f32.mrf.mxu1 }
  0xea   :  { %v347_v11 = vpop.f32.mrf.mxu1 }
  0xed   :  { %v4701_v53 = vpop.f32.mrf.mxu1 }
  0xef   :  { %v357_v12 = vpop.f32.mrf.mxu1 }
  0xf1   :  { %v4704_v51 = vpop.f32.mrf.mxu1 }
  0xf3   :  { %v367_v27 = vpop.f32.mrf.mxu1 }
 0x143   :  { %v4667_v2 = vpop.f32.mrf.mxu0 }
 0x144   :  { %v343_v4 = vadd.f32 %v4695_v41, %v4667_v2 }
 0x145   :  { %v216_v0 = vpop.f32.mrf.mxu0 }
 0x146   :  { %v338_v20 = vadd.f32 %v337_v43, %v216_v0 }
 0x147   :  { %v4670_v14 = vpop.f32.mrf.mxu0 }
 0x148   :  { %v353_v8 = vadd.f32 %v4698_v44, %v4670_v14 }
 0x149   :  { %v226_v15 = vpop.f32.mrf.mxu0 }
 0x14a   :  { %v348_v54 = vadd.f32 %v347_v11, %v226_v15 }
 0x14b   :  { %v4673_v55 = vpop.f32.mrf.mxu0 }
 0x14c   :  { %v363_v25 = vadd.f32 %v4701_v53, %v4673_v55 }
 0x14d   :  { %v236_v60 = vpop.f32.mrf.mxu0 }
 0x14e   :  { %v358_v31 = vadd.f32 %v357_v12, %v236_v60 }
 0x14f   :  { %v4676_v18 = vpop.f32.mrf.mxu0 }
 0x150   :  { %v373_v42 = vadd.f32 %v4704_v51, %v4676_v18 }
 0x151   :  { %v4751_v19 = vpop.f32.mrf.mxu1  ;;  %v246_v49 = vpop.f32.mrf.mxu0 }
 0x152   :  { %v368_v10 = vadd.f32 %v367_v27, %v246_v49 }
 0x153   :  { %v631_v50 = vpop.f32.mrf.mxu1 }
 0x154   :  { %v4723_v57 = vpop.f32.mrf.mxu0 }
 0x155   :  { %v517_v24 = vadd.f32 %v4723_v57, %v343_v4 }
 0x156   :  { %v4754_v17 = vpop.f32.mrf.mxu1  ;;  %v477_v1 = vpop.f32.mrf.mxu0 }
 0x157   :  { %v671_v23 = vadd.f32 %v4751_v19, %v517_v24  ;;  %v516_v40 = vadd.f32 %v477_v1, %v338_v20 }
 0x158   :  { %v641_v29 = vpop.f32.mrf.mxu1 }
 0x159   :  { %v6185_v16 = vadd.f32 %v6182_v58, %v671_v23  ;;  %v670_v13 = vadd.f32 %v631_v50, %v516_v40 }
 0x15a   :  { %v4726_v52 = vpop.f32.mrf.mxu0 }
 0x15b   :  { %v6188_v6 = vadd.f32 %v6182_v58, %v670_v13  ;;  %v519_v59 = vadd.f32 %v4726_v52, %v353_v8 }
 0x15c   :  { %v4757_v56 = vpop.f32.mrf.mxu1  ;;  %v487_v35 = vpop.f32.mrf.mxu0 }
 0x15d   :  { %v673_v9 = vadd.f32 %v4754_v17, %v519_v59  ;;  %v518_v21 = vadd.f32 %v487_v35, %v348_v54 }
 0x15e   :  { %v651_v22 = vpop.f32.mrf.mxu1 }
 0x15f   :  { %v6191_v26 = vadd.f32 %v6182_v58, %v673_v9  ;;  %v672_v28 = vadd.f32 %v641_v29, %v518_v21 }
 0x160   :  { %v4729_v30 = vpop.f32.mrf.mxu0 }
 0x161   :  { %v6194_v32 = vadd.f32 %v6182_v58, %v672_v28  ;;  %v521_v33 = vadd.f32 %v4729_v30, %v363_v25 }
 0x162   :  { %v4760_v34 = vpop.f32.mrf.mxu1  ;;  %v497_v36 = vpop.f32.mrf.mxu0 }
 0x163   :  { %v675_v37 = vadd.f32 %v4757_v56, %v521_v33  ;;  %v520_v38 = vadd.f32 %v497_v36, %v358_v31 }
 0x164   :  { %v661_v39 = vpop.f32.mrf.mxu1 }
 0x165   :  { %v6197_v45 = vadd.f32 %v6182_v58, %v675_v37  ;;  %v674_v46 = vadd.f32 %v651_v22, %v520_v38 }
 0x166   :  { %v4732_v47 = vpop.f32.mrf.mxu0 }
 0x167   :  { %v6200_v48 = vadd.f32 %v6182_v58, %v674_v46  ;;  %v523_v61 = vadd.f32 %v4732_v47, %v373_v42 }
 0x168   :  { %v4807_v62 = vpop.f32.mrf.mxu1  ;;  %v507_v63 = vpop.f32.mrf.mxu0 }
 0x169   :  { %v677_v3 = vadd.f32 %v4760_v34, %v523_v61  ;;  %v522_v5 = vadd.f32 %v507_v63, %v368_v10 }
 0x16a   :  { %v979_v7 = vpop.f32.mrf.mxu1 }
 0x16b   :  { %v6203_v41 = vadd.f32 %v6182_v58, %v677_v3  ;;  %v676_v43 = vadd.f32 %v661_v39, %v522_v5  ;;  %v4779_v44 = vpop.f32.mrf.mxu0 }
 0x16c   :  { %v4810_v11 = vpop.f32.mrf.mxu1  ;;  %v985_v10 = vadd.f32 %v4807_v62, %v4779_v44 }
 0x16d   :  { %v6206_v53 = vadd.f32 %v6182_v58, %v676_v43  ;;  %v874_v2 = vpop.f32.mrf.mxu0 }
 0x16e   :  { %v989_v0 = vpop.f32.mrf.mxu1  ;;  %v980_v57 = vadd.f32 %v979_v7, %v874_v2 }
 0x171   :  { %v4782_v12 = vpop.f32.mrf.mxu0 }
 0x172   :  { %v4813_v15 = vpop.f32.mrf.mxu1  ;;  %v995_v54 = vadd.f32 %v4810_v11, %v4782_v12 }
 0x173   :  { %v884_v14 = vpop.f32.mrf.mxu0 }
 0x174   :  { %v999_v55 = vpop.f32.mrf.mxu1  ;;  %v990_v8 = vadd.f32 %v989_v0, %v884_v14 }
 0x177   :  { %v4785_v51 = vpop.f32.mrf.mxu0 }
 0x178   :  { %v4816_v27 = vpop.f32.mrf.mxu1  ;;  %v1005_v35 = vadd.f32 %v4813_v15, %v4785_v51 }
 0x179   :  { %v894_v60 = vpop.f32.mrf.mxu0 }
 0x17a   :  { %v1009_v49 = vpop.f32.mrf.mxu1  ;;  %v1000_v31 = vadd.f32 %v999_v55, %v894_v60 }
 0x17c   :  { %v4788_v18 = vpop.f32.mrf.mxu0 }
 0x17d   :  { %v1015_v39 = vadd.f32 %v4816_v27, %v4788_v18  ;;  %v5259_v27 = vmov 0.0   ;;  %v4233_v18 = vld [vmem:[%s7396_s5 + $0xf8] sm:$0xff] }
 0x17e   :  { %v904_v19 = vpop.f32.mrf.mxu0  ;;  %4873 = vmatprep.subr.mxu0 %v5259_v27  ;;  %4914 = vmatprep.subr.mxu1 %v5259_v27 }
 0x17f   :  { %v1010_v61 = vadd.f32 %v1009_v49, %v904_v19  ;;  %v1542_v19 = vld [vmem:[%s7396_s5 + $0x78] sm:$0xff]  ;;  %v4232_v49 = vld [vmem:[%s7396_s5 + $0xf0] sm:$0xff]  ;;  %4874 = vmatpush3.msra.mxu0 %v4233_v18  ;;  %v1528_v18 = vld [vmem:[%s7396_s5 + $0x8] sm:$0xff]  ;;  %4905 = vmatprep.mubr.msk.f32.mxu0 %vm5260_vm5, %v5259_v27 }
 0x180   :  { %4915 = vmatpush3.msra.mxu1 %v1542_v19  ;;  %4875 = vmatprep.subr.mxu0 %v5259_v27  ;;  %v700_v19 = vmax.f32 %v6203_v41, 0.0 }
 0x181   :  { %4916 = vmatprep.subr.mxu1 %v5259_v27  ;;  %4876 = vmatpush3.msra.mxu0 %v4232_v49  ;;  %v4218_v49 = vld [vmem:[%s7396_s5 + $0x80] sm:$0xff] }
 0x182   :  { %v4835_v4 = vpop.f32.mrf.mxu0  ;;  %v4863_v50 = vpop.f32.mrf.mxu1  ;;  %4877 = vmatprep.subr.mxu0 %v5259_v27  ;;  %4946 = vmatprep.mubr.msk.f32.mxu1 %vm5260_vm5, %v5259_v27 }
 0x183   :  { %v1124_v20 = vadd.f32 %v4835_v4, %v985_v10  ;;  %v1541_v4 = vld [vmem:[%s7396_s5 + $0x70] sm:$0xff] }
 0x184   :  { %v1084_v24 = vpop.f32.mrf.mxu0  ;;  %v1231_v17 = vpop.f32.mrf.mxu1  ;;  %4917 = vmatpush3.msra.mxu1 %v1541_v4  ;;  %v1527_v4 = vld [vmem:[%s7396_s5] sm:$0xff] }
 0x185   :  { %v1271_v1 = vadd.f32 %v4863_v50, %v1124_v20  ;;  %v1123_v23 = vadd.f32 %v1084_v24, %v980_v57  ;;  %v4231_v24 = vld [vmem:[%s7396_s5 + $0xe8] sm:$0xff]  ;;  %4918 = vmatprep.subr.mxu1 %v5259_v27 }
 0x186   :  { %v4838_v40 = vpop.f32.mrf.mxu0  ;;  %v4866_v29 = vpop.f32.mrf.mxu1  ;;  %4878 = vmatpush3.msra.mxu0 %v4231_v24  ;;  %v1392_v24 = vlaneseq }
 0x187   :  { %v1279_v13 = vadd.f32 %v6182_v58, %v1271_v1  ;;  %v1270_v52 = vadd.f32 %v1231_v17, %v1123_v23  ;;  %v1126_v25 = vadd.f32 %v4838_v40, %v995_v54  ;;  %v1540_v17 = vld [vmem:[%s7396_s5 + $0x68] sm:$0xff]  ;;  %v1539_v1 = vld [vmem:[%s7396_s5 + $0x60] sm:$0xff]  ;;  %4879 = vmatprep.subr.mxu0 %v5259_v27  ;;  %v4229_v40 = vld [vmem:[%s7396_s5 + $0xd8] sm:$0xff] }
 0x188   :  { %v1094_v59 = vpop.f32.mrf.mxu0  ;;  %v1241_v56 = vpop.f32.mrf.mxu1  ;;  %4919 = vmatpush3.msra.mxu1 %v1540_v17  ;;  %v1536_v54 = vld [vmem:[%s7396_s5 + $0x48] sm:$0xff] }
 0x189   :  { %v1287_v9 = vmax.f32 %v1279_v13, 0.0  ;;  %v1278_v21 = vadd.f32 %v6182_v58, %v1270_v52  ;;  %v1125_v22 = vadd.f32 %v1094_v59, %v990_v8  ;;  %v1273_v62 = vadd.f32 %v4866_v29, %v1126_v25  ;;  %4920 = vmatprep.subr.mxu1 %v5259_v27  ;;  %v1538_v29 = vld [vmem:[%s7396_s5 + $0x58] sm:$0xff]  ;;  %v4228_v8 = vld [vmem:[%s7396_s5 + $0xd0] sm:$0xff]  ;;  %v4227_v52 = vld [vmem:[%s7396_s5 + $0xc8] sm:$0xff] }
 0x18a   :  { %v4841_v28 = vpop.f32.mrf.mxu0  ;;  %v4869_v30 = vpop.f32.mrf.mxu1  ;;  %4921 = vmatpush3.msra.mxu1 %v1539_v1  ;;  %v1537_v13 = vld [vmem:[%s7396_s5 + $0x50] sm:$0xff]  ;;  %v4226_v59 = vld [vmem:[%s7396_s5 + $0xc0] sm:$0xff]  ;;  %v693_v25 = vmax.f32 %v6188_v6, 0.0 }
 0x18b   :  { %v1286_v33 = vmax.f32 %v1278_v21, 0.0  ;;  %v1272_v34 = vadd.f32 %v1241_v56, %v1125_v22  ;;  %v1128_v36 = vadd.f32 %v4841_v28, %v1005_v35  ;;  %1304 = vrot.lane.b32.xlu1 %v1287_v9, %s5258_s4  ;;  %v1281_v15 = vadd.f32 %v6182_v58, %v1273_v62  ;;  %4922 = vmatprep.subr.mxu1 %v5259_v27  ;;  %v1535_v56 = vld [vmem:[%s7396_s5 + $0x40] sm:$0xff]  ;;  %v4225_v9 = vld [vmem:[%s7396_s5 + $0xb8] sm:$0xff] }
 0x18c   :  { %v1104_v37 = vpop.f32.mrf.mxu0  ;;  %v1251_v38 = vpop.f32.mrf.mxu1  ;;  %4923 = vmatpush3.msra.mxu1 %v1538_v29  ;;  %v694_v35 = vmax.f32 %v6185_v16, 0.0  ;;  %v1534_v21 = vld [vmem:[%s7396_s5 + $0x38] sm:$0xff]  ;;  %v4224_v16 = vld [vmem:[%s7396_s5 + $0xb0] sm:$0xff]  ;;  %v4222_v62 = vld [vmem:[%s7396_s5 + $0xa0] sm:$0xff] }
 0x18d   :  { %v1280_v42 = vadd.f32 %v6182_v58, %v1272_v34  ;;  %v1127_v46 = vadd.f32 %v1104_v37, %v1000_v31  ;;  %v1275_v47 = vadd.f32 %v4869_v30, %v1128_v36  ;;  %1302 = vrot.lane.b32.xlu0 %v1286_v33, %s5258_s4  ;;  %v1289_v50 = vmax.f32 %v1281_v15, 0.0  ;;  %4924 = vmatprep.subr.mxu1 %v5259_v27  ;;  %v1533_v30 = vld [vmem:[%s7396_s5 + $0x30] sm:$0xff] }
 0x18e   :  { %v4844_v63 = vpop.f32.mrf.mxu0  ;;  %v4872_v3 = vpop.f32.mrf.mxu1  ;;  %4925 = vmatpush3.msra.mxu1 %v1537_v13  ;;  %v695_v36 = vmax.f32 %v6194_v32, 0.0 }
 0x18f   :  { %v1288_v5 = vmax.f32 %v1280_v42, 0.0  ;;  %v1283_v7 = vadd.f32 %v6182_v58, %v1275_v47  ;;  %v1130_v43 = vadd.f32 %v4844_v63, %v1015_v39  ;;  %v1274_v44 = vadd.f32 %v1251_v38, %v1127_v46  ;;  %4926 = vmatprep.subr.mxu1 %v5259_v27  ;;  %v4223_v42 = vld [vmem:[%s7396_s5 + $0xa8] sm:$0xff]  ;;  %v1531_v63 = vld [vmem:[%s7396_s5 + $0x20] sm:$0xff] }
 0x190   :  { %v1114_v11 = vpop.f32.mrf.mxu0  ;;  %v1261_v2 = vpop.f32.mrf.mxu1  ;;  %4927 = vmatpush3.msra.mxu1 %v1536_v54  ;;  %v698_v38 = vmax.f32 %v6197_v45, 0.0  ;;  %v1532_v46 = vld [vmem:[%s7396_s5 + $0x28] sm:$0xff] }
 0x191   :  { %v1291_v0 = vmax.f32 %v1283_v7, 0.0  ;;  %v1282_v12 = vadd.f32 %v6182_v58, %v1274_v44  ;;  %v1129_v14 = vadd.f32 %v1114_v11, %v1010_v61  ;;  %1306 = vrot.lane.b32.xlu0 %v1288_v5, %s5258_s4  ;;  %v1277_v55 = vadd.f32 %v4872_v3, %v1130_v43  ;;  %4928 = vmatprep.subr.mxu1 %v5259_v27  ;;  %v4221_v7 = vld [vmem:[%s7396_s5 + $0x98] sm:$0xff] }
 0x192   :  { %4929 = vmatpush3.msra.mxu1 %v1535_v56  ;;  %v697_v61 = vmax.f32 %v6200_v48, 0.0  ;;  %v1530_v43 = vld [vmem:[%s7396_s5 + $0x18] sm:$0xff]  ;;  %v696_v11 = vmax.f32 %v6191_v26, 0.0 }
 0x193   :  { %v1290_v51 = vmax.f32 %v1282_v12, 0.0  ;;  %v1276_v60 = vadd.f32 %v1261_v2, %v1129_v14  ;;  %1312 = vrot.lane.b32.xlu1 %v1291_v0, %s5258_s4  ;;  %v1285_v57 = vadd.f32 %v6182_v58, %v1277_v55  ;;  %4930 = vmatprep.subr.mxu1 %v5259_v27  ;;  %v699_v2 = vmax.f32 %v6206_v53, 0.0  ;;  %v4220_v0 = vld [vmem:[%s7396_s5 + $0x90] sm:$0xff] }
 0x194   :  { %4931 = vmatpush3.msra.mxu1 %v1534_v21  ;;  %v1529_v12 = vld [vmem:[%s7396_s5 + $0x10] sm:$0xff] }
 0x195   :  { %v1284_v10 = vadd.f32 %v6182_v58, %v1276_v60  ;;  %1310 = vrot.lane.b32.xlu0 %v1290_v51, %s5258_s4  ;;  %v4230_v58 = vld [vmem:[%s7396_s5 + $0xe0] sm:$0xff]  ;;  %v1293_v23 = vmax.f32 %v1285_v57, 0.0  ;;  %4932 = vmatprep.subr.mxu1 %v5259_v27  ;;  %v4219_v51 = vld [vmem:[%s7396_s5 + $0x88] sm:$0xff]  ;;  %v5261_v57 = vmov 1966171168  }
 0x196   :  { %4880 = vmatpush3.msra.mxu0 %v4230_v58  ;;  %4933 = vmatpush3.msra.mxu1 %v1533_v30  ;;  %v6414_v58 = vshrl.u32 %v1392_v24, 7 }
 0x197   :  { %v1292_v20 = vmax.f32 %v1284_v10, 0.0  ;;  %4881 = vmatprep.subr.mxu0 %v5259_v27  ;;  %4934 = vmatprep.subr.mxu1 %v5259_v27 }
 0x198   :  { %4882 = vmatpush3.msra.mxu0 %v4229_v40  ;;  %4935 = vmatpush3.msra.mxu1 %v1532_v46 }
 0x199   :  { %1314 = vrot.lane.b32.xlu1 %v1292_v20, %s5258_s4  ;;  %1308 = vrot.lane.b32.xlu0 %v1289_v50, %s5258_s4  ;;  %v1390_v20 = vunpack.c.l.s4 %v5261_v57 }
 0x19a   :  { %4883 = vmatprep.subr.mxu0 %v5259_v27  ;;  %4936 = vmatprep.subr.mxu1 %v5259_v27 }
 0x19b   :  { %4884 = vmatpush3.msra.mxu0 %v4228_v8  ;;  %4937 = vmatpush3.msra.mxu1 %v1531_v63  ;;  %v1391_v17 = vunpack.c.0.s8 %v1390_v20 }
 0x19c   :  { %4885 = vmatprep.subr.mxu0 %v5259_v27  ;;  %4938 = vmatprep.subr.mxu1 %v5259_v27 }
 0x19d   :  { %1316 = vrot.lane.b32.xlu1 %v1293_v23, %s5258_s4  ;;  %4886 = vmatpush3.msra.mxu0 %v4227_v52  ;;  %v6417_v1 = vsub.s32 %v1391_v17, %v6414_v58 }
 0x19e   :  { %4887 = vmatprep.subr.mxu0 %v5259_v27  ;;  %4939 = vmatpush3.msra.mxu1 %v1530_v43 }
 0x19f   :  { %4888 = vmatpush3.msra.mxu0 %v4226_v59  ;;  %4940 = vmatprep.subr.mxu1 %v5259_v27 }
 0x1a0   :  { %4889 = vmatprep.subr.mxu0 %v5259_v27  ;;  %4941 = vmatpush3.msra.mxu1 %v1529_v12 }
 0x1a1   :  { %4890 = vmatpush3.msra.mxu0 %v4225_v9  ;;  %4942 = vmatprep.subr.mxu1 %v5259_v27 }
 0x1a2   :  { %4891 = vmatprep.subr.mxu0 %v5259_v27  ;;  %4943 = vmatpush3.msra.mxu1 %v1528_v18 }
 0x1a3   :  { %4892 = vmatpush3.msra.mxu0 %v4224_v16  ;;  %4944 = vmatprep.subr.mxu1 %v5259_v27 }
 0x1a4   :  { %4893 = vmatprep.subr.mxu0 %v5259_v27  ;;  %4945 = vmatpush3.msra.mxu1 %v1527_v4 }
 0x1a5   :  { %4894 = vmatpush3.msra.mxu0 %v4223_v42  ;;  %4996 = vmatprep.subr.mxu1 %v5259_v27 }
 0x1a6   :  { %4895 = vmatprep.subr.mxu0 %v5259_v27 }
 0x1a7   :  { %4896 = vmatpush3.msra.mxu0 %v4222_v62 }
 0x1a8   :  { %4897 = vmatprep.subr.mxu0 %v5259_v27 }
 0x1a9   :  { %4898 = vmatpush3.msra.mxu0 %v4221_v7 }
 0x1aa   :  { %4899 = vmatprep.subr.mxu0 %v5259_v27 }
 0x1ab   :  { %4900 = vmatpush3.msra.mxu0 %v4220_v0 }
 0x1ac   :  { %4901 = vmatprep.subr.mxu0 %v5259_v27 }
 0x1ad   :  { %4902 = vmatpush3.msra.mxu0 %v4219_v51 }
 0x1ae   :  { %4903 = vmatprep.subr.mxu0 %v5259_v27 }
 0x1af   :  { %4904 = vmatpush3.msra.mxu0 %v4218_v49 }
 0x1b0   :  { %4955 = vmatprep.subr.mxu0 %v5259_v27 }
 0x1fd   :  { %v1305_v22 = vpop.permute.xlu1 %1304 }
 0x1fe   :  { %v6299_v28 = vsel %vm1326_vm4, %v694_v35, %v1305_v22 }
 0x1ff   :  { %v1344_v31 = vcombine.high %v6299_v28, %v6299_v28  ;;  %v1303_v33 = vpop.permute.xlu0 %1302 }
 0x200   :  { %v6312_v6 = vsel %vm1326_vm4, %v693_v25, %v1303_v33 }
 0x201   :  { %v1343_v34 = vcombine.high %v6312_v6, %v6312_v6  ;;  %1353 = vrot.lane.b32.xlu1 %v1344_v31, %s5257_s28 }
 0x203   :  { %v1307_v37 = vpop.permute.xlu0 %1306  ;;  %1351 = vrot.lane.b32.xlu0 %v1343_v34, %s5257_s28 }
 0x204   :  { %v6323_v39 = vsel %vm1326_vm4, %v695_v36, %v1307_v37 }
 0x205   :  { %v1345_v47 = vcombine.high %v6323_v39, %v6323_v39  ;;  %v1313_v32 = vpop.permute.xlu1 %1312 }
 0x206   :  { %v6335_v45 = vsel %vm1326_vm4, %v698_v38, %v1313_v32 }
 0x207   :  { %v1348_v3 = vcombine.high %v6335_v45, %v6335_v45  ;;  %v1311_v5 = vpop.permute.xlu0 %1310  ;;  %1355 = vrot.lane.b32.xlu0 %v1345_v47, %s5257_s28 }
 0x208   :  { %v6349_v48 = vsel %vm1326_vm4, %v697_v61, %v1311_v5 }
 0x209   :  { %v1347_v44 = vcombine.high %v6349_v48, %v6349_v48  ;;  %1361 = vrot.lane.b32.xlu1 %v1348_v3, %s5257_s28 }
 0x20b   :  { %v1315_v14 = vpop.permute.xlu1 %1314  ;;  %v1309_v15 = vpop.permute.xlu0 %1308  ;;  %1359 = vrot.lane.b32.xlu0 %v1347_v44, %s5257_s28 }
 0x20c   :  { %v6373_v26 = vsel %vm1326_vm4, %v699_v2, %v1315_v14  ;;  %v6376_v53 = vsel %vm1326_vm4, %v696_v11, %v1309_v15 }
 0x20d   :  { %v1349_v55 = vcombine.high %v6373_v26, %v6373_v26  ;;  %v1346_v60 = vcombine.high %v6376_v53, %v6376_v53 }
 0x20f   :  { %v1317_v10 = vpop.permute.xlu1 %1316  ;;  %1363 = vrot.lane.b32.xlu1 %v1349_v55, %s5257_s28  ;;  %1357 = vrot.lane.b32.xlu0 %v1346_v60, %s5257_s28 }
 0x210   :  { %v6401_v50 = vsel %vm1326_vm4, %v700_v19, %v1317_v10 }
 0x211   :  { %v1350_v41 = vcombine.high %v6401_v50, %v6401_v50 }
 0x213   :  { %1365 = vrot.lane.b32.xlu1 %v1350_v41, %s5257_s28 }
 0x273   :  { %v1354_v23 = vpop.permute.xlu1 %1353 }
 0x274   :  { %v1376_v40 = vsel %vm133_vm0, %v6299_v28, %v1354_v23 }
 0x275   :  { %v1418_v29 = vrot.slane %v1376_v40, %v6417_v1  ;;  %v1352_v8 = vpop.permute.xlu0 %1351 }
 0x276   :  { %v1375_v13 = vsel %vm133_vm0, %v6312_v6, %v1352_v8 }
 0x277   :  { %v1395_v52 = vrot.slane %v1375_v13, %v6417_v1  ;;  %v1419_v54 = vcombine.high %v1418_v29, %v1418_v29  ;;  %v6431_v25 = vrot.slane %v1418_v29, %v6417_v1 }
 0x279   :  { %v1396_v59 = vcombine.high %v1395_v52, %v1395_v52  ;;  %v1356_v56 = vpop.permute.xlu0 %1355  ;;  %v1403_v35 = vrot.slane %v1395_v52, %v6417_v1  ;;  %v6434_v28 = vrot.slane %v1419_v54, %v6417_v1  ;;  %v6442_v37 = vcombine.high %v6431_v25, %v6431_v25 }
 0x27a   :  { %v1377_v9 = vsel %vm133_vm0, %v6323_v39, %v1356_v56 }
 0x27b   :  { %v1410_v21 = vrot.slane %v1396_v59, %v6417_v1  ;;  %v1441_v22 = vrot.slane %v1377_v9, %v6417_v1  ;;  %v1411_v16 = vcombine.high %v1403_v35, %v1403_v35  ;;  %v1362_v31 = vpop.permute.xlu1 %1361  ;;  %v4234_v38 = vcombine.high %v6431_v25, %v6434_v28 }
 0x27c   :  { %v1380_v42 = vsel %vm133_vm0, %v6335_v45, %v1362_v31  ;;  %v1764_v45 = vcombine.low %v6434_v28, %v6442_v37 }
 0x27d   :  { %v1543_v30 = vcombine.high %v1410_v21, %v1410_v21  ;;  %v1442_v33 = vcombine.high %v1441_v22, %v1441_v22  ;;  %v6437_v6 = vrot.slane %v1441_v22, %v6417_v1  ;;  %v1360_v34 = vpop.permute.xlu0 %1359  ;;  %v1566_v46 = vcombine.low %v1410_v21, %v1411_v16 }
 0x27e   :  { %v1762_v47 = vcombine.low %v1403_v35, %v1410_v21  ;;  %v1379_v61 = vsel %vm133_vm0, %v6349_v48, %v1360_v34  ;;  %v1763_v63 = vcombine.low %v1411_v16, %v6431_v25  ;;  %v1487_v5 = vrot.slane %v1380_v42, %v6417_v1  ;;  %v4252_v21 = vld [vmem:[%s7396_s5 + $0x178] sm:$0xff]  ;;  %v4251_v42 = vld [vmem:[%s7396_s5 + $0x170] sm:$0xff] }
 0x27f   :  { %v1567_v36 = vcombine.low %v1543_v30, %v6434_v28  ;;  %v6447_v39 = vrot.slane %v1442_v33, %v6417_v1  ;;  %v1457_v32 = vcombine.high %v6437_v6, %v6437_v6  ;;  %v1464_v44 = vrot.slane %v1379_v61, %v6417_v1 }
 0x280   :  { %v1590_v11 = vrot.slane %v4234_v38, %v6417_v1  ;;  %v1576_v2 = vrot.slane %v1566_v46, %v6417_v1  ;;  %v1772_v0 = vrot.slane %v1762_v47, %v6417_v1  ;;  %v1779_v14 = vrot.slane %v1763_v63, %v6417_v1  ;;  %v4268_v38 = vld [vmem:[%s7396_s5 + $0x1f8] sm:$0xff] }
 0x281   :  { %v1364_v62 = vpop.permute.xlu1 %1363  ;;  %v1583_v3 = vrot.slane %v1567_v36, %v6417_v1  ;;  %v1569_v7 = vcombine.low %v6447_v39, %v1457_v32  ;;  %v1765_v43 = vcombine.low %v6437_v6, %v6447_v39  ;;  %v1465_v15 = vcombine.high %v1464_v44, %v1464_v44  ;;  %v1358_v16 = vpop.permute.xlu0 %1357 }
 0x282   :  { %v1381_v48 = vsel %vm133_vm0, %v6373_v26, %v1364_v62  ;;  %v1472_v51 = vrot.slane %v1464_v44, %v6417_v1  ;;  %v1488_v18 = vcombine.high %v1487_v5, %v1487_v5  ;;  %v6479_v4 = vrot.slane %v1487_v5, %v6417_v1  ;;  %v4250_v5 = vld [vmem:[%s7396_s5 + $0x168] sm:$0xff] }
 0x283   :  { %v6470_v12 = vrot.slane %v1569_v7, %v6417_v1  ;;  %v1510_v55 = vrot.slane %v1381_v48, %v6417_v1  ;;  %v1598_v60 = vcombine.low %v1576_v2, %v1583_v3  ;;  %v1793_v26 = vrot.slane %v1765_v43, %v6417_v1  ;;  %v4267_v3 = vld [vmem:[%s7396_s5 + $0x1f0] sm:$0xff]  ;;  %v4266_v48 = vld [vmem:[%s7396_s5 + $0x1e8] sm:$0xff] }
 0x284   :  { %v1479_v19 = vrot.slane %v1465_v15, %v6417_v1  ;;  %v1480_v49 = vcombine.high %v1472_v51, %v1472_v51  ;;  %v6482_v41 = vrot.slane %v1764_v45, %v6417_v1  ;;  %v1794_v57 = vcombine.low %v1772_v0, %v1779_v14  ;;  %v4249_v15 = vld [vmem:[%s7396_s5 + $0x160] sm:$0xff] }
 0x285   :  { %v1599_v10 = vcombine.low %v1590_v11, %v6470_v12  ;;  %v1511_v20 = vcombine.high %v1510_v55, %v1510_v55  ;;  %v6485_v24 = vrot.slane %v1488_v18, %v6417_v1  ;;  %v6488_v17 = vrot.slane %v1510_v55, %v6417_v1  ;;  %v1366_v18 = vpop.permute.xlu1 %1365 }
 0x286   :  { %v1606_v23 = vrot.slane %v1598_v60, %v6417_v1  ;;  %v1811_v40 = vcombine.low %v1457_v32, %v1472_v51  ;;  %v1812_v29 = vcombine.low %v1479_v19, %v1480_v49  ;;  %v1795_v13 = vcombine.low %v6482_v41, %v1793_v26  ;;  %v4265_v49 = vld [vmem:[%s7396_s5 + $0x1e0] sm:$0xff] }
 0x287   :  { %v1613_v8 = vrot.slane %v1599_v10, %v6417_v1  ;;  %v1503_v52 = vcombine.high %v6479_v4, %v6479_v4  ;;  %v1545_v54 = vcombine.high %v6447_v39, %v6447_v39  ;;  %v1802_v59 = vrot.slane %v1794_v57, %v6417_v1  ;;  %v4248_v57 = vld [vmem:[%s7396_s5 + $0x158] sm:$0xff] }
 0x288   :  { %v6499_v56 = vrot.slane %v1511_v20, %v6417_v1  ;;  %v1809_v9 = vrot.slane %v1795_v13, %v6417_v1  ;;  %v6507_v30 = vcombine.high %v6488_v17, %v6488_v17  ;;  %v1813_v31 = vcombine.low %v6479_v4, %v6485_v24  ;;  %v4264_v13 = vld [vmem:[%s7396_s5 + $0x1d8] sm:$0xff] }
 0x289   :  { %v1614_v35 = vcombine.low %v1606_v23, %v1613_v8  ;;  %v1615_v22 = vcombine.low %v1545_v54, %v1479_v19  ;;  %v1814_v33 = vcombine.low %v1503_v52, %v6488_v17  ;;  %v4235_v34 = vcombine.high %v1472_v51, %v1479_v19 }
 0x28a   :  { %v1810_v36 = vcombine.low %v1802_v59, %v1809_v9  ;;  %v1821_v46 = vrot.slane %v1811_v40, %v6417_v1  ;;  %v1828_v47 = vrot.slane %v1812_v29, %v6417_v1  ;;  %v1835_v32 = vrot.slane %v1813_v31, %v6417_v1 }
 0x28b   :  { %4906 = vmatmul.mubr.f32.vlgmr.msra.gmra.mxu0 %v1614_v35  ;;  %v1842_v61 = vrot.slane %v1814_v33, %v6417_v1  ;;  %v1547_v62 = vcombine.high %v6485_v24, %v6485_v24  ;;  %v1378_v63 = vsel %vm133_vm0, %v6376_v53, %v1358_v16  ;;  %v1617_v45 = vcombine.low %v6485_v24, %v1503_v52  ;;  %v4262_v16 = vld [vmem:[%s7396_s5 + $0x1c8] sm:$0xff] }
 0x28c   :  { %4956 = vmatpush3.msra.mxu0 %v4252_v21  ;;  %4908 = vmatprep.mubr.msk.f32.mxu0 %vm5260_vm5, %v5259_v27  ;;  %v1843_v7 = vcombine.low %v1821_v46, %v1828_v47  ;;  %v1625_v53 = vrot.slane %v1615_v22, %v6417_v1  ;;  %v1632_v2 = vrot.slane %v4235_v34, %v6417_v1  ;;  %v4263_v22 = vld [vmem:[%s7396_s5 + $0x1d0] sm:$0xff]  ;;  %v4246_v34 = vld [vmem:[%s7396_s5 + $0x148] sm:$0xff]  ;;  %v4245_v46 = vld [vmem:[%s7396_s5 + $0x140] sm:$0xff] }
 0x28d   :  { %4947 = vmatmul.mubr.f32.vlgmr.msra.gmra.mxu1 %v1810_v36  ;;  %4957 = vmatprep.subr.mxu0 %v5259_v27  ;;  %v1844_v43 = vcombine.low %v1835_v32, %v1842_v61  ;;  %v1618_v44 = vcombine.low %v1547_v62, %v6499_v56  ;;  %v6546_v0 = vrot.slane %v1617_v45, %v6417_v1  ;;  %v4260_v47 = vld [vmem:[%s7396_s5 + $0x1b8] sm:$0xff] }
 0x28e   :  { %4997 = vmatpush3.msra.mxu1 %v4268_v38  ;;  %4958 = vmatpush3.msra.mxu0 %v4251_v42  ;;  %v1851_v11 = vrot.slane %v1843_v7, %v6417_v1  ;;  %v1860_v55 = vcombine.low %v6499_v56, %v6507_v30  ;;  %v1966_v60 = vrot.slane %v1378_v63, %v6417_v1  ;;  %v4261_v42 = vld [vmem:[%s7396_s5 + $0x1c0] sm:$0xff]  ;;  %v4244_v63 = vld [vmem:[%s7396_s5 + $0x138] sm:$0xff]  ;;  %v4259_v7 = vld [vmem:[%s7396_s5 + $0x1b0] sm:$0xff] }
 0x28f   :  { %4998 = vmatprep.subr.mxu1 %v5259_v27  ;;  %4959 = vmatprep.subr.mxu0 %v5259_v27  ;;  %v1858_v14 = vrot.slane %v1844_v43, %v6417_v1  ;;  %v1646_v51 = vrot.slane %v1618_v44, %v6417_v1  ;;  %v1647_v26 = vcombine.low %v1625_v53, %v1632_v2  ;;  %v4243_v44 = vld [vmem:[%s7396_s5 + $0x130] sm:$0xff] }
 0x290   :  { %4999 = vmatpush3.msra.mxu1 %v4267_v3  ;;  %4960 = vmatpush3.msra.mxu0 %v4250_v5  ;;  %v4236_v20 = vcombine.high %v6488_v17, %v6499_v56  ;;  %v6571_v23 = vrot.slane %v1860_v55, %v6417_v1  ;;  %v1382_v40 = vsel %vm133_vm0, %v6401_v50, %v1366_v18  ;;  %v4247_v50 = vld [vmem:[%s7396_s5 + $0x150] sm:$0xff]  ;;  %v4241_v55 = vld [vmem:[%s7396_s5 + $0x120] sm:$0xff] }
 0x291   :  { %5000 = vmatprep.subr.mxu1 %v5259_v27  ;;  %4949 = vmatprep.mubr.msk.f32.mxu1 %vm5260_vm5, %v5259_v27  ;;  %v1859_v19 = vcombine.low %v1851_v11, %v1858_v14  ;;  %v1648_v10 = vcombine.low %v6546_v0, %v1646_v51  ;;  %v1655_v29 = vrot.slane %v1647_v26, %v6417_v1  ;;  %v4256_v26 = vld [vmem:[%s7396_s5 + $0x198] sm:$0xff] }
 0x292   :  { %5001 = vmatpush3.msra.mxu1 %v4266_v48  ;;  %4961 = vmatprep.subr.mxu0 %v5259_v27  ;;  %v1967_v52 = vcombine.high %v1966_v60, %v1966_v60  ;;  %v1671_v59 = vrot.slane %v4236_v20, %v6417_v1  ;;  %v1974_v35 = vrot.slane %v1966_v60, %v6417_v1 }
 0x293   :  { %5002 = vmatprep.subr.mxu1 %v5259_v27  ;;  %4962 = vmatpush3.msra.mxu0 %v4249_v15  ;;  %v1662_v8 = vrot.slane %v1648_v10, %v6417_v1  ;;  %v1989_v9 = vrot.slane %v1382_v40, %v6417_v1  ;;  %v1874_v21 = vrot.slane %v6571_v23, %v6417_v1  ;;  %v4255_v40 = vld [vmem:[%s7396_s5 + $0x190] sm:$0xff] }
 0x294   :  { %4950 = vmatmul.mubr.f32.gmra.mxu1 %v1859_v19  ;;  %4963 = vmatprep.subr.mxu0 %v5259_v27  ;;  %v1981_v31 = vrot.slane %v1967_v52, %v6417_v1  ;;  %v1678_v33 = vrot.slane %v1671_v59, %v6417_v1  ;;  %v6607_v36 = vcombine.high %v1974_v35, %v1974_v35 }
 0x295   :  { %5003 = vmatpush3.msra.mxu1 %v4265_v49  ;;  %4964 = vmatpush3.msra.mxu0 %v4248_v57  ;;  %v1663_v54 = vcombine.low %v1655_v29, %v1662_v8  ;;  %v1990_v38 = vcombine.high %v1989_v9, %v1989_v9  ;;  %v1544_v32 = vcombine.high %v6434_v28, %v6434_v28  ;;  %v4239_v8 = vld [vmem:[%s7396_s5 + $0x110] sm:$0xff] }
 0x296   :  { %5004 = vmatprep.subr.mxu1 %v5259_v27  ;;  %4952 = vmatprep.mubr.msk.f32.mxu1 %vm5260_vm5, %v5259_v27  ;;  %v2025_v61 = vcombine.low %v1974_v35, %v1981_v31  ;;  %v6624_v62 = vrot.slane %v1989_v9, %v6417_v1  ;;  %v2227_v3 = vcombine.low %v1981_v31, %v6607_v36  ;;  %v4238_v9 = vld [vmem:[%s7396_s5 + $0x108] sm:$0xff] }
 0x297   :  { %5005 = vmatpush3.msra.mxu1 %v4264_v13  ;;  %4965 = vmatprep.subr.mxu0 %v5259_v27  ;;  %v6632_v5 = vrot.slane %v1990_v38, %v6417_v1  ;;  %v2024_v45 = vcombine.low %v6442_v37, %v6437_v6  ;;  %v2225_v43 = vcombine.low %v1544_v32, %v6447_v39  ;;  %v4258_v37 = vld [vmem:[%s7396_s5 + $0x1a8] sm:$0xff] }
 0x298   :  { %4909 = vmatmul.mubr.f32.gmra.mxu0 %v1663_v54  ;;  %5006 = vmatprep.subr.mxu1 %v5259_v27  ;;  %v4269_v53 = vcombine.high %v6437_v6, %v6447_v39  ;;  %v2206_v48 = vcombine.high %v1981_v31, %v1981_v31  ;;  %v1548_v11 = vcombine.high %v6499_v56, %v6499_v56  ;;  %v4242_v6 = vld [vmem:[%s7396_s5 + $0x128] sm:$0xff]  ;;  %v4237_v31 = vld [vmem:[%s7396_s5 + $0x100] sm:$0xff] }
 0x299   :  { %4953 = vmatmul.mubr.f32.gmra.mxu1 %v1874_v21  ;;  %4966 = vmatpush3.msra.mxu0 %v4247_v50  ;;  %v2023_v2 = vcombine.low %v6431_v25, %v6434_v28  ;;  %v2046_v14 = vrot.slane %v2025_v61, %v6417_v1  ;;  %v2066_v15 = vcombine.low %v6507_v30, %v6624_v62  ;;  %v4257_v25 = vld [vmem:[%s7396_s5 + $0x1a0] sm:$0xff] }
 0x29a   :  { %5007 = vmatpush3.msra.mxu1 %v4263_v22  ;;  %4911 = vmatprep.mubr.msk.f32.mxu0 %vm5260_vm5, %v5259_v27  ;;  %v2248_v39 = vrot.slane %v2227_v3, %v6417_v1  ;;  %v2268_v51 = vcombine.low %v1548_v11, %v6632_v5  ;;  %v2039_v28 = vrot.slane %v2024_v45, %v6417_v1  ;;  %v4279_v11 = vld [vmem:[%s7397_s7 + $0x70] sm:$0xff] }
 0x29b   :  { %4967 = vmatprep.subr.mxu0 %v5259_v27  ;;  %5008 = vmatprep.subr.mxu1 %v5259_v27  ;;  %v2064_v30 = vcombine.low %v6607_v36, %v6479_v4  ;;  %v2065_v60 = vcombine.low %v6488_v17, %v6499_v56  ;;  %v2241_v18 = vrot.slane %v4269_v53, %v6417_v1  ;;  %v4240_v17 = vld [vmem:[%s7396_s5 + $0x118] sm:$0xff] }
 0x29c   :  { %4912 = vmatmul.mubr.f32.gmra.mxu0 %v1678_v33  ;;  %5009 = vmatpush3.msra.mxu1 %v4262_v16  ;;  %v2234_v19 = vrot.slane %v2225_v43, %v6417_v1  ;;  %v2266_v49 = vcombine.low %v2206_v48, %v6485_v24  ;;  %v2032_v10 = vrot.slane %v2023_v2, %v6417_v1  ;;  %v4253_v33 = vld [vmem:[%s7396_s5 + $0x180] sm:$0xff]  ;;  %v4280_v53 = vld [vmem:[%s7397_s7 + $0x78] sm:$0xff]  ;;  %v4278_v2 = vld [vmem:[%s7397_s7 + $0x68] sm:$0xff] }
 0x29d   :  { %4968 = vmatpush3.msra.mxu0 %v4246_v34  ;;  %5010 = vmatprep.subr.mxu1 %v5259_v27  ;;  %v2048_v57 = vcombine.low %v6470_v12, %v2046_v14  ;;  %v2087_v56 = vrot.slane %v2066_v15, %v6417_v1  ;;  %v2250_v20 = vcombine.low %v2241_v18, %v2248_v39  ;;  %v2551_v48 = vld [vmem:[%s7397_s7 + $0x38] sm:$0xff]  ;;  %v2549_v14 = vld [vmem:[%s7397_s7 + $0x28] sm:$0xff]  ;;  %v4277_v15 = vld [vmem:[%s7397_s7 + $0x60] sm:$0xff] }
 0x29e   :  { %4969 = vmatprep.subr.mxu0 %v5259_v27  ;;  %5011 = vmatpush3.msra.mxu1 %v4261_v42  ;;  %v4270_v12 = vcombine.high %v6479_v4, %v6485_v24  ;;  %v2289_v29 = vrot.slane %v2268_v51, %v6417_v1  ;;  %v2047_v13 = vcombine.low %v2032_v10, %v2039_v28  ;;  %v4254_v4 = vld [vmem:[%s7396_s5 + $0x188] sm:$0xff]  ;;  %v4276_v39 = vld [vmem:[%s7397_s7 + $0x58] sm:$0xff]  ;;  %v2546_v28 = vld [vmem:[%s7397_s7 + $0x10] sm:$0xff] }
 0x29f   :  { %4970 = vmatpush3.msra.mxu0 %v4245_v46  ;;  %5012 = vmatprep.subr.mxu1 %v5259_v27  ;;  %v2073_v52 = vrot.slane %v2064_v30, %v6417_v1  ;;  %v2080_v54 = vrot.slane %v2065_v60, %v6417_v1  ;;  %v2249_v24 = vcombine.low %v6482_v41, %v2234_v19  ;;  %v2547_v51 = vld [vmem:[%s7397_s7 + $0x18] sm:$0xff]  ;;  %v4274_v30 = vld [vmem:[%s7397_s7 + $0x48] sm:$0xff]  ;;  %v4273_v60 = vld [vmem:[%s7397_s7 + $0x40] sm:$0xff] }
 0x2a0   :  { %4971 = vmatprep.subr.mxu0 %v5259_v27  ;;  %5013 = vmatpush3.msra.mxu1 %v4260_v47  ;;  %v2275_v50 = vrot.slane %v2266_v49, %v6417_v1  ;;  %v2062_v59 = vrot.slane %v2048_v57, %v6417_v1  ;;  %v2005_v35 = vcombine.high %v6624_v62, %v6624_v62  ;;  %v2544_v18 = vld [vmem:[%s7397_s7] sm:$0xff] }
 0x2a1   :  { %4972 = vmatpush3.msra.mxu0 %v4244_v63  ;;  %5014 = vmatprep.subr.mxu1 %v5259_v27  ;;  %v2089_v21 = vcombine.low %v2080_v54, %v2087_v56  ;;  %v2264_v41 = vrot.slane %v2250_v20, %v6417_v1  ;;  %v2282_v22 = vrot.slane %v4270_v12, %v6417_v1 }
 0x2a2   :  { %4973 = vmatprep.subr.mxu0 %v5259_v27  ;;  %5015 = vmatpush3.msra.mxu1 %v4259_v7  ;;  %v2291_v16 = vcombine.low %v6571_v23, %v2289_v29  ;;  %v2055_v34 = vrot.slane %v2047_v13, %v6417_v1  ;;  %v2088_v36 = vcombine.low %v2073_v52, %v6546_v0 }
 0x2a3   :  { %4974 = vmatpush3.msra.mxu0 %v4243_v44  ;;  %5016 = vmatprep.subr.mxu1 %v5259_v27  ;;  %v2257_v23 = vrot.slane %v2249_v24, %v6417_v1  ;;  %v2290_v38 = vcombine.low %v2275_v50, %v2282_v22  ;;  %v2103_v46 = vrot.slane %v2089_v21, %v6417_v1  ;;  %v4272_v50 = vld [vmem:[%s7398_s6] ss:$0 sm:$0xff] }
 0x2a4   :  { %4975 = vmatprep.subr.mxu0 %v5259_v27  ;;  %5017 = vmatpush3.msra.mxu1 %v4258_v37  ;;  %v2063_v42 = vcombine.low %v2055_v34, %v2062_v59  ;;  %v2105_v47 = vcombine.low %v6632_v5, %v2005_v35  ;;  %v2305_v0 = vrot.slane %v2291_v16, %v6417_v1  ;;  %v2550_v37 = vld [vmem:[%s7397_s7 + $0x30] sm:$0xff] }
 0x2a5   :  { %4976 = vmatpush3.msra.mxu0 %v4242_v6  ;;  %5018 = vmatprep.subr.mxu1 %v5259_v27  ;;  %v2265_v32 = vcombine.low %v2257_v23, %v2264_v41  ;;  %v4271_v61 = vcombine.high %v6624_v62, %v6632_v5  ;;  %v2096_v63 = vrot.slane %v2088_v36, %v6417_v1  ;;  %v2548_v6 = vld [vmem:[%s7397_s7 + $0x20] sm:$0xff] }
 0x2a6   :  { %4977 = vmatprep.subr.mxu0 %v5259_v27  ;;  %5019 = vmatpush3.msra.mxu1 %v4257_v25  ;;  %v2298_v3 = vrot.slane %v2290_v38, %v6417_v1  ;;  %v2112_v45 = vrot.slane %v2105_v47, %v6417_v1  ;;  %v4275_v25 = vld [vmem:[%s7397_s7 + $0x50] sm:$0xff] }
 0x2a7   :  { %4978 = vmatpush3.msra.mxu0 %v4241_v55  ;;  %5020 = vmatprep.subr.mxu1 %v5259_v27  ;;  %v2104_v7 = vcombine.low %v2096_v63, %v2103_v46  ;;  %v2314_v5 = vrot.slane %v4271_v61, %v6417_v1  ;;  %v2545_v55 = vld [vmem:[%s7397_s7 + $0x8] sm:$0xff] }
 0x2a8   :  { %4979 = vmatprep.subr.mxu0 %v5259_v27  ;;  %5021 = vmatpush3.msra.mxu1 %v4256_v26  ;;  %v2306_v62 = vcombine.low %v2298_v3, %v2305_v0  ;;  %v2119_v43 = vrot.slane %v2112_v45, %v6417_v1 }
 0x2a9   :  { %4980 = vmatpush3.msra.mxu0 %v4240_v17  ;;  %5022 = vmatprep.subr.mxu1 %v5259_v27  ;;  %v2321_v44 = vrot.slane %v2314_v5, %v6417_v1 }
 0x2aa   :  { %4981 = vmatprep.subr.mxu0 %v5259_v27  ;;  %5023 = vmatpush3.msra.mxu1 %v4255_v40 }
 0x2ab   :  { %4982 = vmatpush3.msra.mxu0 %v4239_v8  ;;  %5024 = vmatprep.subr.mxu1 %v5259_v27 }
 0x2ac   :  { %4983 = vmatprep.subr.mxu0 %v5259_v27  ;;  %5025 = vmatpush3.msra.mxu1 %v4254_v4 }
 0x2ad   :  { %4984 = vmatpush3.msra.mxu0 %v4238_v9  ;;  %5026 = vmatprep.subr.mxu1 %v5259_v27 }
 0x2ae   :  { %4985 = vmatprep.subr.mxu0 %v5259_v27  ;;  %4987 = vmatprep.mubr.msk.f32.mxu0 %vm5260_vm5, %v5259_v27 }
 0x2af   :  { %4986 = vmatpush3.msra.mxu0 %v4237_v31  ;;  %5027 = vmatpush3.msra.mxu1 %v4253_v33 }
 0x2b0   :  { %5028 = vmatprep.mubr.msk.f32.mxu1 %vm5260_vm5, %v5259_v27  ;;  %4988 = vmatmul.mubr.f32.vlgmr.msra.gmra.mxu0 %v2063_v42 }
 0x2b1   :  { %5029 = vmatmul.mubr.f32.vlgmr.msra.gmra.mxu1 %v2265_v32  ;;  %4990 = vmatprep.mubr.msk.f32.mxu0 %vm5260_vm5, %v5259_v27 }
 0x2b2   :  { %5031 = vmatprep.mubr.msk.f32.mxu1 %vm5260_vm5, %v5259_v27  ;;  %5037 = vmatprep.subr.mxu0 %v5259_v27 }
 0x2b3   :  { %5056 = vmatprep.subr.mxu1 %v5259_v27  ;;  %5038 = vmatpush3.msra.mxu0 %v4280_v53 }
 0x2b4   :  { %4991 = vmatmul.mubr.f32.gmra.mxu0 %v2104_v7  ;;  %5057 = vmatpush3.msra.mxu1 %v2551_v48 }
 0x2b5   :  { %5032 = vmatmul.mubr.f32.gmra.mxu1 %v2306_v62  ;;  %4993 = vmatprep.mubr.msk.f32.mxu0 %vm5260_vm5, %v5259_v27 }
 0x2b6   :  { %5034 = vmatprep.mubr.msk.f32.mxu1 %vm5260_vm5, %v5259_v27  ;;  %5039 = vmatprep.subr.mxu0 %v5259_v27 }
 0x2b7   :  { %5058 = vmatprep.subr.mxu1 %v5259_v27  ;;  %5040 = vmatpush3.msra.mxu0 %v4279_v11 }
 0x2b8   :  { %4994 = vmatmul.mubr.f32.gmra.mxu0 %v2119_v43  ;;  %5059 = vmatpush3.msra.mxu1 %v2550_v37 }
 0x2b9   :  { %5035 = vmatmul.mubr.f32.gmra.mxu1 %v2321_v44  ;;  %5053 = vmatprep.mubr.msk.f32.mxu0 %vm5260_vm5, %v5259_v27 }
 0x2ba   :  { %5072 = vmatprep.mubr.msk.f32.mxu1 %vm5260_vm5, %v5259_v27  ;;  %5041 = vmatprep.subr.mxu0 %v5259_v27 }
 0x2bb   :  { %5060 = vmatprep.subr.mxu1 %v5259_v27  ;;  %5042 = vmatpush3.msra.mxu0 %v4278_v2 }
 0x2bc   :  { %5061 = vmatpush3.msra.mxu1 %v2549_v14  ;;  %5043 = vmatprep.subr.mxu0 %v5259_v27 }
 0x2bd   :  { %5062 = vmatprep.subr.mxu1 %v5259_v27  ;;  %5044 = vmatpush3.msra.mxu0 %v4277_v15 }
 0x2be   :  { %5063 = vmatpush3.msra.mxu1 %v2548_v6  ;;  %5045 = vmatprep.subr.mxu0 %v5259_v27 }
 0x2bf   :  { %5064 = vmatprep.subr.mxu1 %v5259_v27  ;;  %5046 = vmatpush3.msra.mxu0 %v4276_v39 }
 0x2c0   :  { %5065 = vmatpush3.msra.mxu1 %v2547_v51  ;;  %5047 = vmatprep.subr.mxu0 %v5259_v27 }
 0x2c1   :  { %5066 = vmatprep.subr.mxu1 %v5259_v27  ;;  %5048 = vmatpush3.msra.mxu0 %v4275_v25 }
 0x2c2   :  { %5067 = vmatpush3.msra.mxu1 %v2546_v28  ;;  %5049 = vmatprep.subr.mxu0 %v5259_v27 }
 0x2c3   :  { %5068 = vmatprep.subr.mxu1 %v5259_v27  ;;  %5050 = vmatpush3.msra.mxu0 %v4274_v30 }
 0x2c4   :  { %5069 = vmatpush3.msra.mxu1 %v2545_v55  ;;  %5051 = vmatprep.subr.mxu0 %v5259_v27 }
 0x2c5   :  { %5070 = vmatprep.subr.mxu1 %v5259_v27  ;;  %5052 = vmatpush3.msra.mxu0 %v4273_v60  ;;  %v4290_v60 = vld [vmem:[%s7397_s7 + $0xb8] sm:$0xff] }
 0x2c6   :  { %5071 = vmatpush3.msra.mxu1 %v2544_v18  ;;  %5075 = vmatprep.subr.mxu0 %v5259_v27  ;;  %v4300_v18 = vld [vmem:[%s7397_s7 + $0xf8] sm:$0xff] }
 0x2c7   :  { %5094 = vmatprep.subr.mxu1 %v5259_v27 }
 0x34b   :  { %v1748_v26 = vpop.f32.mrf.mxu0 }
 0x34d   :  { %v1944_v19 = vpop.f32.mrf.mxu1  ;;  %v4907_v49 = vpop.f32.mrf.mxu0 }
 0x34e   :  { %v1945_v52 = vadd.f32 %v1944_v19, %v1748_v26  ;;  %v4289_v49 = vld [vmem:[%s7397_s7 + $0xb0] sm:$0xff] }
 0x34f   :  { %v4948_v10 = vpop.f32.mrf.mxu1 }
 0x350   :  { %v4299_v10 = vld [vmem:[%s7397_s7 + $0xf0] sm:$0xff] }
 0x354   :  { %v1949_v57 = vpop.f32.mrf.mxu1 }
 0x356   :  { %v4951_v17 = vpop.f32.mrf.mxu1 }
 0x357   :  { %v4298_v17 = vld [vmem:[%s7397_s7 + $0xe8] sm:$0xff] }
 0x358   :  { %v1753_v56 = vpop.f32.mrf.mxu0 }
 0x359   :  { %v1954_v20 = vpop.f32.mrf.mxu1  ;;  %v1950_v35 = vadd.f32 %v1949_v57, %v1753_v56  ;;  %v4288_v57 = vld [vmem:[%s7397_s7 + $0xa8] sm:$0xff] }
 0x35a   :  { %v4910_v40 = vpop.f32.mrf.mxu0 }
 0x35b   :  { %v4954_v12 = vpop.f32.mrf.mxu1  ;;  %v4297_v40 = vld [vmem:[%s7397_s7 + $0xe0] sm:$0xff] }
 0x35c   :  { %v1758_v29 = vpop.f32.mrf.mxu0 }
 0x35d   :  { %v1955_v8 = vadd.f32 %v1954_v20, %v1758_v29  ;;  %v4287_v20 = vld [vmem:[%s7397_s7 + $0xa0] sm:$0xff]  ;;  %v4286_v29 = vld [vmem:[%s7397_s7 + $0x98] sm:$0xff] }
 0x35e   :  { %v4913_v13 = vpop.f32.mrf.mxu0 }
 0x370   :  { %v2189_v54 = vpop.f32.mrf.mxu0 }
 0x371   :  { %v2203_v4 = vadd.f32 %v2189_v54, %v1945_v52  ;;  %v2391_v24 = vpop.f32.mrf.mxu1  ;;  %v4285_v54 = vld [vmem:[%s7397_s7 + $0x90] sm:$0xff] }
 0x372   :  { %v4989_v59 = vpop.f32.mrf.mxu0 }
 0x373   :  { %v2405_v9 = vadd.f32 %v2391_v24, %v2203_v4  ;;  %v5030_v21 = vpop.f32.mrf.mxu1  ;;  %v4295_v4 = vld [vmem:[%s7397_s7 + $0xd0] sm:$0xff]  ;;  %v4284_v24 = vld [vmem:[%s7397_s7 + $0x88] sm:$0xff] }
 0x374   :  { %v2194_v41 = vpop.f32.mrf.mxu0  ;;  %v4283_v21 = vld [vmem:[%s7397_s7 + $0x80] sm:$0xff] }
 0x375   :  { %v2415_v22 = vadd.f32 %v4272_v50, %v2405_v9  ;;  %v2204_v16 = vadd.f32 %v2194_v41, %v1950_v35  ;;  %v2396_v31 = vpop.f32.mrf.mxu1  ;;  %v4293_v41 = vld [vmem:[%s7397_s7 + $0xc0] sm:$0xff] }
 0x376   :  { %v4992_v33 = vpop.f32.mrf.mxu0 }
 0x377   :  { %v6829_v34 = vmax.f32 %v2415_v22, 0.0  ;;  %v2406_v36 = vadd.f32 %v2396_v31, %v2204_v16  ;;  %v5033_v23 = vpop.f32.mrf.mxu1  ;;  %v4309_v33 = vld [vmem:[%s7397_s7 + $0x138] sm:$0xff] }
 0x378   :  { %v2199_v38 = vpop.f32.mrf.mxu0  ;;  %v4308_v23 = vld [vmem:[%s7397_s7 + $0x130] sm:$0xff] }
 0x379   :  { %v2416_v42 = vadd.f32 %v4272_v50, %v2406_v36  ;;  %v2205_v46 = vadd.f32 %v2199_v38, %v1955_v8  ;;  %v2401_v47 = vpop.f32.mrf.mxu1  ;;  %v2431_v32 = vrot.slane %v6829_v34, %v6417_v1  ;;  %v4296_v8 = vld [vmem:[%s7397_s7 + $0xd8] sm:$0xff]  ;;  %v2424_v59 = vcombine.high %v6829_v34, %v6829_v34  ;;  %v4317_v38 = vld [vmem:[%s7397_s7 + $0x170] sm:$0xff] }
 0x37a   :  { %v4995_v0 = vpop.f32.mrf.mxu0  ;;  %v4318_v34 = vld [vmem:[%s7397_s7 + $0x178] sm:$0xff] }
 0x37b   :  { %v2419_v61 = vmax.f32 %v2416_v42, 0.0  ;;  %v5036_v63 = vpop.f32.mrf.mxu1  ;;  %v2407_v3 = vadd.f32 %v2401_v47, %v2205_v46  ;;  %v2439_v7 = vcombine.high %v2431_v32, %v2431_v32  ;;  %v2447_v53 = vrot.slane %v2431_v32, %v6417_v1  ;;  %v4307_v46 = vld [vmem:[%s7397_s7 + $0x128] sm:$0xff] }
 0x37c   :  { %v2438_v22 = vrot.slane %v2424_v59, %v6417_v1  ;;  %v4316_v47 = vld [vmem:[%s7397_s7 + $0x168] sm:$0xff]  ;;  %v4315_v63 = vld [vmem:[%s7397_s7 + $0x160] sm:$0xff] }
 0x37d   :  { %v2480_v45 = vrot.slane %v2419_v61, %v6417_v1  ;;  %v2417_v62 = vadd.f32 %v4272_v50, %v2407_v3  ;;  %v2461_v48 = vrot.slane %v2439_v7, %v6417_v1  ;;  %v2473_v39 = vcombine.high %v2419_v61, %v2419_v61  ;;  %v4294_v50 = vld [vmem:[%s7397_s7 + $0xc8] sm:$0xff]  ;;  %v4306_v61 = vld [vmem:[%s7397_s7 + $0x120] sm:$0xff] }
 0x37e   :  { %v2440_v42 = vcombine.high %v2438_v22, %v2438_v22  ;;  %v6979_v3 = vrot.slane %v2438_v22, %v6417_v1  ;;  %v3423_v22 = vld [vmem:[%s7400_s1] sm:$0x3] }
 0x37f   :  { %v2488_v5 = vcombine.high %v2480_v45, %v2480_v45  ;;  %v6835_v43 = vrot.slane %v2480_v45, %v6417_v1  ;;  %v2420_v44 = vmax.f32 %v2417_v62, 0.0  ;;  %v6861_v26 = vrot.slane %v2473_v39, %v6417_v1  ;;  %v4305_v45 = vld [vmem:[%s7397_s7 + $0x118] sm:$0xff]  ;;  %v4311_v39 = vld [vmem:[%s7397_s7 + $0x140] sm:$0xff] }
 0x380   :  { %v2471_v12 = vcombine.high %v2461_v48, %v2461_v48  ;;  %v6982_v7 = vrot.slane %v2440_v42, %v6417_v1  ;;  %v4314_v62 = vld [vmem:[%s7397_s7 + $0x158] sm:$0xff] }
 0x381   :  { %v2510_v11 = vrot.slane %v2488_v5, %v6417_v1  ;;  %v2518_v37 = vcombine.high %v6835_v43, %v6835_v43  ;;  %v6843_v2 = vrot.slane %v2420_v44, %v6417_v1  ;;  %v6883_v56 = vrot.slane %v6861_v26, %v6417_v1 }
 0x382   :  { %v2489_v36 = vcombine.high %v6861_v26, %v6861_v26  ;;  %v4325_v26 = vld [vmem:[%s7397_s7 + $0x1a8] sm:$0xff] }
 0x383   :  { %v2561_v14 = vcombine.low %v2461_v48, %v2518_v37  ;;  %v2648_v15 = vcombine.low %v2447_v53, %v2510_v11  ;;  %v2529_v6 = vcombine.high %v6843_v2, %v6843_v2  ;;  %v4291_v13 = vcombine.high %v2447_v53, %v2510_v11  ;;  %v4304_v53 = vld [vmem:[%s7397_s7 + $0x110] sm:$0xff]  ;;  %v4303_v11 = vld [vmem:[%s7397_s7 + $0x108] sm:$0xff] }
 0x384   :  { %v2841_v52 = vcombine.low %v2471_v12, %v6883_v56  ;;  %v6966_v32 = vrot.slane %v2489_v36, %v6417_v1  ;;  %v2519_v0 = vcombine.high %v6883_v56, %v6883_v56  ;;  %v4313_v48 = vld [vmem:[%s7397_s7 + $0x150] sm:$0xff]  ;;  %v4312_v37 = vld [vmem:[%s7397_s7 + $0x148] sm:$0xff]  ;;  %v2472_v56 = vcombine.high %v6982_v7, %v6982_v7 }
 0x385   :  { %v2568_v51 = vrot.slane %v2561_v14, %v6417_v1  ;;  %v2655_v25 = vrot.slane %v2648_v15, %v6417_v1  ;;  %v6850_v28 = vrot.slane %v2529_v6, %v6417_v1  ;;  %v2751_v35 = vrot.slane %v4291_v13, %v6417_v1  ;;  %v4302_v6 = vld [vmem:[%s7397_s7 + $0x100] sm:$0xff]  ;;  %v4321_v13 = vld [vmem:[%s7397_s7 + $0x188] sm:$0xff] }
 0x386   :  { %v2848_v9 = vrot.slane %v2841_v52, %v6417_v1  ;;  %v2938_v5 = vcombine.low %v6979_v3, %v6966_v32  ;;  %v3035_v44 = vcombine.low %v6982_v7, %v2519_v0  ;;  %v4331_v52 = vld [vmem:[%s7397_s7 + $0x1c8] sm:$0xff]  ;;  %v3565_v0 = vld [vmem:[%s7401_s12 + $0xd0] sm:$0xff] }
 0x387   :  { %v2575_v30 = vrot.slane %v2568_v51, %v6417_v1  ;;  %v2662_v55 = vrot.slane %v2655_v25, %v6417_v1  ;;  %v3326_v19 = vcombine.low %v6835_v43, %v6850_v28  ;;  %v2758_v16 = vrot.slane %v2751_v35, %v6417_v1  ;;  %v3568_v43 = vld [vmem:[%s7401_s12 + $0xe8] sm:$0xff]  ;;  %v3570_v28 = vld [vmem:[%s7401_s12 + $0xf8] sm:$0xff]  ;;  %v3561_v7 = vld [vmem:[%s7401_s12 + $0xb0] sm:$0xff] }
 0x388   :  { %v2855_v31 = vrot.slane %v2848_v9, %v6417_v1  ;;  %v2945_v14 = vrot.slane %v2938_v5, %v6417_v1  ;;  %v3042_v15 = vrot.slane %v3035_v44, %v6417_v1  ;;  %v4346_v9 = vld [vmem:[%s7397_s7 + $0x238] sm:$0xff]  ;;  %v3555_v5 = vld [vmem:[%s7401_s12 + $0x80] sm:$0xff]  ;;  %v3557_v44 = vld [vmem:[%s7401_s12 + $0x90] sm:$0xff] }
 0x389   :  { %5054 = vmatmul.mubr.msk.f32.vlgmr.msra.gmra.mxu0 %vm133_vm0, %v2575_v30  ;;  %5073 = vmatmul.mubr.msk.f32.vlgmr.msra.gmra.mxu1 %vm133_vm0, %v2662_v55  ;;  %v4327_v30 = vld [vmem:[%s7397_s7 + $0x1b8] sm:$0xff]  ;;  %v3333_v36 = vrot.slane %v3326_v19, %v6417_v1  ;;  %v3567_v19 = vld [vmem:[%s7401_s12 + $0xe0] sm:$0xff] }
 0x38a   :  { %5076 = vmatpush3.msra.mxu0 %v4290_v60  ;;  %5095 = vmatpush3.msra.mxu1 %v4300_v18  ;;  %v2952_v51 = vrot.slane %v2945_v14, %v6417_v1  ;;  %v3049_v25 = vrot.slane %v3042_v15, %v6417_v1  ;;  %v4337_v55 = vld [vmem:[%s7397_s7 + $0x1f8] sm:$0xff]  ;;  %v4326_v60 = vld [vmem:[%s7397_s7 + $0x1b0] sm:$0xff]  ;;  %v3548_v14 = vld [vmem:[%s7401_s12 + $0x48] sm:$0xff] }
 0x38b   :  { %5077 = vmatprep.subr.mxu0 %v5259_v27  ;;  %5096 = vmatprep.subr.mxu1 %v5259_v27  ;;  %v4336_v18 = vld [vmem:[%s7397_s7 + $0x1f0] sm:$0xff]  ;;  %v3340_v42 = vrot.slane %v3333_v36, %v6417_v1  ;;  %v3550_v15 = vld [vmem:[%s7401_s12 + $0x58] sm:$0xff] }
 0x38c   :  { %5078 = vmatpush3.msra.mxu0 %v4289_v49  ;;  %5097 = vmatpush3.msra.mxu1 %v4299_v10  ;;  %v4335_v49 = vld [vmem:[%s7397_s7 + $0x1e8] sm:$0xff]  ;;  %v2536_v10 = vrot.slane %v6843_v2, %v6417_v1  ;;  %v4323_v2 = vld [vmem:[%s7397_s7 + $0x198] sm:$0xff] }
 0x38d   :  { %5079 = vmatprep.subr.mxu0 %v5259_v27  ;;  %5098 = vmatprep.subr.mxu1 %v5259_v27 }
 0x38e   :  { %5080 = vmatpush3.msra.mxu0 %v4288_v57  ;;  %5099 = vmatpush3.msra.mxu1 %v4298_v17  ;;  %v4324_v57 = vld [vmem:[%s7397_s7 + $0x1a0] sm:$0xff]  ;;  %v3229_v12 = vcombine.low %v2472_v56, %v2536_v10  ;;  %v3536_v10 = vld [vmem:[%s7402_s11 + $0xe8] sm:$0xff] }
 0x38f   :  { %5081 = vmatprep.subr.mxu0 %v5259_v27  ;;  %5100 = vmatprep.subr.mxu1 %v5259_v27  ;;  %v4334_v17 = vld [vmem:[%s7397_s7 + $0x1e0] sm:$0xff] }
 0x390   :  { %5082 = vmatpush3.msra.mxu0 %v4287_v20  ;;  %5101 = vmatpush3.msra.mxu1 %v4297_v40  ;;  %v4333_v20 = vld [vmem:[%s7397_s7 + $0x1d8] sm:$0xff]  ;;  %v4328_v40 = vcombine.high %v6979_v3, %v6966_v32  ;;  %v3563_v32 = vld [vmem:[%s7401_s12 + $0xc0] sm:$0xff] }
 0x391   :  { %5083 = vmatprep.subr.mxu0 %v5259_v27  ;;  %5102 = vmatprep.subr.mxu1 %v5259_v27  ;;  %v3559_v3 = vld [vmem:[%s7401_s12 + $0xa0] sm:$0xff] }
 0x392   :  { %5084 = vmatpush3.msra.mxu0 %v4286_v29  ;;  %5103 = vmatpush3.msra.mxu1 %v4296_v8  ;;  %v4322_v29 = vld [vmem:[%s7397_s7 + $0x190] sm:$0xff] }
 0x393   :  { %5085 = vmatprep.subr.mxu0 %v5259_v27  ;;  %5104 = vmatprep.subr.mxu1 %v5259_v27  ;;  %v4332_v8 = vld [vmem:[%s7397_s7 + $0x1d0] sm:$0xff] }
 0x394   :  { %5086 = vmatpush3.msra.mxu0 %v4285_v54  ;;  %5105 = vmatpush3.msra.mxu1 %v4295_v4  ;;  %v3236_v54 = vrot.slane %v3229_v12, %v6417_v1  ;;  %v3139_v4 = vrot.slane %v4328_v40, %v6417_v1 }
 0x395   :  { %5087 = vmatprep.subr.mxu0 %v5259_v27  ;;  %5106 = vmatprep.subr.mxu1 %v5259_v27 }
 0x396   :  { %5088 = vmatpush3.msra.mxu0 %v4284_v24  ;;  %5107 = vmatpush3.msra.mxu1 %v4294_v50  ;;  %v4320_v24 = vld [vmem:[%s7397_s7 + $0x180] sm:$0xff]  ;;  %v3146_v59 = vrot.slane %v3139_v4, %v6417_v1  ;;  %v3243_v35 = vrot.slane %v3236_v54, %v6417_v1  ;;  %v3569_v1 = vld [vmem:[%s7401_s12 + $0xf0] sm:$0xff] }
 0x397   :  { %5089 = vmatprep.subr.mxu0 %v5259_v27  ;;  %5108 = vmatprep.subr.mxu1 %v5259_v27  ;;  %v4330_v50 = vld [vmem:[%s7397_s7 + $0x1c0] sm:$0xff] }
 0x398   :  { %5090 = vmatpush3.msra.mxu0 %v4283_v21  ;;  %5091 = vmatprep.mubr.msk.f32.mxu0 %vm5260_vm5, %v5259_v27  ;;  %v3424_v21 = vld [vmem:[%s7399_s9] sm:$0xff] }
 0x399   :  { %5109 = vmatpush3.msra.mxu1 %v4293_v41  ;;  %5110 = vmatprep.mubr.msk.f32.mxu1 %vm5260_vm5, %v5259_v27  ;;  %v4345_v41 = vld [vmem:[%s7397_s7 + $0x230] sm:$0xff] }
 0x39a   :  { %5092 = vmatmul.mubr.msk.f32.vlgmr.msra.gmra.mxu0 %vm133_vm0, %v2758_v16  ;;  %5111 = vmatmul.mubr.msk.f32.vlgmr.msra.gmra.mxu1 %vm133_vm0, %v2855_v31  ;;  %v4344_v16 = vld [vmem:[%s7397_s7 + $0x228] sm:$0xff]  ;;  %v4343_v31 = vld [vmem:[%s7397_s7 + $0x220] sm:$0xff] }
 0x39b   :  { %5113 = vmatprep.subr.mxu0 %v5259_v27  ;;  %5132 = vmatprep.subr.mxu1 %v5259_v27 }
 0x39c   :  { %5114 = vmatpush3.msra.mxu0 %v4309_v33  ;;  %5133 = vmatpush3.msra.mxu1 %v4318_v34  ;;  %v4342_v33 = vld [vmem:[%s7397_s7 + $0x218] sm:$0xff]  ;;  %v4341_v34 = vld [vmem:[%s7397_s7 + $0x210] sm:$0xff] }
 0x39d   :  { %5115 = vmatprep.subr.mxu0 %v5259_v27  ;;  %5134 = vmatprep.subr.mxu1 %v5259_v27 }
 0x39e   :  { %5116 = vmatpush3.msra.mxu0 %v4308_v23  ;;  %5135 = vmatpush3.msra.mxu1 %v4317_v38  ;;  %v4340_v23 = vld [vmem:[%s7397_s7 + $0x208] sm:$0xff]  ;;  %v4339_v38 = vld [vmem:[%s7397_s7 + $0x200] sm:$0xff] }
 0x39f   :  { %5117 = vmatprep.subr.mxu0 %v5259_v27  ;;  %5136 = vmatprep.subr.mxu1 %v5259_v27 }
 0x3a0   :  { %5118 = vmatpush3.msra.mxu0 %v4307_v46  ;;  %5137 = vmatpush3.msra.mxu1 %v4316_v47  ;;  %v3564_v46 = vld [vmem:[%s7401_s12 + $0xc8] sm:$0xff]  ;;  %v3566_v47 = vld [vmem:[%s7401_s12 + $0xd8] sm:$0xff] }
 0x3a1   :  { %5119 = vmatprep.subr.mxu0 %v5259_v27  ;;  %5138 = vmatprep.subr.mxu1 %v5259_v27 }
 0x3a2   :  { %5120 = vmatpush3.msra.mxu0 %v4306_v61  ;;  %5139 = vmatpush3.msra.mxu1 %v4315_v63  ;;  %v3560_v61 = vld [vmem:[%s7401_s12 + $0xa8] sm:$0xff]  ;;  %v3562_v63 = vld [vmem:[%s7401_s12 + $0xb8] sm:$0xff] }
 0x3a3   :  { %5121 = vmatprep.subr.mxu0 %v5259_v27  ;;  %5140 = vmatprep.subr.mxu1 %v5259_v27 }
 0x3a4   :  { %5122 = vmatpush3.msra.mxu0 %v4305_v45  ;;  %5141 = vmatpush3.msra.mxu1 %v4314_v62  ;;  %v3556_v45 = vld [vmem:[%s7401_s12 + $0x88] sm:$0xff]  ;;  %v3558_v62 = vld [vmem:[%s7401_s12 + $0x98] sm:$0xff] }
 0x3a5   :  { %5123 = vmatprep.subr.mxu0 %v5259_v27  ;;  %5142 = vmatprep.subr.mxu1 %v5259_v27 }
 0x3a6   :  { %5124 = vmatpush3.msra.mxu0 %v4304_v53  ;;  %5143 = vmatpush3.msra.mxu1 %v4313_v48  ;;  %v3552_v53 = vld [vmem:[%s7401_s12 + $0x68] sm:$0xff]  ;;  %v3554_v48 = vld [vmem:[%s7401_s12 + $0x78] sm:$0xff] }
 0x3a7   :  { %5125 = vmatprep.subr.mxu0 %v5259_v27  ;;  %5144 = vmatprep.subr.mxu1 %v5259_v27 }
 0x3a8   :  { %5126 = vmatpush3.msra.mxu0 %v4303_v11  ;;  %5145 = vmatpush3.msra.mxu1 %v4312_v37  ;;  %v3551_v11 = vld [vmem:[%s7401_s12 + $0x60] sm:$0xff]  ;;  %v3553_v37 = vld [vmem:[%s7401_s12 + $0x70] sm:$0xff] }
 0x3a9   :  { %5127 = vmatprep.subr.mxu0 %v5259_v27  ;;  %5146 = vmatprep.subr.mxu1 %v5259_v27 }
 0x3aa   :  { %5128 = vmatpush3.msra.mxu0 %v4302_v6  ;;  %5129 = vmatprep.mubr.msk.f32.mxu0 %vm5260_vm5, %v5259_v27  ;;  %v3547_v6 = vld [vmem:[%s7401_s12 + $0x40] sm:$0xff] }
 0x3ab   :  { %5147 = vmatpush3.msra.mxu1 %v4311_v39  ;;  %5148 = vmatprep.mubr.msk.f32.mxu1 %vm5260_vm5, %v5259_v27  ;;  %v3549_v39 = vld [vmem:[%s7401_s12 + $0x50] sm:$0xff] }
 0x3ac   :  { %5130 = vmatmul.mubr.msk.f32.vlgmr.msra.gmra.mxu0 %vm133_vm0, %v2952_v51  ;;  %5149 = vmatmul.mubr.msk.f32.vlgmr.msra.gmra.mxu1 %vm133_vm0, %v3049_v25  ;;  %v3544_v51 = vld [vmem:[%s7401_s12 + $0x28] sm:$0xff]  ;;  %v3546_v25 = vld [vmem:[%s7401_s12 + $0x38] sm:$0xff] }
 0x3ad   :  { %5151 = vmatprep.subr.mxu0 %v5259_v27  ;;  %5170 = vmatprep.subr.mxu1 %v5259_v27 }
 0x3ae   :  { %5152 = vmatpush3.msra.mxu0 %v4327_v30  ;;  %5171 = vmatpush3.msra.mxu1 %v4337_v55  ;;  %v3543_v30 = vld [vmem:[%s7401_s12 + $0x20] sm:$0xff]  ;;  %v3545_v55 = vld [vmem:[%s7401_s12 + $0x30] sm:$0xff] }
 0x3af   :  { %5153 = vmatprep.subr.mxu0 %v5259_v27  ;;  %5172 = vmatprep.subr.mxu1 %v5259_v27 }
 0x3b0   :  { %5154 = vmatpush3.msra.mxu0 %v4326_v60  ;;  %5173 = vmatpush3.msra.mxu1 %v4336_v18  ;;  %v3540_v60 = vld [vmem:[%s7401_s12 + $0x8] sm:$0xff]  ;;  %v3542_v18 = vld [vmem:[%s7401_s12 + $0x18] sm:$0xff] }
 0x3b1   :  { %5155 = vmatprep.subr.mxu0 %v5259_v27  ;;  %5174 = vmatprep.subr.mxu1 %v5259_v27 }
 0x3b2   :  { %5156 = vmatpush3.msra.mxu0 %v4325_v26  ;;  %5175 = vmatpush3.msra.mxu1 %v4335_v49  ;;  %v3539_v26 = vld [vmem:[%s7401_s12] sm:$0xff]  ;;  %v3541_v49 = vld [vmem:[%s7401_s12 + $0x10] sm:$0xff] }
 0x3b3   :  { %5157 = vmatprep.subr.mxu0 %v5259_v27  ;;  %5176 = vmatprep.subr.mxu1 %v5259_v27 }
 0x3b4   :  { %5158 = vmatpush3.msra.mxu0 %v4324_v57  ;;  %5177 = vmatpush3.msra.mxu1 %v4334_v17  ;;  %v3538_v57 = vld [vmem:[%s7402_s11 + $0xf8] sm:$0xff] }
 0x3b5   :  { %5159 = vmatprep.subr.mxu0 %v5259_v27  ;;  %5178 = vmatprep.subr.mxu1 %v5259_v27 }
 0x3b6   :  { %5160 = vmatpush3.msra.mxu0 %v4323_v2  ;;  %5179 = vmatpush3.msra.mxu1 %v4333_v20 }
 0x3b7   :  { %5161 = vmatprep.subr.mxu0 %v5259_v27  ;;  %5180 = vmatprep.subr.mxu1 %v5259_v27 }
 0x3b8   :  { %5162 = vmatpush3.msra.mxu0 %v4322_v29  ;;  %5181 = vmatpush3.msra.mxu1 %v4332_v8 }
 0x3b9   :  { %5163 = vmatprep.subr.mxu0 %v5259_v27  ;;  %5182 = vmatprep.subr.mxu1 %v5259_v27 }
 0x3ba   :  { %5164 = vmatpush3.msra.mxu0 %v4321_v13  ;;  %5183 = vmatpush3.msra.mxu1 %v4331_v52 }
 0x3bb   :  { %5165 = vmatprep.subr.mxu0 %v5259_v27  ;;  %5184 = vmatprep.subr.mxu1 %v5259_v27 }
 0x3bc   :  { %5166 = vmatpush3.msra.mxu0 %v4320_v24  ;;  %5167 = vmatprep.mubr.msk.f32.mxu0 %vm5260_vm5, %v5259_v27 }
 0x3bd   :  { %5185 = vmatpush3.msra.mxu1 %v4330_v50  ;;  %5186 = vmatprep.mubr.msk.f32.mxu1 %vm5260_vm5, %v5259_v27 }
 0x3be   :  { %5168 = vmatmul.mubr.msk.f32.vlgmr.msra.gmra.mxu0 %vm133_vm0, %v3146_v59  ;;  %5187 = vmatmul.mubr.msk.f32.vlgmr.msra.gmra.mxu1 %vm133_vm0, %v3243_v35 }
 0x3bf   :  { %5189 = vmatprep.subr.mxu0 %v5259_v27  ;;  %5208 = vmatprep.subr.mxu1 %v5259_v27 }
 0x3c0   :  { %5190 = vmatpush3.msra.mxu0 %v4346_v9  ;;  %5209 = vmatpush3.msra.mxu1 %v3424_v21 }
 0x3c1   :  { %5191 = vmatprep.subr.mxu0 %v5259_v27  ;;  %5210 = vmatprep.mubr.msk.f32.mxu1 %vm5260_vm5, %v5259_v27 }
 0x3c2   :  { %5192 = vmatpush3.msra.mxu0 %v4345_v41  ;;  %5211 = vmatmul.mubr.msk.f32.vlgmr.msra.gmra.mxu1 %vm3432_vm6, %v3423_v22  ;;  %v4349_v41 = vld [vmem:[%s7403_s10] ss:$0 sm:$0xff] }
 0x3c3   :  { %5193 = vmatprep.subr.mxu0 %v5259_v27  ;;  %5205 = vmatprep.mubr.msk.f32.mxu0 %vm5260_vm5, %v5259_v27 }
 0x3c4   :  { %5194 = vmatpush3.msra.mxu0 %v4344_v16  ;;  %3638 = vmatprep.mubr.f32.mxu1 %v5259_v27 }
 0x3c5   :  { %5195 = vmatprep.subr.mxu0 %v5259_v27  ;;  %3590 = vmatprep.subr.mxu1 %v3568_v43  ;;  %v3534_v43 = vld [vmem:[%s7402_s11 + $0xd8] sm:$0xff] }
 0x3c6   :  { %5196 = vmatpush3.msra.mxu0 %v4343_v31  ;;  %3591 = vmatpush1.msra.mxu1 %v3567_v19  ;;  %v3533_v19 = vld [vmem:[%s7402_s11 + $0xd0] sm:$0xff] }
 0x3c7   :  { %5197 = vmatprep.subr.mxu0 %v5259_v27  ;;  %3592 = vmatprep.subr.mxu1 %v3564_v46  ;;  %v3528_v46 = vld [vmem:[%s7402_s11 + $0xa8] sm:$0xff] }
 0x3c8   :  { %5198 = vmatpush3.msra.mxu0 %v4342_v33  ;;  %3593 = vmatpush1.msra.mxu1 %v3563_v32  ;;  %v3527_v32 = vld [vmem:[%s7402_s11 + $0xa0] sm:$0xff] }
 0x3c9   :  { %5199 = vmatprep.subr.mxu0 %v5259_v27  ;;  %3594 = vmatprep.subr.mxu1 %v3560_v61 }
 0x3ca   :  { %5200 = vmatpush3.msra.mxu0 %v4341_v34  ;;  %3595 = vmatpush1.msra.mxu1 %v3559_v3  ;;  %v3526_v3 = vld [vmem:[%s7402_s11 + $0x98] sm:$0xff] }
 0x3cb   :  { %5201 = vmatprep.subr.mxu0 %v5259_v27  ;;  %3596 = vmatprep.subr.mxu1 %v3556_v45  ;;  %v3525_v45 = vld [vmem:[%s7402_s11 + $0x90] sm:$0xff] }
 0x3cc   :  { %5202 = vmatpush3.msra.mxu0 %v4340_v23  ;;  %3597 = vmatpush1.msra.mxu1 %v3555_v5  ;;  %v3535_v23 = vld [vmem:[%s7402_s11 + $0xe0] sm:$0xff]  ;;  %v3522_v5 = vld [vmem:[%s7402_s11 + $0x78] sm:$0xff] }
 0x3cd   :  { %5203 = vmatprep.subr.mxu0 %v5259_v27  ;;  %3598 = vmatprep.subr.mxu1 %v3552_v53  ;;  %v3521_v53 = vld [vmem:[%s7402_s11 + $0x70] sm:$0xff] }
 0x3ce   :  { %5204 = vmatpush3.msra.mxu0 %v4339_v38  ;;  %3599 = vmatpush1.msra.mxu1 %v3551_v11  ;;  %v3537_v38 = vld [vmem:[%s7402_s11 + $0xf0] sm:$0xff]  ;;  %v3516_v11 = vld [vmem:[%s7402_s11 + $0x48] sm:$0xff] }
 0x3cf   :  { %5206 = vmatmul.mubr.msk.f32.vlgmr.msra.gmra.mxu0 %vm133_vm0, %v3340_v42  ;;  %3661 = vmatprep.subr.mxu0 %v3570_v28  ;;  %v3532_v42 = vld [vmem:[%s7402_s11 + $0xc8] sm:$0xff]  ;;  %v3531_v28 = vld [vmem:[%s7402_s11 + $0xc0] sm:$0xff] }
 0x3d0   :  { %3709 = vmatprep.mubr.f32.mxu0 %v5259_v27  ;;  %3662 = vmatpush1.msra.mxu0 %v3569_v1 }
 0x3d1   :  { %3663 = vmatprep.subr.mxu0 %v3566_v47  ;;  %3600 = vmatprep.subr.mxu1 %v3548_v14  ;;  %v3530_v47 = vld [vmem:[%s7402_s11 + $0xb8] sm:$0xff] }
 0x3d2   :  { %3664 = vmatpush1.msra.mxu0 %v3565_v0  ;;  %3601 = vmatpush1.msra.mxu1 %v3547_v6  ;;  %v3529_v0 = vld [vmem:[%s7402_s11 + $0xb0] sm:$0xff]  ;;  %v3515_v6 = vld [vmem:[%s7402_s11 + $0x40] sm:$0xff] }
 0x3d3   :  { %3665 = vmatprep.subr.mxu0 %v3562_v63  ;;  %3602 = vmatprep.subr.mxu1 %v3544_v51  ;;  %v3524_v63 = vld [vmem:[%s7402_s11 + $0x88] sm:$0xff] }
 0x3d4   :  { %3666 = vmatpush1.msra.mxu0 %v3561_v7  ;;  %3603 = vmatpush1.msra.mxu1 %v3543_v30  ;;  %v3523_v7 = vld [vmem:[%s7402_s11 + $0x80] sm:$0xff]  ;;  %v3514_v30 = vld [vmem:[%s7402_s11 + $0x38] sm:$0xff] }
 0x3d5   :  { %3667 = vmatprep.subr.mxu0 %v3558_v62  ;;  %3604 = vmatprep.subr.mxu1 %v3540_v60  ;;  %v3520_v62 = vld [vmem:[%s7402_s11 + $0x68] sm:$0xff]  ;;  %v3511_v60 = vld [vmem:[%s7402_s11 + $0x20] sm:$0xff] }
 0x3d6   :  { %3668 = vmatpush1.msra.mxu0 %v3557_v44  ;;  %3605 = vmatpush1.msra.mxu1 %v3539_v26  ;;  %v3519_v44 = vld [vmem:[%s7402_s11 + $0x60] sm:$0xff] }
 0x3d7   :  { %3669 = vmatprep.subr.mxu0 %v3554_v48  ;;  %3735 = vmatprep.subr.mxu1 %v3536_v10  ;;  %v3510_v10 = vld [vmem:[%s7402_s11 + $0x18] sm:$0xff] }
 0x3d8   :  { %3670 = vmatpush1.msra.mxu0 %v3553_v37  ;;  %v3518_v37 = vld [vmem:[%s7402_s11 + $0x58] sm:$0xff] }
 0x3d9   :  { %3671 = vmatprep.subr.mxu0 %v3550_v15  ;;  %v4348_v15 = vld [vmem:[%s7404_s8] ss:$0 sm:$0xff] }
 0x3da   :  { %3672 = vmatpush1.msra.mxu0 %v3549_v39  ;;  %v3517_v39 = vld [vmem:[%s7402_s11 + $0x50] sm:$0xff] }
 0x3db   :  { %3673 = vmatprep.subr.mxu0 %v3546_v25  ;;  %v3512_v25 = vld [vmem:[%s7402_s11 + $0x28] sm:$0xff] }
 0x3dc   :  { %3674 = vmatpush1.msra.mxu0 %v3545_v55 }
 0x3dd   :  { %3675 = vmatprep.subr.mxu0 %v3542_v18  ;;  %v3513_v18 = vld [vmem:[%s7402_s11 + $0x30] sm:$0xff] }
 0x3de   :  { %3676 = vmatpush1.msra.mxu0 %v3541_v49  ;;  %v3508_v49 = vld [vmem:[%s7402_s11 + $0x8] sm:$0xff] }
 0x3df   :  { %3806 = vmatprep.subr.mxu0 %v3538_v57  ;;  %v3862_v57 = vld [vmem:[%s7405_s13] sm:$0xff] }
 0x449   :  { %v2644_v17 = vpop.f32.mrf.mxu0  ;;  %v2731_v56 = vpop.f32.mrf.mxu1 }
 0x44a   :  { %v2732_v24 = vadd.f32 %v2731_v56, %v2644_v17  ;;  %v3507_v17 = vld [vmem:[%s7402_s11] sm:$0xff] }
 0x44b   :  { %v5055_v2 = vpop.f32.mrf.mxu0  ;;  %v5074_v20 = vpop.f32.mrf.mxu1 }
 0x44c   :  { %v3509_v2 = vld [vmem:[%s7402_s11 + $0x10] sm:$0xff]  ;;  %v3863_v20 = vld [vmem:[%s7405_s13 + $0x8] sm:$0xff] }
 0x45a   :  { %v2827_v40 = vpop.f32.mrf.mxu0  ;;  %v2924_v12 = vpop.f32.mrf.mxu1 }
 0x45b   :  { %v2831_v50 = vadd.f32 %v2827_v40, %v2732_v24  ;;  %v3866_v40 = vcombine.high %v3862_v57, %v3862_v57 }
 0x45c   :  { %v5093_v29 = vpop.f32.mrf.mxu0  ;;  %v5112_v8 = vpop.f32.mrf.mxu1 }
 0x45d   :  { %v2928_v22 = vadd.f32 %v2924_v12, %v2831_v50  ;;  %v3867_v12 = vcombine.high %v3863_v20, %v3863_v20  ;;  %v3861_v29 = vld [vmem:[%s7406_s2] sm:$0x3]  ;;  %v22_v8 = vstv %s7407_s16 }
 0x45e   :  { %23 = vst [vmem:[#allocation2] sm:$0x1] %v22_v8 }
 0x46c   :  { %v3021_v13 = vpop.f32.mrf.mxu0  ;;  %v3118_v52 = vpop.f32.mrf.mxu1 }
 0x46d   :  { %v3025_v33 = vadd.f32 %v3021_v13, %v2928_v22  ;;  %v4057_v22 = vld [vmem:[%s7409_s15] sm:$0xf] }
 0x46e   :  { %v5131_v54 = vpop.f32.mrf.mxu0  ;;  %v5150_v4 = vpop.f32.mrf.mxu1 }
 0x46f   :  { %v3122_v1 = vadd.f32 %v3118_v52, %v3025_v33  ;;  %v4031_v4 = vsub.s32 0, %v6414_v58  ;;  %v4043_v33 = vsub.s32 3, %v6414_v58 }
 0x47e   :  { %v3215_v59 = vpop.f32.mrf.mxu0  ;;  %v3312_v35 = vpop.f32.mrf.mxu1 }
 0x47f   :  { %v3219_v61 = vadd.f32 %v3215_v59, %v3122_v1  ;;  %v4027_v59 = vld [vmem:[%s7408_s14] sm:$0xf] }
 0x480   :  { %v5169_v9 = vpop.f32.mrf.mxu0  ;;  %v5188_v21 = vpop.f32.mrf.mxu1 }
 0x481   :  { %v3316_v48 = vadd.f32 %v3312_v35, %v3219_v61  ;;  %v4035_v35 = vsub.s32 1, %v6414_v58 }
 0x482   :  { %v3502_v16 = vpop.f32.mrf.mxu1 }
 0x483   :  { %v3503_v31 = vadd.f32 %v4349_v41, %v3502_v16  ;;  %v4032_v41 = vrot.slane %v4027_v59, %v4031_v4  ;;  %v4039_v16 = vsub.s32 2, %v6414_v58 }
 0x484   :  { %v5212_v34 = vpop.f32.mrf.mxu1 }
 0x485   :  { %v3506_v36 = vmax.f32 %v3503_v31, 0.0 }
 0x487   :  { %4351 = vmatmul.mubr.msk.f32.vlgmr.msra.gmra.mxu1 %vm133_vm0, %v3506_v36  ;;  %4352 = vmatmul.mubr.msk.f32.vlgmr.msra.gmra.mxu0 %vm133_vm0, %v3506_v36 }
 0x488   :  { %3736 = vmatpush1.msra.mxu1 %v3535_v23  ;;  %3807 = vmatpush1.msra.mxu0 %v3537_v38  ;;  %v4036_v23 = vrot.slane %v4027_v59, %v4035_v35 }
 0x489   :  { %3737 = vmatprep.subr.mxu1 %v3532_v42  ;;  %3808 = vmatprep.subr.mxu0 %v3534_v43  ;;  %v4062_v42 = vrot.slane %v4057_v22, %v4031_v4 }
 0x48a   :  { %3738 = vmatpush1.msra.mxu1 %v3531_v28  ;;  %3809 = vmatpush1.msra.mxu0 %v3533_v19 }
 0x48b   :  { %3739 = vmatprep.subr.mxu1 %v3528_v46  ;;  %3810 = vmatprep.subr.mxu0 %v3530_v47  ;;  %v4040_v46 = vrot.slane %v4027_v59, %v4039_v16  ;;  %v4066_v47 = vrot.slane %v4057_v22, %v4035_v35 }
 0x48c   :  { %3740 = vmatpush1.msra.mxu1 %v3527_v32  ;;  %3811 = vmatpush1.msra.mxu0 %v3529_v0  ;;  %v4044_v0 = vrot.slane %v4027_v59, %v4043_v33 }
 0x48d   :  { %3741 = vmatprep.subr.mxu1 %v3524_v63  ;;  %3812 = vmatprep.subr.mxu0 %v3526_v3 }
 0x48e   :  { %3742 = vmatpush1.msra.mxu1 %v3523_v7  ;;  %3813 = vmatpush1.msra.mxu0 %v3525_v45  ;;  %v4070_v45 = vrot.slane %v4057_v22, %v4039_v16 }
 0x48f   :  { %v3409_v14 = vpop.f32.mrf.mxu0  ;;  %3743 = vmatprep.subr.mxu1 %v3520_v62  ;;  %3814 = vmatprep.subr.mxu0 %v3522_v5 }
 0x490   :  { %v3413_v51 = vadd.f32 %v3409_v14, %v3316_v48  ;;  %3744 = vmatpush1.msra.mxu1 %v3519_v44  ;;  %3815 = vmatpush1.msra.mxu0 %v3521_v53  ;;  %v4074_v14 = vrot.slane %v4057_v22, %v4043_v33 }
 0x491   :  { %v5207_v55 = vpop.f32.mrf.mxu0  ;;  %3745 = vmatprep.subr.mxu1 %v3516_v11  ;;  %3816 = vmatprep.subr.mxu0 %v3518_v37 }
 0x492   :  { %v3421_v26 = vadd.f32 %v4348_v15, %v3413_v51  ;;  %3746 = vmatpush1.msra.mxu1 %v3515_v6  ;;  %3817 = vmatpush1.msra.mxu0 %v3517_v39 }
 0x493   :  { %3747 = vmatprep.subr.mxu1 %v3512_v25  ;;  %3818 = vmatprep.subr.mxu0 %v3514_v30 }
 0x494   :  { %v3422_v56 = vmax.f32 %v3421_v26, 0.0  ;;  %3748 = vmatpush1.msra.mxu1 %v3511_v60  ;;  %3819 = vmatpush1.msra.mxu0 %v3513_v18 }
 0x495   :  { %3749 = vmatprep.subr.mxu1 %v3508_v49  ;;  %3820 = vmatprep.subr.mxu0 %v3510_v10  ;;  %v5262_v49 = vmov 0   ;;  %v4361_v10 = vld [vmem:[#allocation2] ss:$0 sm:$0xff] }
 0x496   :  { %3750 = vmatpush1.msra.mxu1 %v3507_v17  ;;  %3783 = vmatprep.mubr.f32.mxu1 %v5259_v27 }
 0x497   :  { %3821 = vmatpush1.msra.mxu0 %v3509_v2  ;;  %3854 = vmatprep.mubr.f32.mxu0 %v5259_v27 }
 0x498   :  { %4353 = vmatmul.mubr.msk.f32.vlgmr.msra.gmra.mxu1 %vm133_vm0, %v3422_v56  ;;  %4354 = vmatmul.mubr.msk.f32.vlgmr.msra.gmra.mxu0 %vm133_vm0, %v3422_v56 }
 0x499   :  { %4355 = vmatprep.subr.msk.mxu1 %vm3872_vm7, %v3866_v40  ;;  %3945 = vmatprep.mubr.f32.mxu1 %v5259_v27 }
 0x49a   :  { %4356 = vmatpush1.msk.msra.mxu1 %vm3872_vm7, %v3862_v57  ;;  %5219 = vset.pattern.permute.xlu1 %v5262_v49 }
 0x49b   :  { %4358 = vmatprep.subr.msk.mxu1 %vm3872_vm7, %v3867_v12  ;;  %5220 = vset.pattern.permute.xlu0 %v5262_v49 }
 0x49c   :  { %4357 = vmatmul.mubr.msk.f32.vlgmr.msra.gmra.mxu1 %vm3868_vm8, %v3861_v29 }
 0x49d   :  { %4359 = vmatpush1.msk.msra.mxu1 %vm3872_vm7, %v3863_v20  ;;  %4016 = vmatprep.mubr.f32.mxu1 %v5259_v27 }
 0x4a0   :  { %4360 = vmatmul.mubr.msk.f32.vlgmr.msra.gmra.mxu1 %vm3868_vm8, %v3861_v29 }
 0x547   :  { %v3640_v13 = vpop.f32.mrf.mxu1  ;;  %v3711_v52 = vpop.f32.mrf.mxu0 }
 0x549   :  { %v3642_v54 = vpop.f32.mrf.mxu1  ;;  %v3713_v24 = vpop.f32.mrf.mxu0 }
 0x558   :  { %v3785_v50 = vpop.f32.mrf.mxu1  ;;  %v3856_v27 = vpop.f32.mrf.mxu0 }
 0x559   :  { %v3786_v21 = vadd.f32 %v3785_v50, %v3640_v13  ;;  %v3857_v28 = vadd.f32 %v3856_v27, %v3711_v52 }
 0x55a   :  { %v3787_v9 = vpop.f32.mrf.mxu1  ;;  %v3858_v38 = vpop.f32.mrf.mxu0 }
 0x55b   :  { %v3788_v34 = vadd.f32 %v3787_v9, %v3642_v54  ;;  %v3859_v61 = vadd.f32 %v3858_v38, %v3713_v24 }
 0x55c   :  { %v3947_v31 = vpop.f32.mrf.mxu1 }
 0x55d   :  { %v4023_v36 = vadd.f32 %v3947_v31, %v3786_v21 }
 0x55e   :  { %v3949_v43 = vpop.f32.mrf.mxu1 }
 0x55f   :  { %v4049_v19 = vadd.f32 %v4032_v41, %v4023_v36  ;;  %v4024_v1 = vadd.f32 %v3949_v43, %v3788_v34 }
 0x560   :  { %v4018_v32 = vpop.f32.mrf.mxu1 }
 0x561   :  { %v4053_v63 = vmax.f32 %v4049_v19, 0.0  ;;  %v4050_v3 = vadd.f32 %v4036_v23, %v4024_v1  ;;  %v4025_v7 = vadd.f32 %v4018_v32, %v3857_v28 }
 0x562   :  { %v4020_v62 = vpop.f32.mrf.mxu1 }
 0x563   :  { %v4079_v58 = vmul.f32 %v4062_v42, %v4053_v63  ;;  %v4054_v5 = vmax.f32 %v4050_v3, 0.0  ;;  %v4051_v44 = vadd.f32 %v4040_v46, %v4025_v7  ;;  %v4026_v53 = vadd.f32 %v4020_v62, %v3859_v61 }
 0x565   :  { %v4080_v48 = vmul.f32 %v4066_v47, %v4054_v5  ;;  %v4055_v11 = vmax.f32 %v4051_v44, 0.0  ;;  %v4052_v37 = vadd.f32 %v4044_v0, %v4026_v53  ;;  %v4084_v39 = vsel %vm4083_vm9, %v4079_v58, 0.0 }
 0x567   :  { %v4081_v15 = vmul.f32 %v4070_v45, %v4055_v11  ;;  %v4056_v6 = vmax.f32 %v4052_v37, 0.0  ;;  %v4085_v51 = vsel %vm4083_vm9, %v4080_v48, 0.0 }
 0x568   :  { %v4086_v25 = vadd.f32 %v4085_v51, %v4084_v39 }
 0x569   :  { %v4082_v30 = vmul.f32 %v4074_v14, %v4056_v6  ;;  %v4087_v55 = vsel %vm4083_vm9, %v4081_v15, 0.0 }
 0x56a   :  { %v4088_v60 = vadd.f32 %v4087_v55, %v4086_v25 }
 0x56b   :  { %v4089_v18 = vsel %vm4083_vm9, %v4082_v30, 0.0 }
 0x56c   :  { %v4090_v26 = vadd.f32 %v4089_v18, %v4088_v60 }
 0x56e   :  { %4091 = vadd.xlane.f32.xlu0 %v4090_v26 }
 0x5f7   :  { %v4092_v57 = vpop.xlane.xlu0 %4091 }
 0x5f8   :  { %v4100_v17 = vadd.f32 %v4361_v10, %v4092_v57 }
 0x5fa   :  { %4103 = vperm.xlu1 %5219, %v4100_v17  }
 0x675   :  { %v4104_v56 = vpop.permute.xlu1 %4103 }
 0x676   :  { %4106 = vst [vmem:[%s7410_s17] sm:$0x3] %v4104_v56 }

</bundles_post_ra>
